<compile_context>
chip_gen: v7x
topology: tpu7x:2x2x1
jax: 0.10.0
libtpu: 0.0.40
codegen_flags: <defaults>
</compile_context>

<pallas_src>
import math
import functools

import jax
import jax.numpy as jnp
from jax.experimental import pallas as pl
from jax.experimental.pallas import tpu as pltpu

# ----------------------------- demo sizes (small) -----------------------------
B = 16                       # batch (2 grid steps of 8 -> megacore-friendly on v7x)
C_IN, H, W = 4, 16, 16
HW = H * W
K_H = K_W = 3
C_OUT = 128                  # conv output channels (lane-dense)
FEAT_DIM = 128               # embedding dim (lane-dense)
NUM_CLASSES = 512            # identities (one lane-dense head tile per step)
ARC_S, ARC_M = 32.0, 0.5

K_RAW = C_IN * K_H * K_W     # 36
K_PAD = 48                   # rounded up to bf16 sublane pack (16); weight padded at init
TILE_B = 8                   # samples per grid step

_COS_M, _SIN_M = math.cos(ARC_M), math.sin(ARC_M)
_TH = math.cos(math.pi - ARC_M)
_MM = math.sin(math.pi - ARC_M) * ARC_M


# ----------------------------- im2col glue (XLA) ------------------------------
def _im2col_3x3(x):
    """NCHW -> [B, H*W, C_IN*9]; flattening order (cin, kh, kw) matches
    PyTorch Conv2d weight.reshape(C_out, -1)."""
    b, c, h, w = x.shape
    xp = jnp.pad(x, ((0, 0), (0, 0), (1, 1), (1, 1)))
    taps = [xp[:, :, i:i + h, j:j + w] for i in range(3) for j in range(3)]
    patches = jnp.stack(taps, axis=2)            # [B, C, 9, H, W]
    patches = patches.transpose(0, 3, 4, 1, 2)   # [B, H, W, C, 9]
    return patches.reshape(b, h * w, c * 9)


# --------------------------- fused FaceModel kernel ----------------------------
def _face_kernel(patch_ref, wc_ref, bc_ref, wfc_ref, bfc_ref, warc_ref, lbl_ref,
                 feat_ref, logits_ref):
    """One grid step = tile_b samples:
       conv-as-matmul -> bias+ReLU -> global avg pool -> FC -> feat store
       -> L2 norm (feat & class weights) -> cosine logits -> ArcFace margin -> logits store.
    """
    tb = feat_ref.shape[0]                      # samples in this step
    hw = patch_ref.shape[0] // tb               # spatial positions per sample
    c_out = wc_ref.shape[1]

    # conv: bf16 operands straight from HBM-resident bf16 tensors, f32 MXU accumulation.
    conv = jnp.dot(patch_ref[...], wc_ref[...], preferred_element_type=jnp.float32)
    act = jnp.maximum(conv + bc_ref[...], 0.0)                    # bias + ReLU (f32)
    # global average pool: tile-aligned sublane-split reshape + reduce over HW.
    pooled = jnp.mean(act.reshape(tb, hw, c_out), axis=1)         # (tb, C_OUT) f32
    feat = jnp.dot(pooled.astype(jnp.bfloat16), wfc_ref[...],
                   preferred_element_type=jnp.float32) + bfc_ref[...]
    feat_ref[...] = feat                                          # single (8,128) store

    # ArcFace head (fused; normalization runs once per step, not once per class tile).
    fhat = feat * jax.lax.rsqrt(jnp.sum(feat * feat, axis=1, keepdims=True) + 1e-6)
    w = warc_ref[...]                                             # f32 for norm precision
    what = w * jax.lax.rsqrt(jnp.sum(w * w, axis=0, keepdims=True) + 1e-6)
    cos = jnp.dot(fhat.astype(jnp.bfloat16), what.astype(jnp.bfloat16),
                  preferred_element_type=jnp.float32)
    cos = jnp.clip(cos, -1.0 + 1e-6, 1.0 - 1e-6)
    sin = jnp.sqrt(jnp.maximum(1.0 - cos * cos, 1e-12))
    phi = cos * _COS_M - sin * _SIN_M
    phi = jnp.where(cos > _TH, phi, cos - _MM)                    # theta+m > pi fallback
    # target-class select: iota over the full class range vs (tb,1) label column (VMEM).
    cols = jax.lax.broadcasted_iota(jnp.int32, cos.shape, 1)
    logits_ref[...] = ARC_S * jnp.where(cols == lbl_ref[...], phi, cos)   # single (8,512) store


def face_forward_fused(patches2d, wc_mat, bc, wfc_mat, bfc, w_arc, labels,
                       *, tile_b=TILE_B):
    bhw, kp = patches2d.shape
    b = labels.shape[0]
    hw = bhw // b
    c_out = wc_mat.shape[1]
    feat_dim = wfc_mat.shape[1]
    num_classes = w_arc.shape[1]
    assert b % tile_b == 0
    n_steps = b // tile_b           # 2 parallel steps -> both TCs busy on v7x

    grid_spec = pltpu.PrefetchScalarGridSpec(
        num_scalar_prefetch=0,
        grid=(n_steps,),
        in_specs=[
            pl.BlockSpec((tile_b * hw, kp), lambda i: (i, 0)),       # patches (bf16)
            pl.BlockSpec((kp, c_out), lambda i: (0, 0)),             # conv weight (bf16)
            pl.BlockSpec((1, c_out), lambda i: (0, 0)),              # conv bias (f32)
            pl.BlockSpec((c_out, feat_dim), lambda i: (0, 0)),       # FC weight (bf16)
            pl.BlockSpec((1, feat_dim), lambda i: (0, 0)),           # FC bias (f32)
            pl.BlockSpec((feat_dim, num_classes), lambda i: (0, 0)), # ArcFace kernel (f32)
            pl.BlockSpec((tile_b, 1), lambda i: (i, 0)),             # labels (int32, VMEM)
        ],
        out_specs=[
            pl.BlockSpec((tile_b, feat_dim), lambda i: (i, 0)),
            pl.BlockSpec((tile_b, num_classes), lambda i: (i, 0)),
        ],
    )
    feat, logits = pl.pallas_call(
        _face_kernel,
        out_shape=(jax.ShapeDtypeStruct((b, feat_dim), jnp.float32),
                   jax.ShapeDtypeStruct((b, num_classes), jnp.float32)),
        grid_spec=grid_spec,
        compiler_params=pltpu.CompilerParams(
            dimension_semantics=("parallel",),
            vmem_limit_bytes=32 * 1024 * 1024,
        ),
    )(patches2d, wc_mat, bc.reshape(1, c_out), wfc_mat, bfc.reshape(1, feat_dim),
      w_arc, labels.reshape(b, 1).astype(jnp.int32))
    return feat, logits


# ----------------------------- FaceModel.forward ------------------------------
@functools.partial(jax.jit, static_argnames=("status",))
def face_model_forward(params, data, label, status="train"):
    # TODO(synk): gather the 3x3 windows in-kernel (memory_space=pl.ANY + manual DMA)
    # to avoid materializing the im2col patches tensor in HBM at all.
    patches = _im2col_3x3(data)                                       # (B, HW, 36) f32
    patches = jnp.pad(patches, ((0, 0), (0, 0), (0, K_PAD - K_RAW)))  # 36 -> 48 only
    patches = patches.reshape(-1, K_PAD).astype(jnp.bfloat16)         # batch folded into M
    feat, logits = face_forward_fused(patches, params["wc_mat"], params["bc"],
                                      params["wfc_mat"], params["bfc"],
                                      params["w_arc"], label)
    if status == "eval":
        # TODO(synk): a head-free backbone-only variant would skip the (tiny) head work.
        return feat
    return logits


# ----------------------------- params & reference -----------------------------
def init_params(key):
    k1, k2, k3, k4, k5, k6 = jax.random.split(key, 6)
    wc_t = 0.1 * jax.random.normal(k1, (C_OUT, C_IN, K_H, K_W), jnp.float32)  # torch Conv2d weight
    bc = 0.05 * jax.random.normal(k2, (C_OUT,), jnp.float32)
    wfc_t = 0.1 * jax.random.normal(k3, (FEAT_DIM, C_OUT), jnp.float32)       # torch Linear weight
    bfc = 0.05 * jax.random.normal(k4, (FEAT_DIM,), jnp.float32)
    w_arc = jax.random.normal(k5, (FEAT_DIM, NUM_CLASSES), jnp.float32)       # ArcFace kernel
    # matmul-ready, pre-cast layouts (K padded once, bf16 once, at weight-prep time)
    wc_mat = jnp.pad(wc_t.reshape(C_OUT, K_RAW).T,
                     ((0, K_PAD - K_RAW), (0, 0))).astype(jnp.bfloat16)
    wfc_mat = wfc_t.T.astype(jnp.bfloat16)
    return dict(wc_t=wc_t, bc=bc, wfc_t=wfc_t, bfc=bfc, w_arc=w_arc,
                wc_mat=wc_mat, wfc_mat=wfc_mat), k6


def ref_forward(params, data, label):
    """Pure-JAX reference matching the kernel arithmetic (bf16 MXU operands, f32 elsewhere)."""
    bf16 = jnp.bfloat16
    patches = jnp.pad(_im2col_3x3(data), ((0, 0), (0, 0), (0, K_PAD - K_RAW)))
    b, hw, kp = patches.shape
    conv = jnp.dot(patches.reshape(b * hw, kp).astype(bf16), params["wc_mat"],
                   preferred_element_type=jnp.float32).reshape(b, hw, C_OUT)
    conv = jnp.maximum(conv + params["bc"][None, None, :], 0.0)
    pooled = jnp.mean(conv, axis=1)
    feat = jnp.dot(pooled.astype(bf16), params["wfc_mat"],
                   preferred_element_type=jnp.float32) + params["bfc"][None, :]
    fhat = feat * jax.lax.rsqrt(jnp.sum(feat * feat, axis=1, keepdims=True) + 1e-6)
    w = params["w_arc"]
    what = w * jax.lax.rsqrt(jnp.sum(w * w, axis=0, keepdims=True) + 1e-6)
    cos = jnp.dot(fhat.astype(bf16), what.astype(bf16), preferred_element_type=jnp.float32)
    cos = jnp.clip(cos, -1.0 + 1e-6, 1.0 - 1e-6)
    sin = jnp.sqrt(jnp.maximum(1.0 - cos * cos, 1e-12))
    phi = cos * _COS_M - sin * _SIN_M
    phi = jnp.where(cos > _TH, phi, cos - _MM)
    onehot = label[:, None] == jnp.arange(NUM_CLASSES)[None, :]
    logits = ARC_S * jnp.where(onehot, phi, cos)
    return feat, logits


# ----------------------------------- main --------------------------------------
if __name__ == "__main__":
    key = jax.random.PRNGKey(0)
    params, key = init_params(key)
    kx, kl = jax.random.split(key)
    data = jax.random.normal(kx, (B, C_IN, H, W), jnp.float32)
    label = jax.random.randint(kl, (B,), 0, NUM_CLASSES, dtype=jnp.int32)

    # sanity: im2col flattening order matches a real conv (f32, highest precision)
    conv_lax = jax.lax.conv_general_dilated(
        data, params["wc_t"], window_strides=(1, 1), padding="SAME",
        dimension_numbers=("NCHW", "OIHW", "NCHW"),
        precision=jax.lax.Precision.HIGHEST)
    conv_lax = conv_lax.transpose(0, 2, 3, 1).reshape(B, HW, C_OUT)
    conv_im2col = jnp.einsum("bpk,ok->bpo", _im2col_3x3(data),
                             params["wc_t"].reshape(C_OUT, K_RAW),
                             precision=jax.lax.Precision.HIGHEST)
    assert jnp.allclose(conv_lax, conv_im2col, atol=1e-3, rtol=1e-3), "im2col order mismatch"

    # run the fused Pallas forward (train: logits; eval: embeddings)
    logits = face_model_forward(params, data, label, status="train")
    feat = face_model_forward(params, data, label, status="eval")
    jax.block_until_ready((logits, feat))

    # verify against the pure-JAX reference
    ref_feat, ref_logits = ref_forward(params, data, label)
    assert jnp.allclose(feat, ref_feat, atol=1e-2, rtol=1e-2), "feat mismatch"
    assert jnp.allclose(logits, ref_logits, atol=5e-2, rtol=5e-2), "logits mismatch"

    print("KERNEL_OK")
</pallas_src>

<mosaic_0001>
module attributes {stable_mosaic.version = 11 : i64} {
  func.func @_face_kernel(%arg0: i32, %arg1: memref<2048x48xbf16, #tpu.memory_space<vmem>>, %arg2: memref<48x128xbf16, #tpu.memory_space<vmem>>, %arg3: memref<1x128xf32, #tpu.memory_space<vmem>>, %arg4: memref<128x128xbf16, #tpu.memory_space<vmem>>, %arg5: memref<1x128xf32, #tpu.memory_space<vmem>>, %arg6: memref<128x512xf32, #tpu.memory_space<vmem>>, %arg7: memref<8x1xi32, #tpu.memory_space<vmem>>, %arg8: memref<8x128xf32, #tpu.memory_space<vmem>>, %arg9: memref<8x512xf32, #tpu.memory_space<vmem>>) attributes {dimension_semantics = [#tpu.dimension_semantics<parallel>], iteration_bounds = array<i64: 2>, scalar_prefetch = 0 : i64, scratch_operands = 0 : i64, tpu.core_type = #tpu.core_type<tc>, window_params = [{transform_indices = @transform_0, window_bounds = array<i64: 2048, 48>}, {pipeline_mode = #tpu.pipeline_mode<synchronous>, transform_indices = @transform_1, window_bounds = array<i64: 48, 128>}, {pipeline_mode = #tpu.pipeline_mode<synchronous>, transform_indices = @transform_2, window_bounds = array<i64: 1, 128>}, {pipeline_mode = #tpu.pipeline_mode<synchronous>, transform_indices = @transform_3, window_bounds = array<i64: 128, 128>}, {pipeline_mode = #tpu.pipeline_mode<synchronous>, transform_indices = @transform_4, window_bounds = array<i64: 1, 128>}, {pipeline_mode = #tpu.pipeline_mode<synchronous>, transform_indices = @transform_5, window_bounds = array<i64: 128, 512>}, {transform_indices = @transform_6, window_bounds = array<i64: 8, 1>}, {transform_indices = @transform_7, window_bounds = array<i64: 8, 128>}, {transform_indices = @transform_8, window_bounds = array<i64: 8, 512>}]} {
    %c0 = arith.constant 0 : index
    %c0_0 = arith.constant 0 : index
    %0 = vector.load %arg1[%c0, %c0_0] : memref<2048x48xbf16, #tpu.memory_space<vmem>>, vector<2048x48xbf16>
    %c0_1 = arith.constant 0 : index
    %c0_2 = arith.constant 0 : index
    %1 = vector.load %arg2[%c0_1, %c0_2] : memref<48x128xbf16, #tpu.memory_space<vmem>>, vector<48x128xbf16>
    %cst = arith.constant dense<0.000000e+00> : vector<2048x128xf32>
    %2 = tpu.matmul %0, %1, %cst {dimension_numbers = #tpu.dot_dimension_numbers<[1], [0], [0], [1], [0, 0, 1, 1], [], []>} : vector<2048x48xbf16>, vector<48x128xbf16>, vector<2048x128xf32> -> vector<2048x128xf32>
    %c0_3 = arith.constant 0 : index
    %c0_4 = arith.constant 0 : index
    %3 = vector.load %arg3[%c0_3, %c0_4] : memref<1x128xf32, #tpu.memory_space<vmem>>, vector<1x128xf32>
    %4 = vector.broadcast %3 : vector<1x128xf32> to vector<2048x128xf32>
    %5 = arith.addf %2, %4 : vector<2048x128xf32>
    %cst_5 = arith.constant 0.000000e+00 : f32
    %6 = vector.broadcast %cst_5 : f32 to vector<2048x128xf32>
    %7 = arith.maximumf %5, %6 : vector<2048x128xf32>
    %8 = vector.shape_cast %7 : vector<2048x128xf32> to vector<8x256x128xf32>
    %cst_6 = arith.constant dense<0.000000e+00> : vector<8x128xf32>
    %9 = vector.multi_reduction <add>, %8, %cst_6 [1] : vector<8x256x128xf32> to vector<8x128xf32>
    %cst_7 = arith.constant 2.560000e+02 : f32
    %10 = vector.broadcast %cst_7 : f32 to vector<8x128xf32>
    %11 = arith.divf %9, %10 : vector<8x128xf32>
    %12 = arith.truncf %11 : vector<8x128xf32> to vector<8x128xbf16>
    %c0_8 = arith.constant 0 : index
    %c0_9 = arith.constant 0 : index
    %13 = vector.load %arg4[%c0_8, %c0_9] : memref<128x128xbf16, #tpu.memory_space<vmem>>, vector<128x128xbf16>
    %cst_10 = arith.constant dense<0.000000e+00> : vector<8x128xf32>
    %14 = tpu.matmul %12, %13, %cst_10 {dimension_numbers = #tpu.dot_dimension_numbers<[1], [0], [0], [1], [0, 0, 1, 1], [], []>} : vector<8x128xbf16>, vector<128x128xbf16>, vector<8x128xf32> -> vector<8x128xf32>
    %c0_11 = arith.constant 0 : index
    %c0_12 = arith.constant 0 : index
    %15 = vector.load %arg5[%c0_11, %c0_12] : memref<1x128xf32, #tpu.memory_space<vmem>>, vector<1x128xf32>
    %16 = vector.broadcast %15 : vector<1x128xf32> to vector<8x128xf32>
    %17 = arith.addf %14, %16 : vector<8x128xf32>
    %c0_13 = arith.constant 0 : index
    %c0_14 = arith.constant 0 : index
    %18 = vector.load %arg8[%c0_13, %c0_14] : memref<8x128xf32, #tpu.memory_space<vmem>>, vector<8x128xf32>
    tpu.vector_store %arg8[%c0_13, %c0_14], %17 {strides = array<i32>} : memref<8x128xf32, #tpu.memory_space<vmem>>, vector<8x128xf32>,
    %19 = arith.mulf %17, %17 : vector<8x128xf32>
    %cst_15 = arith.constant dense<0.000000e+00> : vector<8xf32>
    %20 = vector.multi_reduction <add>, %19, %cst_15 [1] : vector<8x128xf32> to vector<8xf32>
    %21 = vector.shape_cast %20 : vector<8xf32> to vector<8x1xf32>
    %cst_16 = arith.constant 9.99999997E-7 : f32
    %22 = vector.broadcast %cst_16 : f32 to vector<8x1xf32>
    %23 = arith.addf %21, %22 : vector<8x1xf32>
    %24 = math.rsqrt %23 : vector<8x1xf32>
    %25 = vector.broadcast %24 : vector<8x1xf32> to vector<8x128xf32>
    %26 = arith.mulf %17, %25 : vector<8x128xf32>
    %c0_17 = arith.constant 0 : index
    %c0_18 = arith.constant 0 : index
    %27 = vector.load %arg6[%c0_17, %c0_18] : memref<128x512xf32, #tpu.memory_space<vmem>>, vector<128x512xf32>
    %28 = arith.mulf %27, %27 : vector<128x512xf32>
    %cst_19 = arith.constant dense<0.000000e+00> : vector<512xf32>
    %29 = vector.multi_reduction <add>, %28, %cst_19 [0] : vector<128x512xf32> to vector<512xf32>
    %30 = vector.shape_cast %29 : vector<512xf32> to vector<1x512xf32>
    %cst_20 = arith.constant 9.99999997E-7 : f32
    %31 = vector.broadcast %cst_20 : f32 to vector<1x512xf32>
    %32 = arith.addf %30, %31 : vector<1x512xf32>
    %33 = math.rsqrt %32 : vector<1x512xf32>
    %34 = vector.broadcast %33 : vector<1x512xf32> to vector<128x512xf32>
    %35 = arith.mulf %27, %34 : vector<128x512xf32>
    %36 = arith.truncf %26 : vector<8x128xf32> to vector<8x128xbf16>
    %37 = arith.truncf %35 : vector<128x512xf32> to vector<128x512xbf16>
    %cst_21 = arith.constant dense<0.000000e+00> : vector<8x512xf32>
    %38 = tpu.matmul %36, %37, %cst_21 {dimension_numbers = #tpu.dot_dimension_numbers<[1], [0], [0], [1], [0, 0, 1, 1], [], []>} : vector<8x128xbf16>, vector<128x512xbf16>, vector<8x512xf32> -> vector<8x512xf32>
    %cst_22 = arith.constant -0.999998986 : f32
    %cst_23 = arith.constant 0.999998986 : f32
    %39 = vector.broadcast %cst_22 : f32 to vector<8x512xf32>
    %40 = arith.maximumf %39, %38 : vector<8x512xf32>
    %41 = vector.broadcast %cst_23 : f32 to vector<8x512xf32>
    %42 = arith.minimumf %41, %40 : vector<8x512xf32>
    %43 = arith.mulf %42, %42 : vector<8x512xf32>
    %cst_24 = arith.constant 1.000000e+00 : f32
    %44 = vector.broadcast %cst_24 : f32 to vector<8x512xf32>
    %45 = arith.subf %44, %43 : vector<8x512xf32>
    %cst_25 = arith.constant 9.99999996E-13 : f32
    %46 = vector.broadcast %cst_25 : f32 to vector<8x512xf32>
    %47 = arith.maximumf %45, %46 : vector<8x512xf32>
    %48 = math.sqrt %47 : vector<8x512xf32>
    %cst_26 = arith.constant 0.87758255 : f32
    %49 = vector.broadcast %cst_26 : f32 to vector<8x512xf32>
    %50 = arith.mulf %42, %49 : vector<8x512xf32>
    %cst_27 = arith.constant 0.47942555 : f32
    %51 = vector.broadcast %cst_27 : f32 to vector<8x512xf32>
    %52 = arith.mulf %48, %51 : vector<8x512xf32>
    %53 = arith.subf %50, %52 : vector<8x512xf32>
    %cst_28 = arith.constant -0.87758255 : f32
    %54 = vector.broadcast %cst_28 : f32 to vector<8x512xf32>
    %55 = arith.cmpf ogt, %42, %54 : vector<8x512xf32>
    %cst_29 = arith.constant 0.239712775 : f32
    %56 = vector.broadcast %cst_29 : f32 to vector<8x512xf32>
    %57 = arith.subf %42, %56 : vector<8x512xf32>
    %58 = arith.select %55, %53, %57 : vector<8x512xi1>, vector<8x512xf32>
    %59 = tpu.iota {dimensions = array<i32: 1>} : vector<8x512xi32>
    %c0_30 = arith.constant 0 : index
    %c0_31 = arith.constant 0 : index
    %60 = vector.load %arg7[%c0_30, %c0_31] : memref<8x1xi32, #tpu.memory_space<vmem>>, vector<8x1xi32>
    %61 = vector.broadcast %60 : vector<8x1xi32> to vector<8x512xi32>
    %62 = arith.cmpi eq, %59, %61 : vector<8x512xi32>
    %63 = arith.select %62, %58, %42 : vector<8x512xi1>, vector<8x512xf32>
    %cst_32 = arith.constant 3.200000e+01 : f32
    %64 = vector.broadcast %cst_32 : f32 to vector<8x512xf32>
    %65 = arith.mulf %64, %63 : vector<8x512xf32>
    %c0_33 = arith.constant 0 : index
    %c0_34 = arith.constant 0 : index
    %66 = vector.load %arg9[%c0_33, %c0_34] : memref<8x512xf32, #tpu.memory_space<vmem>>, vector<8x512xf32>
    tpu.vector_store %arg9[%c0_33, %c0_34], %65 {strides = array<i32>} : memref<8x512xf32, #tpu.memory_space<vmem>>, vector<8x512xf32>,
    return
  }
  func.func @transform_0(%arg0: i32) -> (i32, i32) {
    %c0_i32 = arith.constant 0 : i32
    %c0_i32_0 = arith.constant 0 : i32
    return %arg0, %c0_i32 : i32, i32
  }
  func.func @transform_1(%arg0: i32) -> (i32, i32) {
    %c0_i32 = arith.constant 0 : i32
    %c0_i32_0 = arith.constant 0 : i32
    %c0_i32_1 = arith.constant 0 : i32
    return %c0_i32, %c0_i32_0 : i32, i32
  }
  func.func @transform_2(%arg0: i32) -> (i32, i32) {
    %c0_i32 = arith.constant 0 : i32
    %c0_i32_0 = arith.constant 0 : i32
    %c0_i32_1 = arith.constant 0 : i32
    return %c0_i32, %c0_i32_0 : i32, i32
  }
  func.func @transform_3(%arg0: i32) -> (i32, i32) {
    %c0_i32 = arith.constant 0 : i32
    %c0_i32_0 = arith.constant 0 : i32
    %c0_i32_1 = arith.constant 0 : i32
    return %c0_i32, %c0_i32_0 : i32, i32
  }
  func.func @transform_4(%arg0: i32) -> (i32, i32) {
    %c0_i32 = arith.constant 0 : i32
    %c0_i32_0 = arith.constant 0 : i32
    %c0_i32_1 = arith.constant 0 : i32
    return %c0_i32, %c0_i32_0 : i32, i32
  }
  func.func @transform_5(%arg0: i32) -> (i32, i32) {
    %c0_i32 = arith.constant 0 : i32
    %c0_i32_0 = arith.constant 0 : i32
    %c0_i32_1 = arith.constant 0 : i32
    return %c0_i32, %c0_i32_0 : i32, i32
  }
  func.func @transform_6(%arg0: i32) -> (i32, i32) {
    %c0_i32 = arith.constant 0 : i32
    %c0_i32_0 = arith.constant 0 : i32
    return %arg0, %c0_i32 : i32, i32
  }
  func.func @transform_7(%arg0: i32) -> (i32, i32) {
    %c0_i32 = arith.constant 0 : i32
    %c0_i32_0 = arith.constant 0 : i32
    return %arg0, %c0_i32 : i32, i32
  }
  func.func @transform_8(%arg0: i32) -> (i32, i32) {
    %c0_i32 = arith.constant 0 : i32
    %c0_i32_0 = arith.constant 0 : i32
    return %arg0, %c0_i32 : i32, i32
  }
}

</mosaic_0001>

<bundles_post_ra>
// kernel: face_model_forward.1
= control target key start
LH: loop header
LB: loop body
LE: loop exit
PB: predicated region body
PF: predicated region fallthrough
CT: control target
= control target key end

     0   :  { %14 = vsyncpa [#allocation3], 0  ;;  %s6491_s0 = inlined_call_operand.vmem [shape: bf16[4096,48], index: 0, kind: input, shape index: {}]   ;;  %s6492_s1 = inlined_call_operand.vmem [shape: bf16[48,128], index: 1, kind: input, shape index: {}]   ;;  %s6493_s2 = inlined_call_operand.vmem [shape: f32[1,128], index: 2, kind: input, shape index: {}]   ;;  %s6494_s3 = inlined_call_operand.vmem [shape: bf16[128,128], index: 3, kind: input, shape index: {}]   ;;  %s6495_s4 = inlined_call_operand.vmem [shape: f32[1,128], index: 4, kind: input, shape index: {}]   ;;  %s6496_s5 = inlined_call_operand.vmem [shape: f32[128,512], index: 5, kind: input, shape index: {}]   ;;  %s6497_s6 = inlined_call_operand.vmem [shape: s32[16,1], index: 6, kind: input, shape index: {}]   ;;  %s6498_s7 = inlined_call_operand.hbm [shape: f32[16,128], index: 7, kind: output, shape index: {0}]   ;;  %s6499_s8 = inlined_call_operand.hbm [shape: f32[16,512], index: 8, kind: output, shape index: {1}]  }
   0x1   :  { %16 = vsyncpa [#allocation3 + $0x1], 0 }
   0x2   :  { %17 = vsyncpa [#allocation5], 0 }
   0x3   :  { %19 = vsyncpa [#allocation5 + $0x1], 0  ;;  %s5130_s27 = smov 0   ;;  %s5132_s28 = smov 0  }
   0x4   :  { %s5134_s29 = smov 0   ;;  %s5136_s30 = smov 0  }
   0x5 LB: > { %s5151_s9 = sadd.s32 4294967295, %s5078_s30   ;;  %s4055_s10 = sadd.s32 4294967294, %s5078_s30   ;;  %s5078_s30 = sphi %s5136_s30, %s6505_s30   ;;  %s5074_s29 = sphi %s5134_s29, %s6504_s29   ;;  %s5070_s28 = sphi %s5132_s28, %s6503_s28   ;;  %s5066_s27 = sphi %s5130_s27, %s6502_s27  }
   0x6   : > { %s5155_s11 = sadd.s32 1, %s5078_s30   ;;  %s189_s12 = sadd.s32 1, %s5074_s29 }
   0x7   : > { %s186_s13 = ssub.s32 %s5078_s30, %s5155_s11  ;;  %p199_p0 = scmp.ne.s32.totalorder %s5074_s29, %s5070_s28 }
   0x8   : > { %p187_p1 = scmp.eq.s32.totalorder %s186_s13, 0  ;;  %p200_p2 = scmp.eq.s32.totalorder %s5151_s9, 1 }
   0x9   : > { %p205_p3 = scmp.ne.s32.totalorder %s5070_s28, %s5066_s27  ;;  %p206_p4 = scmp.eq.s32.totalorder %s4055_s10, 1 }
   0xa   : > { %s5166_s14 = scalar_select %p187_p1, %s5074_s29, %s189_s12  }
   0xb   : > { %p5168_p5 = por %p200_p2, %p199_p0  ;;  %p5172_p6 = por %p206_p4, %p205_p3 }
   0xc   : > { %p4058_p7 = scmp.ge.s32.totalorder %s5078_s30, 1  ;;  %p281_p8 = scmp.lt.s32.totalorder %s5078_s30, 3 }
   0xe   : > { %p282_p9 = pnand %p4058_p7, %p281_p8 }
   0xf   : > { %v4825_v0 = vld [vmem:[%s6492_s1] sm:$0xff] (!%p282_p9)   ;;  %s4061_s19 = sshll.u32 (!%p282_p9), %s5151_s9, 8  ;;  %v4826_v1 = vld [vmem:[%s6492_s1 + $0x8] sm:$0xff] (!%p282_p9)   ;;  %v4827_v2 = vld [vmem:[%s6492_s1 + $0x10] sm:$0xff] (!%p282_p9)   ;;  %vm1262_vm0 = vcmask (!%p282_p9), 392192   ;;  %vm3312_vm1 = vcmask (!%p282_p9), 1041409  }
  0x10   : > { %285 = sbr.rel (%p282_p9) target bundleno = 1254 (0x4e6), region = 48  ;;  %p325_p10 = scmp.lt.s32.totalorder (!%p282_p9), %s4061_s19, 511  ;;  %4489 = vmatprep.subr.bf16.mxu0 (!%p282_p9), %v4825_v0  ;;  %4771 = vmatprep.subr.bf16.mxu1 (!%p282_p9), %v4825_v0  ;;  %vm5081_vm2 = vmmov (!%p282_p9), 0   ;;  %vm3314_vm3 = vcmask (!%p282_p9), 1042434   ;;  %vm3316_vm4 = vcmask (!%p282_p9), 1043459   ;;  %vm3318_vm5 = vcmask (!%p282_p9), 1044484  }
  0x11   : > { %4490 = vmatpush3.bf16.msra.mxu0 (!%p282_p9), %v4825_v0  ;;  %4774 = vmatpush3.bf16.msra.mxu1 (!%p282_p9), %v4825_v0  ;;  %vm3320_vm6 = vcmask (!%p282_p9), 1045509   ;;  %vm3322_vm7 = vcmask (!%p282_p9), 1046534   ;;  %vm3324_vm8 = vcmask (!%p282_p9), 1047559   ;;  %s6160_s21 = sand.u32 (!%p282_p9), 1, %s5070_s28   ;;  %p330_p11 = scmp.lt.s32.totalorder (!%p282_p9), %s5151_s9, 1 }
  0x12   : > { %4491 = vmatprep.subr.bf16.mxu0 (!%p282_p9), %v4826_v1  ;;  %4772 = vmatprep.subr.bf16.mxu1 (!%p282_p9), %v4826_v1  ;;  %s4059_s26 = sshll.u32 (!%p282_p9), %s6160_s21, 3  ;;  %s5083_s22 = smov (!%p282_p9), [#allocation2]  }
  0x13   : > { %s6198_s20 = scalar_lea.vmem (!%p282_p9), [#allocation2], %s4059_s26  ;;  %s4988_s23 = sshll.u32 (!%p282_p9), %s5083_s22, 4  ;;  %s4989_s23 = int_to_ptr.vmem [resolvable:$false] %s4988_s23 }
  0x15   : > { %4492 = vmatpush3.bf16.msra.mxu0 (!%p282_p9), %v4826_v1  ;;  %4775 = vmatpush3.bf16.msra.mxu1 (!%p282_p9), %v4826_v1 }
  0x16   : > { %4493 = vmatprep.subr.bf16.mxu0 (!%p282_p9), %v4827_v2  ;;  %4773 = vmatprep.subr.bf16.mxu1 (!%p282_p9), %v4827_v2 }
  0x17   : > { %s6507_s19 = smov (!%p325_p10, %s4061_s19), 511 }
  0x18   : > { %s4062_s24 = sshll.u32 %s6507_s19, 2 }
  0x19   : > { %s5191_s10 = scalar_lea.vmem %s6491_s0, %s4062_s24  ;;  %4494 = vmatpush3.bf16.msra.mxu0 %v4827_v2  ;;  %4776 = vmatpush3.bf16.msra.mxu1 %v4827_v2  ;;  %s4990_s24 = scalar_lea.vmem %s4989_s23, 256 }
  0x1a   : > { %v4828_v3 = vld [vmem:[%s5191_s10] sm:$0xff]   ;;  %v4829_v4 = vld [vmem:[%s5191_s10 + $0x8] sm:$0xff]   ;;  %v4830_v5 = vld [vmem:[%s5191_s10 + $0x10] sm:$0xff]   ;;  %s331_s25 = scalar_select %p330_p11, %s5151_s9, 1 }
  0x1b   : > { %4495 = vmatprep.mubr.msk.bf16.mxu0 %vm1262_vm0, %v4828_v3  ;;  %v4831_v6 = vld [vmem:[%s5191_s10 + $0x18] sm:$0xff]   ;;  %v4832_v7 = vld [vmem:[%s5191_s10 + $0x20] sm:$0xff]   ;;  %v4833_v8 = vld [vmem:[%s5191_s10 + $0x28] sm:$0xff]  }
  0x1c   : > { %4496 = vmatmul.mubr.msk.bf16.vlgmr.msra.gmra.mrb[0].mxu0 %vm1262_vm0, %v4829_v4  ;;  %v4834_v9 = vld [vmem:[%s5191_s10 + $0x30] sm:$0xff]   ;;  %v4853_v11 = vld [vmem:[%s5191_s10 + $0x258] sm:$0xff]   ;;  %v4836_v13 = vld [vmem:[%s5191_s10 + $0x40] sm:$0xff]   ;;  %s4063_s26 = sshll.u32 %s331_s25, 3 }
  0x1d   : > { %4499 = vmatprep.mubr.msk.bf16.mxu0 %vm1262_vm0, %v4830_v5  ;;  %v4852_v10 = vld [vmem:[%s5191_s10 + $0x250] sm:$0xff]   ;;  %v4835_v12 = vld [vmem:[%s5191_s10 + $0x38] sm:$0xff]   ;;  %v4856_v14 = vld [vmem:[%s5191_s10 + $0x260] sm:$0xff]   ;;  %s333_s18 = scalar_lea.vmem %s6497_s6, %s4063_s26  ;;  %s3938_s26 = sshll.u32 %s6198_s20, 4  ;;  %s3939_s26 = int_to_ptr.vmem [resolvable:$true] %s3938_s26 }
  0x1e   : > { %4643 = vmatprep.mubr.msk.bf16.mxu1 %vm1262_vm0, %v4852_v10  ;;  %v4857_v15 = vld [vmem:[%s5191_s10 + $0x268] sm:$0xff]   ;;  %v4860_v16 = vld [vmem:[%s5191_s10 + $0x270] sm:$0xff]   ;;  %v4861_v19 = vld [vmem:[%s5191_s10 + $0x278] sm:$0xff]   ;;  %s4984_s19 = scalar_lea.vmem %s3939_s26, 128  ;;  %p4991_p1 = scmp.lt.s32.totalorder %s3939_s26, %s4989_s23 }
  0x1f   : > { %4644 = vmatmul.mubr.msk.bf16.vlgmr.msra.gmra.mrb[0].mxu1 %vm1262_vm0, %v4853_v11  ;;  %v4837_v17 = vld [vmem:[%s5191_s10 + $0x48] sm:$0xff]   ;;  %v4838_v18 = vld [vmem:[%s5191_s10 + $0x50] sm:$0xff]   ;;  %v4864_v20 = vld [vmem:[%s5191_s10 + $0x280] sm:$0xff]   ;;  %p4985_p12 = scmp.ne.s32.totalorder %s3939_s26, %s4984_s19  ;;  %p4992_p2 = scmp.lt.s32.totalorder %s4990_s24, %s4984_s19 }
  0x20   : > { %4647 = vmatprep.mubr.msk.bf16.mxu1 %vm1262_vm0, %v4856_v14  ;;  %v4839_v21 = vld [vmem:[%s5191_s10 + $0x58] sm:$0xff]   ;;  %v4840_v22 = vld [vmem:[%s5191_s10 + $0x60] sm:$0xff]   ;;  %v4865_v23 = vld [vmem:[%s5191_s10 + $0x288] sm:$0xff]  }
  0x21   : > { %v4868_v24 = vld [vmem:[%s5191_s10 + $0x290] sm:$0xff]   ;;  %v4841_v25 = vld [vmem:[%s5191_s10 + $0x68] sm:$0xff]   ;;  %v4869_v27 = vld [vmem:[%s5191_s10 + $0x298] sm:$0xff]   ;;  %p4986_p13 = pnand %p4985_p12, %p5168_p5  ;;  %p4993_p3 = por %p4992_p2, %p4991_p1 }
  0x22   : > { %v4842_v26 = vld [vmem:[%s5191_s10 + $0x70] sm:$0xff]   ;;  %v4872_v28 = vld [vmem:[%s5191_s10 + $0x2a0] sm:$0xff]   ;;  %v4843_v29 = vld [vmem:[%s5191_s10 + $0x78] sm:$0xff]  }
  0x23   : > { %v4844_v30 = vld [vmem:[%s5191_s10 + $0x80] sm:$0xff]   ;;  %v4873_v31 = vld [vmem:[%s5191_s10 + $0x2a8] sm:$0xff]   ;;  %v4876_v32 = vld [vmem:[%s5191_s10 + $0x2b0] sm:$0xff]   ;;  %p4987_p0 = pneg %p4986_p13 }
  0x24   : > { %4500 = vmatmul.mubr.msk.bf16.gmra.mrb[4].mxu0 %vm1262_vm0, %v4831_v6  ;;  %v4845_v33 = vld [vmem:[%s5191_s10 + $0x88] sm:$0xff]   ;;  %v4846_v34 = vld [vmem:[%s5191_s10 + $0x90] sm:$0xff]   ;;  %v4877_v35 = vld [vmem:[%s5191_s10 + $0x2b8] sm:$0xff]  }
  0x25   : > { %4503 = vmatprep.mubr.msk.bf16.mxu0 %vm1262_vm0, %v4832_v7  ;;  %v4880_v36 = vld [vmem:[%s5191_s10 + $0x2c0] sm:$0xff]   ;;  %v4847_v37 = vld [vmem:[%s5191_s10 + $0x98] sm:$0xff]   ;;  %v4881_v39 = vld [vmem:[%s5191_s10 + $0x2c8] sm:$0xff]   ;;  %p4994_p4 = pnand %p4993_p3, %p4987_p0 }
  0x26   : > { %v4848_v38 = vld [vmem:[%s5191_s10 + $0xa0] sm:$0xff]   ;;  %v4884_v40 = vld [vmem:[%s5191_s10 + $0x2d0] sm:$0xff]   ;;  %v4849_v41 = vld [vmem:[%s5191_s10 + $0xa8] sm:$0xff]  }
  0x27   : > { %4648 = vmatmul.mubr.msk.bf16.gmra.mrb[4].mxu1 %vm1262_vm0, %v4857_v15  ;;  %v4850_v42 = vld [vmem:[%s5191_s10 + $0xb0] sm:$0xff]   ;;  %v4885_v43 = vld [vmem:[%s5191_s10 + $0x2d8] sm:$0xff]   ;;  %v4888_v44 = vld [vmem:[%s5191_s10 + $0x2e0] sm:$0xff]  }
  0x28   : > { %4651 = vmatprep.mubr.msk.bf16.mxu1 %vm1262_vm0, %v4860_v16  ;;  %v4851_v45 = vld [vmem:[%s5191_s10 + $0xb8] sm:$0xff]   ;;  %v4854_v46 = vld [vmem:[%s5191_s10 + $0xc0] sm:$0xff]   ;;  %v4889_v47 = vld [vmem:[%s5191_s10 + $0x2e8] sm:$0xff]  }
  0x29   : > { %v4892_v48 = vld [vmem:[%s5191_s10 + $0x2f0] sm:$0xff]   ;;  %v4855_v49 = vld [vmem:[%s5191_s10 + $0xc8] sm:$0xff]   ;;  %v4893_v51 = vld [vmem:[%s5191_s10 + $0x2f8] sm:$0xff]  }
  0x2a   : > { %v4858_v50 = vld [vmem:[%s5191_s10 + $0xd0] sm:$0xff]   ;;  %v4896_v52 = vld [vmem:[%s5191_s10 + $0x300] sm:$0xff]   ;;  %v4859_v53 = vld [vmem:[%s5191_s10 + $0xd8] sm:$0xff]  }
  0x2b   : > { %v4862_v54 = vld [vmem:[%s5191_s10 + $0xe0] sm:$0xff]   ;;  %v4897_v55 = vld [vmem:[%s5191_s10 + $0x308] sm:$0xff]   ;;  %v4900_v56 = vld [vmem:[%s5191_s10 + $0x310] sm:$0xff]  }
  0x2c   : > { %4504 = vmatmul.mubr.msk.bf16.gmra.mrb[8].mxu0 %vm1262_vm0, %v4833_v8  ;;  %v4863_v57 = vld [vmem:[%s5191_s10 + $0xe8] sm:$0xff]   ;;  %v4866_v58 = vld [vmem:[%s5191_s10 + $0xf0] sm:$0xff]   ;;  %v4901_v59 = vld [vmem:[%s5191_s10 + $0x318] sm:$0xff]  }
  0x2d   : > { %4507 = vmatprep.mubr.msk.bf16.mxu0 %vm1262_vm0, %v4834_v9  ;;  %v4904_v60 = vld [vmem:[%s5191_s10 + $0x320] sm:$0xff]   ;;  %v4867_v61 = vld [vmem:[%s5191_s10 + $0xf8] sm:$0xff]   ;;  %v4905_v63 = vld [vmem:[%s5191_s10 + $0x328] sm:$0xff]  }
  0x2e   : > { %v4870_v62 = vld [vmem:[%s5191_s10 + $0x100] sm:$0xff]   ;;  %v4908_v0 = vld [vmem:[%s5191_s10 + $0x330] sm:$0xff]   ;;  %v4871_v1 = vld [vmem:[%s5191_s10 + $0x108] sm:$0xff]  }
  0x2f   : > { %4652 = vmatmul.mubr.msk.bf16.gmra.mrb[8].mxu1 %vm1262_vm0, %v4861_v19  ;;  %v4874_v2 = vld [vmem:[%s5191_s10 + $0x110] sm:$0xff]   ;;  %v4909_v3 = vld [vmem:[%s5191_s10 + $0x338] sm:$0xff]   ;;  %v4912_v4 = vld [vmem:[%s5191_s10 + $0x340] sm:$0xff]  }
  0x30   : > { %4655 = vmatprep.mubr.msk.bf16.mxu1 %vm1262_vm0, %v4864_v20  ;;  %v4875_v5 = vld [vmem:[%s5191_s10 + $0x118] sm:$0xff]   ;;  %v4878_v6 = vld [vmem:[%s5191_s10 + $0x120] sm:$0xff]   ;;  %v4913_v7 = vld [vmem:[%s5191_s10 + $0x348] sm:$0xff]  }
  0x31   : > { %v4916_v8 = vld [vmem:[%s5191_s10 + $0x350] sm:$0xff]   ;;  %v4879_v9 = vld [vmem:[%s5191_s10 + $0x128] sm:$0xff]   ;;  %v4917_v11 = vld [vmem:[%s5191_s10 + $0x358] sm:$0xff]  }
  0x32   : > { %v4882_v10 = vld [vmem:[%s5191_s10 + $0x130] sm:$0xff]   ;;  %v4886_v14 = vld [vmem:[%s5191_s10 + $0x140] sm:$0xff]   ;;  %v4921_v15 = vld [vmem:[%s5191_s10 + $0x368] sm:$0xff]  }
  0x33   : > { %v4924_v16 = vld [vmem:[%s5191_s10 + $0x370] sm:$0xff]   ;;  %v4925_v19 = vld [vmem:[%s5191_s10 + $0x378] sm:$0xff]   ;;  %v4928_v20 = vld [vmem:[%s5191_s10 + $0x380] sm:$0xff]  }
  0x34   : > { %4508 = vmatmul.mubr.msk.bf16.gmra.mrb[12].mxu0 %vm1262_vm0, %v4835_v12  ;;  %v4920_v12 = vld [vmem:[%s5191_s10 + $0x360] sm:$0xff]  }
  0x35   : > { %4511 = vmatprep.mubr.msk.bf16.mxu0 %vm1262_vm0, %v4836_v13  ;;  %v4883_v13 = vld [vmem:[%s5191_s10 + $0x138] sm:$0xff]  }
  0x37   : > { %4656 = vmatmul.mubr.msk.bf16.gmra.mrb[12].mxu1 %vm1262_vm0, %v4865_v23  ;;  %v4929_v23 = vld [vmem:[%s5191_s10 + $0x388] sm:$0xff]  }
  0x38   : > { %4659 = vmatprep.mubr.msk.bf16.mxu1 %vm1262_vm0, %v4868_v24  ;;  %v4932_v24 = vld [vmem:[%s5191_s10 + $0x390] sm:$0xff]  }
  0x3c   : > { %4512 = vmatmul.mubr.msk.bf16.gmra.mrb[16].mxu0 %vm1262_vm0, %v4837_v17  ;;  %v4887_v17 = vld [vmem:[%s5191_s10 + $0x148] sm:$0xff]  }
  0x3d   : > { %4515 = vmatprep.mubr.msk.bf16.mxu0 %vm1262_vm0, %v4838_v18  ;;  %v4890_v18 = vld [vmem:[%s5191_s10 + $0x150] sm:$0xff]  }
  0x3f   : > { %4660 = vmatmul.mubr.msk.bf16.gmra.mrb[16].mxu1 %vm1262_vm0, %v4869_v27  ;;  %v4933_v27 = vld [vmem:[%s5191_s10 + $0x398] sm:$0xff]  }
  0x40   : > { %4663 = vmatprep.mubr.msk.bf16.mxu1 %vm1262_vm0, %v4872_v28  ;;  %v4936_v28 = vld [vmem:[%s5191_s10 + $0x3a0] sm:$0xff]  }
  0x44   : > { %4516 = vmatmul.mubr.msk.bf16.gmra.mrb[20].mxu0 %vm1262_vm0, %v4839_v21  ;;  %v4891_v21 = vld [vmem:[%s5191_s10 + $0x158] sm:$0xff]  }
  0x45   : > { %4519 = vmatprep.mubr.msk.bf16.mxu0 %vm1262_vm0, %v4840_v22  ;;  %v4894_v22 = vld [vmem:[%s5191_s10 + $0x160] sm:$0xff]  }
  0x47   : > { %4664 = vmatmul.mubr.msk.bf16.gmra.mrb[20].mxu1 %vm1262_vm0, %v4873_v31  ;;  %v4937_v31 = vld [vmem:[%s5191_s10 + $0x3a8] sm:$0xff]  }
  0x48   : > { %4667 = vmatprep.mubr.msk.bf16.mxu1 %vm1262_vm0, %v4876_v32  ;;  %v4940_v32 = vld [vmem:[%s5191_s10 + $0x3b0] sm:$0xff]  }
  0x4c   : > { %4520 = vmatmul.mubr.msk.bf16.gmra.mrb[24].mxu0 %vm1262_vm0, %v4841_v25  ;;  %v4895_v25 = vld [vmem:[%s5191_s10 + $0x168] sm:$0xff]  }
  0x4d   : > { %4523 = vmatprep.mubr.msk.bf16.mxu0 %vm1262_vm0, %v4842_v26  ;;  %v4898_v26 = vld [vmem:[%s5191_s10 + $0x170] sm:$0xff]  }
  0x4f   : > { %4668 = vmatmul.mubr.msk.bf16.gmra.mrb[24].mxu1 %vm1262_vm0, %v4877_v35  ;;  %v4941_v35 = vld [vmem:[%s5191_s10 + $0x3b8] sm:$0xff]  }
  0x50   : > { %4671 = vmatprep.mubr.msk.bf16.mxu1 %vm1262_vm0, %v4880_v36  ;;  %v4944_v36 = vld [vmem:[%s5191_s10 + $0x3c0] sm:$0xff]  }
  0x54   : > { %4524 = vmatmul.mubr.msk.bf16.gmra.mrb[28].mxu0 %vm1262_vm0, %v4843_v29  ;;  %v4899_v29 = vld [vmem:[%s5191_s10 + $0x178] sm:$0xff]  }
  0x55   : > { %4527 = vmatprep.mubr.msk.bf16.mxu0 %vm1262_vm0, %v4844_v30  ;;  %v4902_v30 = vld [vmem:[%s5191_s10 + $0x180] sm:$0xff]  }
  0x57   : > { %4672 = vmatmul.mubr.msk.bf16.gmra.mrb[28].mxu1 %vm1262_vm0, %v4881_v39  ;;  %v4945_v39 = vld [vmem:[%s5191_s10 + $0x3c8] sm:$0xff]  }
  0x58   : > { %4675 = vmatprep.mubr.msk.bf16.mxu1 %vm1262_vm0, %v4884_v40  ;;  %v4948_v40 = vld [vmem:[%s5191_s10 + $0x3d0] sm:$0xff]  }
  0x5c   : > { %4528 = vmatmul.mubr.msk.bf16.gmra.mrb[32].mxu0 %vm1262_vm0, %v4845_v33  ;;  %v4903_v33 = vld [vmem:[%s5191_s10 + $0x188] sm:$0xff]  }
  0x5d   : > { %4531 = vmatprep.mubr.msk.bf16.mxu0 %vm1262_vm0, %v4846_v34  ;;  %v4906_v34 = vld [vmem:[%s5191_s10 + $0x190] sm:$0xff]  }
  0x5f   : > { %4676 = vmatmul.mubr.msk.bf16.gmra.mrb[32].mxu1 %vm1262_vm0, %v4885_v43  ;;  %v4949_v43 = vld [vmem:[%s5191_s10 + $0x3d8] sm:$0xff]  }
  0x60   : > { %4679 = vmatprep.mubr.msk.bf16.mxu1 %vm1262_vm0, %v4888_v44  ;;  %v4952_v44 = vld [vmem:[%s5191_s10 + $0x3e0] sm:$0xff]  }
  0x64   : > { %4532 = vmatmul.mubr.msk.bf16.gmra.mrb[36].mxu0 %vm1262_vm0, %v4847_v37  ;;  %v4907_v37 = vld [vmem:[%s5191_s10 + $0x198] sm:$0xff]  }
  0x65   : > { %4535 = vmatprep.mubr.msk.bf16.mxu0 %vm1262_vm0, %v4848_v38  ;;  %v4910_v38 = vld [vmem:[%s5191_s10 + $0x1a0] sm:$0xff]  }
  0x67   : > { %4680 = vmatmul.mubr.msk.bf16.gmra.mrb[36].mxu1 %vm1262_vm0, %v4889_v47 }
  0x68   : > { %4683 = vmatprep.mubr.msk.bf16.mxu1 %vm1262_vm0, %v4892_v48  ;;  %v4915_v48 = vld [vmem:[%s5191_s10 + $0x1b8] sm:$0xff]  }
  0x6c   : > { %4536 = vmatmul.mubr.msk.bf16.gmra.mrb[40].mxu0 %vm1262_vm0, %v4849_v41  ;;  %v4911_v41 = vld [vmem:[%s5191_s10 + $0x1a8] sm:$0xff]  }
  0x6d   : > { %4539 = vmatprep.mubr.msk.bf16.mxu0 %vm1262_vm0, %v4850_v42  ;;  %v4914_v42 = vld [vmem:[%s5191_s10 + $0x1b0] sm:$0xff]  }
  0x6f   : > { %4684 = vmatmul.mubr.msk.bf16.gmra.mrb[40].mxu1 %vm1262_vm0, %v4893_v51  ;;  %v4918_v51 = vld [vmem:[%s5191_s10 + $0x1c0] sm:$0xff]  }
  0x70   : > { %4687 = vmatprep.mubr.msk.bf16.mxu1 %vm1262_vm0, %v4896_v52 }
  0x74   : > { %4540 = vmatmul.mubr.msk.bf16.gmra.mrb[44].mxu0 %vm1262_vm0, %v4851_v45  ;;  %v5406_v45 = vld [vmem:[%s6493_s2] ss:$0 sm:$0xff] }
  0x75   : > { %4543 = vmatprep.mubr.msk.bf16.mxu0 %vm1262_vm0, %v4854_v46 }
  0x77   : > { %4688 = vmatmul.mubr.msk.bf16.gmra.mrb[44].mxu1 %vm1262_vm0, %v4897_v55  ;;  %v4953_v55 = vld [vmem:[%s5191_s10 + $0x3e8] sm:$0xff]  }
  0x78   : > { %4691 = vmatprep.mubr.msk.bf16.mxu1 %vm1262_vm0, %v4900_v56 }
  0x7c   : > { %4544 = vmatmul.mubr.msk.bf16.gmra.mrb[48].mxu0 %vm1262_vm0, %v4855_v49 }
  0x7d   : > { %4547 = vmatprep.mubr.msk.bf16.mxu0 %vm1262_vm0, %v4858_v50 }
  0x7f   : > { %4692 = vmatmul.mubr.msk.bf16.gmra.mrb[48].mxu1 %vm1262_vm0, %v4901_v59  ;;  %v4954_v59 = vld [vmem:[%s5191_s10 + $0x3f0] sm:$0xff]  }
  0x80   : > { %4695 = vmatprep.mubr.msk.bf16.mxu1 %vm1262_vm0, %v4904_v60 }
  0x84   : > { %4548 = vmatmul.mubr.msk.bf16.gmra.mrb[52].mxu0 %vm1262_vm0, %v4859_v53 }
  0x85   : > { %4551 = vmatprep.mubr.msk.bf16.mxu0 %vm1262_vm0, %v4862_v54 }
  0x87   : > { %4696 = vmatmul.mubr.msk.bf16.gmra.mrb[52].mxu1 %vm1262_vm0, %v4905_v63 }
  0x88   : > { %4699 = vmatprep.mubr.msk.bf16.mxu1 %vm1262_vm0, %v4908_v0  ;;  %v4919_v0 = vld [vmem:[%s5191_s10 + $0x1c8] sm:$0xff]  }
  0x8c   : > { %4552 = vmatmul.mubr.msk.bf16.gmra.mrb[56].mxu0 %vm1262_vm0, %v4863_v57 }
  0x8d   : > { %4555 = vmatprep.mubr.msk.bf16.mxu0 %vm1262_vm0, %v4866_v58 }
  0x8f   : > { %4700 = vmatmul.mubr.msk.bf16.gmra.mrb[56].mxu1 %vm1262_vm0, %v4909_v3 }
  0x90   : > { %4703 = vmatprep.mubr.msk.bf16.mxu1 %vm1262_vm0, %v4912_v4 }
  0x94   : > { %4556 = vmatmul.mubr.msk.bf16.gmra.mrb[60].mxu0 %vm1262_vm0, %v4867_v61 }
  0x95   : > { %4559 = vmatprep.mubr.msk.bf16.mxu0 %vm1262_vm0, %v4870_v62 }
  0x97   : > { %4704 = vmatmul.mubr.msk.bf16.gmra.mrb[60].mxu1 %vm1262_vm0, %v4913_v7 }
  0x98   : > { %4707 = vmatprep.mubr.msk.bf16.mxu1 %vm1262_vm0, %v4916_v8 }
  0x9c   : > { %4560 = vmatmul.mubr.msk.bf16.gmra.mrb[64].mxu0 %vm1262_vm0, %v4871_v1 }
  0x9d   : > { %4563 = vmatprep.mubr.msk.bf16.mxu0 %vm1262_vm0, %v4874_v2 }
  0x9f   : > { %4708 = vmatmul.mubr.msk.bf16.gmra.mrb[64].mxu1 %vm1262_vm0, %v4917_v11  ;;  %v4955_v11 = vld [vmem:[%s5191_s10 + $0x3f8] sm:$0xff]  }
  0xa0   : > { %4711 = vmatprep.mubr.msk.bf16.mxu1 %vm1262_vm0, %v4920_v12 }
  0xa4   : > { %4564 = vmatmul.mubr.msk.bf16.gmra.mrb[68].mxu0 %vm1262_vm0, %v4875_v5  ;;  %v4922_v5 = vld [vmem:[%s5191_s10 + $0x1d0] sm:$0xff]  }
  0xa5   : > { %4567 = vmatprep.mubr.msk.bf16.mxu0 %vm1262_vm0, %v4878_v6 }
  0xa7   : > { %4712 = vmatmul.mubr.msk.bf16.gmra.mrb[68].mxu1 %vm1262_vm0, %v4921_v15 }
  0xa8   : > { %4715 = vmatprep.mubr.msk.bf16.mxu1 %vm1262_vm0, %v4924_v16 }
  0xac   : > { %4568 = vmatmul.mubr.msk.bf16.gmra.mrb[72].mxu0 %vm1262_vm0, %v4879_v9 }
  0xad   : > { %4571 = vmatprep.mubr.msk.bf16.mxu0 %vm1262_vm0, %v4882_v10 }
  0xaf   : > { %4716 = vmatmul.mubr.msk.bf16.gmra.mrb[72].mxu1 %vm1262_vm0, %v4925_v19  ;;  %v4923_v19 = vld [vmem:[%s5191_s10 + $0x1d8] sm:$0xff]  }
  0xb0   : > { %4719 = vmatprep.mubr.msk.bf16.mxu1 %vm1262_vm0, %v4928_v20 }
  0xb4   : > { %4572 = vmatmul.mubr.msk.bf16.gmra.mrb[76].mxu0 %vm1262_vm0, %v4883_v13 }
  0xb5   : > { %4575 = vmatprep.mubr.msk.bf16.mxu0 %vm1262_vm0, %v4886_v14 }
  0xb7   : > { %4720 = vmatmul.mubr.msk.bf16.gmra.mrb[76].mxu1 %vm1262_vm0, %v4929_v23 }
  0xb8   : > { %4723 = vmatprep.mubr.msk.bf16.mxu1 %vm1262_vm0, %v4932_v24  ;;  %v4926_v24 = vld [vmem:[%s5191_s10 + $0x1e0] sm:$0xff]  }
  0xbc   : > { %4576 = vmatmul.mubr.msk.bf16.gmra.mrb[80].mxu0 %vm1262_vm0, %v4887_v17 }
  0xbd   : > { %4579 = vmatprep.mubr.msk.bf16.mxu0 %vm1262_vm0, %v4890_v18 }
  0xbf   : > { %4724 = vmatmul.mubr.msk.bf16.gmra.mrb[80].mxu1 %vm1262_vm0, %v4933_v27 }
  0xc0   : > { %4727 = vmatprep.mubr.msk.bf16.mxu1 %vm1262_vm0, %v4936_v28 }
  0xc4   : > { %4580 = vmatmul.mubr.msk.bf16.gmra.mrb[84].mxu0 %vm1262_vm0, %v4891_v21 }
  0xc5   : > { %4583 = vmatprep.mubr.msk.bf16.mxu0 %vm1262_vm0, %v4894_v22 }
  0xc7   : > { %4728 = vmatmul.mubr.msk.bf16.gmra.mrb[84].mxu1 %vm1262_vm0, %v4937_v31 }
  0xc8   : > { %4731 = vmatprep.mubr.msk.bf16.mxu1 %vm1262_vm0, %v4940_v32 }
  0xcc   : > { %4584 = vmatmul.mubr.msk.bf16.gmra.mrb[88].mxu0 %vm1262_vm0, %v4895_v25 }
  0xcd   : > { %4587 = vmatprep.mubr.msk.bf16.mxu0 %vm1262_vm0, %v4898_v26 }
  0xcf   : > { %4732 = vmatmul.mubr.msk.bf16.gmra.mrb[88].mxu1 %vm1262_vm0, %v4941_v35 }
  0xd0   : > { %4735 = vmatprep.mubr.msk.bf16.mxu1 %vm1262_vm0, %v4944_v36 }
  0xd4   : > { %4588 = vmatmul.mubr.msk.bf16.gmra.mrb[92].mxu0 %vm1262_vm0, %v4899_v29 }
  0xd5   : > { %4591 = vmatprep.mubr.msk.bf16.mxu0 %vm1262_vm0, %v4902_v30 }
  0xd7   : > { %4736 = vmatmul.mubr.msk.bf16.gmra.mrb[92].mxu1 %vm1262_vm0, %v4945_v39 }
  0xd8   : > { %4739 = vmatprep.mubr.msk.bf16.mxu1 %vm1262_vm0, %v4948_v40  ;;  %v4956_v40 = vld [vmem:[%s6494_s3] sm:$0xff]  }
  0xdc   : > { %4592 = vmatmul.mubr.msk.bf16.gmra.mrb[96].mxu0 %vm1262_vm0, %v4903_v33 }
  0xdd   : > { %4595 = vmatprep.mubr.msk.bf16.mxu0 %vm1262_vm0, %v4906_v34 }
  0xdf   : > { %4740 = vmatmul.mubr.msk.bf16.gmra.mrb[96].mxu1 %vm1262_vm0, %v4949_v43  ;;  %v5080_v43 = vmov 0.0  }
  0xe0   : > { %4743 = vmatprep.mubr.msk.bf16.mxu1 %vm1262_vm0, %v4952_v44  ;;  %4751 = vmatprep.subr.bf16.mxu1 %v5080_v43 }
  0xe1   : > { %4752 = vmatpush3.bf16.msra.mxu1 %v4956_v40 }
  0xe2   : > { %4753 = vmatprep.subr.bf16.mxu1 %v5080_v43 }
  0xe4   : > { %4596 = vmatmul.mubr.msk.bf16.gmra.mrb[100].mxu0 %vm1262_vm0, %v4907_v37 }
  0xe5   : > { %4599 = vmatprep.mubr.msk.bf16.mxu0 %vm1262_vm0, %v4910_v38 }
  0xe7   : > { %4744 = vmatmul.mubr.msk.bf16.gmra.mrb[100].mxu1 %vm1262_vm0, %v4953_v55 }
  0xe8   : > { %4747 = vmatprep.mubr.msk.bf16.mxu1 %vm1262_vm0, %v4954_v59 }
  0xec   : > { %4600 = vmatmul.mubr.msk.bf16.gmra.mrb[104].mxu0 %vm1262_vm0, %v4911_v41 }
  0xed   : > { %4603 = vmatprep.mubr.msk.bf16.mxu0 %vm1262_vm0, %v4914_v42  ;;  %v4927_v42 = vld [vmem:[%s5191_s10 + $0x1e8] sm:$0xff]  }
  0xef   : > { %v4497_v46 = vpop.f32.mrb[0].mxu0  ;;  %4748 = vmatmul.mubr.msk.bf16.gmra.mrb[104].mxu1 %vm1262_vm0, %v4955_v11 }
  0xf0   : > { %v1681_v47 = vpop.f32.mrb[1].mxu0  ;;  %v1690_v53 = vadd.f32 %v4497_v46, %v5406_v45  ;;  %4767 = vmatprep.mubr.msk.bf16.mxu1 %vm5081_vm2, %v5080_v43 }
  0xf1   : > { %v1682_v49 = vadd.f32 %v5406_v45, %v1681_v47  ;;  %v4498_v50 = vpop.f32.mrb[2].mxu0 }
  0xf2   : > { %v1684_v52 = vpop.f32.mrb[3].mxu0  ;;  %v1693_v57 = vadd.f32 %v4498_v50, %v5406_v45  ;;  %v2706_v60 = vmax.f32 %v1690_v53, 0.0  ;;  %v5437_v30 = vpop.f32.mrb[0].mxu1 }
  0xf3   : > { %v1685_v54 = vadd.f32 %v5406_v45, %v1684_v52  ;;  %v2704_v56 = vmax.f32 %v1682_v49, 0.0  ;;  %v5440_v31 = vpop.f32.mrb[1].mxu1  ;;  %v4930_v49 = vld [vmem:[%s5191_s10 + $0x1f0] sm:$0xff]  }
  0xf4   : > { %4604 = vmatmul.mubr.msk.bf16.gmra.mrb[108].mxu0 %vm1262_vm0, %v4915_v48  ;;  %v2707_v1 = vmax.f32 %v1693_v57, 0.0  ;;  %v5444_v35 = vpop.f32.mrb[2].mxu1 }
  0xf5   : > { %v2705_v58 = vmax.f32 %v1685_v54, 0.0  ;;  %4607 = vmatprep.mubr.msk.bf16.mxu0 %vm1262_vm0, %v4918_v51  ;;  %v5446_v36 = vpop.f32.mrb[3].mxu1 }
  0xf7   : > { %v2960_v61 = vadd.f32 %v2705_v58, %v2704_v56  ;;  %v4501_v62 = vpop.f32.mrb[4].mxu0 }
  0xf8   : > { %v1697_v63 = vpop.f32.mrb[5].mxu0  ;;  %v1706_v7 = vadd.f32 %v4501_v62, %v5406_v45 }
  0xf9   : > { %v2961_v2 = vadd.f32 %v2960_v61, %v2706_v60  ;;  %v1698_v3 = vadd.f32 %v5406_v45, %v1697_v63  ;;  %v4502_v4 = vpop.f32.mrb[6].mxu0 }
  0xfa   : > { %v1700_v6 = vpop.f32.mrb[7].mxu0  ;;  %v1709_v13 = vadd.f32 %v4502_v4, %v5406_v45  ;;  %v2710_v15 = vmax.f32 %v1706_v7, 0.0  ;;  %v5458_v55 = vpop.f32.mrb[4].mxu1  ;;  %v4934_v7 = vld [vmem:[%s5191_s10 + $0x200] sm:$0xff]  }
  0xfb   : > { %v2708_v8 = vmax.f32 %v1698_v3, 0.0  ;;  %v2962_v9 = vadd.f32 %v2961_v2, %v2707_v1  ;;  %v1701_v10 = vadd.f32 %v5406_v45, %v1700_v6  ;;  %v5461_v56 = vpop.f32.mrb[5].mxu1  ;;  %v4931_v2 = vld [vmem:[%s5191_s10 + $0x1f8] sm:$0xff]  }
  0xfc   : > { %4608 = vmatmul.mubr.msk.bf16.gmra.mrb[112].mxu0 %vm1262_vm0, %v4919_v0  ;;  %v2711_v20 = vmax.f32 %v1709_v13, 0.0  ;;  %v5465_v60 = vpop.f32.mrb[6].mxu1 }
  0xfd   : > { %v2963_v12 = vadd.f32 %v2962_v9, %v2708_v8  ;;  %v2709_v14 = vmax.f32 %v1701_v10, 0.0  ;;  %4611 = vmatprep.mubr.msk.bf16.mxu0 %vm1262_vm0, %v4922_v5  ;;  %v5467_v61 = vpop.f32.mrb[7].mxu1 }
  0xff   : > { %v2964_v16 = vadd.f32 %v2963_v12, %v2709_v14  ;;  %v4505_v17 = vpop.f32.mrb[8].mxu0 }
 0x100   : > { %v1713_v18 = vpop.f32.mrb[9].mxu0  ;;  %v1722_v26 = vadd.f32 %v4505_v17, %v5406_v45 }
 0x101   : > { %v2965_v21 = vadd.f32 %v2964_v16, %v2710_v15  ;;  %v1714_v22 = vadd.f32 %v5406_v45, %v1713_v18  ;;  %v4506_v23 = vpop.f32.mrb[10].mxu0 }
 0x102   : > { %v1716_v25 = vpop.f32.mrb[11].mxu0  ;;  %v1725_v33 = vadd.f32 %v4506_v23, %v5406_v45  ;;  %v2714_v37 = vmax.f32 %v1722_v26, 0.0  ;;  %v5474_v13 = vpop.f32.mrb[8].mxu1 }
 0x103   : > { %v2712_v27 = vmax.f32 %v1714_v22, 0.0  ;;  %v2966_v28 = vadd.f32 %v2965_v21, %v2711_v20  ;;  %v1717_v29 = vadd.f32 %v5406_v45, %v1716_v25  ;;  %v5477_v14 = vpop.f32.mrb[9].mxu1  ;;  %v4935_v25 = vld [vmem:[%s5191_s10 + $0x208] sm:$0xff]  }
 0x104   : > { %4612 = vmatmul.mubr.msk.bf16.gmra.mrb[116].mxu0 %vm1262_vm0, %v4923_v19  ;;  %v2715_v44 = vmax.f32 %v1725_v33, 0.0  ;;  %v5481_v18 = vpop.f32.mrb[10].mxu1  ;;  %v4957_v19 = vld [vmem:[%s6494_s3 + $0x8] sm:$0xff]  }
 0x105   : > { %v2967_v32 = vadd.f32 %v2966_v28, %v2712_v27  ;;  %v2713_v34 = vmax.f32 %v1717_v29, 0.0  ;;  %4615 = vmatprep.mubr.msk.bf16.mxu0 %vm1262_vm0, %v4926_v24  ;;  %v5486_v20 = vpop.f32.mrb[11].mxu1  ;;  %4754 = vmatpush3.bf16.msra.mxu1 %v4957_v19 }
 0x106   : > { %4755 = vmatprep.subr.bf16.mxu1 %v5080_v43 }
 0x107   : > { %v2968_v38 = vadd.f32 %v2967_v32, %v2713_v34  ;;  %v4509_v39 = vpop.f32.mrb[12].mxu0  ;;  %v4938_v32 = vld [vmem:[%s5191_s10 + $0x210] sm:$0xff]  }
 0x108   : > { %v1729_v41 = vpop.f32.mrb[13].mxu0  ;;  %v1738_v51 = vadd.f32 %v4509_v39, %v5406_v45 }
 0x109   : > { %v2969_v46 = vadd.f32 %v2968_v38, %v2714_v37  ;;  %v1730_v47 = vadd.f32 %v5406_v45, %v1729_v41  ;;  %v4510_v48 = vpop.f32.mrb[14].mxu0 }
 0x10a   : > { %v1732_v50 = vpop.f32.mrb[15].mxu0  ;;  %v1741_v58 = vadd.f32 %v4510_v48, %v5406_v45  ;;  %v2718_v62 = vmax.f32 %v1738_v51, 0.0  ;;  %v4657_v40 = vpop.f32.mrb[12].mxu1 }
 0x10b   : > { %v2716_v52 = vmax.f32 %v1730_v47, 0.0  ;;  %v2970_v53 = vadd.f32 %v2969_v46, %v2715_v44  ;;  %v1733_v54 = vadd.f32 %v5406_v45, %v1732_v50  ;;  %v2330_v47 = vadd.f32 %v4657_v40, %v5406_v45  ;;  %v4943_v40 = vld [vmem:[%s5191_s10 + $0x228] sm:$0xff]  }
 0x10c   : > { %4616 = vmatmul.mubr.msk.bf16.gmra.mrb[120].mxu0 %vm1262_vm0, %v4927_v42  ;;  %v2719_v3 = vmax.f32 %v1741_v58, 0.0  ;;  %v2321_v42 = vpop.f32.mrb[13].mxu1 }
 0x10d   : > { %v2971_v57 = vadd.f32 %v2970_v53, %v2716_v52  ;;  %v2717_v59 = vmax.f32 %v1733_v54, 0.0  ;;  %4619 = vmatprep.mubr.msk.bf16.mxu0 %vm1262_vm0, %v4930_v49  ;;  %v2322_v48 = vadd.f32 %v5406_v45, %v2321_v42  ;;  %v4658_v49 = vpop.f32.mrb[14].mxu1 }
 0x10e   : > { %v2333_v50 = vadd.f32 %v4658_v49, %v5406_v45  ;;  %v2324_v51 = vpop.f32.mrb[15].mxu1 }
 0x10f   : > { %v2972_v63 = vadd.f32 %v2971_v57, %v2717_v59  ;;  %v4513_v0 = vpop.f32.mrb[16].mxu0  ;;  %v2864_v57 = vmax.f32 %v2322_v48, 0.0  ;;  %v2325_v58 = vadd.f32 %v5406_v45, %v2324_v51 }
 0x110   : > { %v1745_v1 = vpop.f32.mrb[17].mxu0  ;;  %v1754_v9 = vadd.f32 %v4513_v0, %v5406_v45 }
 0x111   : > { %v2973_v4 = vadd.f32 %v2972_v63, %v2718_v62  ;;  %v1746_v5 = vadd.f32 %v5406_v45, %v1745_v1  ;;  %v4514_v6 = vpop.f32.mrb[18].mxu0  ;;  %v4939_v63 = vld [vmem:[%s5191_s10 + $0x218] sm:$0xff]  }
 0x112   : > { %v1748_v8 = vpop.f32.mrb[19].mxu0  ;;  %v1757_v16 = vadd.f32 %v4514_v6, %v5406_v45  ;;  %v2722_v21 = vmax.f32 %v1754_v9, 0.0 }
 0x113   : > { %v2720_v10 = vmax.f32 %v1746_v5, 0.0  ;;  %v2974_v11 = vadd.f32 %v2973_v4, %v2719_v3  ;;  %v1749_v12 = vadd.f32 %v5406_v45, %v1748_v8  ;;  %v4942_v3 = vld [vmem:[%s5191_s10 + $0x220] sm:$0xff]   ;;  %v2866_v4 = vmax.f32 %v2330_v47, 0.0  ;;  %v4946_v47 = vld [vmem:[%s5191_s10 + $0x230] sm:$0xff]  }
 0x114   : > { %4620 = vmatmul.mubr.msk.bf16.gmra.mrb[124].mxu0 %vm1262_vm0, %v4931_v2  ;;  %v2723_v26 = vmax.f32 %v1757_v16, 0.0  ;;  %v2865_v5 = vmax.f32 %v2325_v58, 0.0  ;;  %v2867_v8 = vmax.f32 %v2333_v50, 0.0 }
 0x115   : > { %v2975_v15 = vadd.f32 %v2974_v11, %v2720_v10  ;;  %v2721_v17 = vmax.f32 %v1749_v12, 0.0  ;;  %4623 = vmatprep.mubr.msk.bf16.mxu0 %vm1262_vm0, %v4934_v7 }
 0x116   : > { %v3145_v12 = vadd.f32 %v2865_v5, %v2864_v57 }
 0x117   : > { %v2976_v22 = vadd.f32 %v2975_v15, %v2721_v17  ;;  %v4517_v23 = vpop.f32.mrb[20].mxu0  ;;  %v4661_v15 = vpop.f32.mrb[16].mxu1 }
 0x118   : > { %v1761_v24 = vpop.f32.mrb[21].mxu0  ;;  %v1770_v34 = vadd.f32 %v4517_v23, %v5406_v45  ;;  %v2346_v17 = vadd.f32 %v4661_v15, %v5406_v45  ;;  %v2337_v19 = vpop.f32.mrb[17].mxu1  ;;  %v3146_v23 = vadd.f32 %v3145_v12, %v2866_v4 }
 0x119   : > { %v2977_v27 = vadd.f32 %v2976_v22, %v2722_v21  ;;  %v1762_v28 = vadd.f32 %v5406_v45, %v1761_v24  ;;  %v4518_v29 = vpop.f32.mrb[22].mxu0  ;;  %v2338_v24 = vadd.f32 %v5406_v45, %v2337_v19  ;;  %v4947_v19 = vld [vmem:[%s5191_s10 + $0x238] sm:$0xff]  }
 0x11a   : > { %v1764_v33 = vpop.f32.mrb[23].mxu0  ;;  %v1773_v41 = vadd.f32 %v4518_v29, %v5406_v45  ;;  %v2726_v52 = vmax.f32 %v1770_v34, 0.0  ;;  %v3147_v34 = vadd.f32 %v3146_v23, %v2867_v8 }
 0x11b   : > { %v2724_v37 = vmax.f32 %v1762_v28, 0.0  ;;  %v2978_v38 = vadd.f32 %v2977_v27, %v2723_v26  ;;  %v1765_v39 = vadd.f32 %v5406_v45, %v1764_v33  ;;  %v2868_v33 = vmax.f32 %v2338_v24, 0.0 }
 0x11c   : > { %4624 = vmatmul.mubr.msk.bf16.gmra.mrb[128].mxu0 %vm1262_vm0, %v4935_v25  ;;  %v2727_v59 = vmax.f32 %v1773_v41, 0.0  ;;  %v4662_v25 = vpop.f32.mrb[18].mxu1  ;;  %v2870_v41 = vmax.f32 %v2346_v17, 0.0 }
 0x11d   : > { %v2979_v44 = vadd.f32 %v2978_v38, %v2724_v37  ;;  %v2725_v46 = vmax.f32 %v1765_v39, 0.0  ;;  %4627 = vmatprep.mubr.msk.bf16.mxu0 %vm1262_vm0, %v4938_v32  ;;  %v2349_v27 = vadd.f32 %v4662_v25, %v5406_v45  ;;  %v2340_v28 = vpop.f32.mrb[19].mxu1  ;;  %v3148_v48 = vadd.f32 %v3147_v34, %v2868_v33  ;;  %v4950_v25 = vld [vmem:[%s5191_s10 + $0x240] sm:$0xff]  }
 0x11e   : > { %v2341_v37 = vadd.f32 %v5406_v45, %v2340_v28 }
 0x11f   : > { %v2980_v53 = vadd.f32 %v2979_v44, %v2725_v46  ;;  %v4521_v54 = vpop.f32.mrb[24].mxu0 }
 0x120   : > { %v1777_v62 = vpop.f32.mrb[25].mxu0  ;;  %v1786_v6 = vadd.f32 %v4521_v54, %v5406_v45  ;;  %v2869_v49 = vmax.f32 %v2341_v37, 0.0 }
 0x121   : > { %v2981_v0 = vadd.f32 %v2980_v53, %v2726_v52  ;;  %v1778_v1 = vadd.f32 %v5406_v45, %v1777_v62  ;;  %v4522_v2 = vpop.f32.mrb[26].mxu0  ;;  %v2871_v52 = vmax.f32 %v2349_v27, 0.0 }
 0x122   : > { %v1780_v7 = vpop.f32.mrb[27].mxu0  ;;  %v1789_v16 = vadd.f32 %v4522_v2, %v5406_v45  ;;  %v2730_v26 = vmax.f32 %v1786_v6, 0.0  ;;  %v3149_v58 = vadd.f32 %v3148_v48, %v2869_v49 }
 0x123   : > { %v2728_v9 = vmax.f32 %v1778_v1, 0.0  ;;  %v2982_v10 = vadd.f32 %v2981_v0, %v2727_v59  ;;  %v1781_v11 = vadd.f32 %v5406_v45, %v1780_v7  ;;  %v4665_v59 = vpop.f32.mrb[20].mxu1 }
 0x124   : > { %4628 = vmatmul.mubr.msk.bf16.gmra.mrb[132].mxu0 %vm1262_vm0, %v4939_v63  ;;  %v2731_v38 = vmax.f32 %v1789_v16, 0.0  ;;  %v2362_v63 = vadd.f32 %v4665_v59, %v5406_v45  ;;  %v2353_v0 = vpop.f32.mrb[21].mxu1 }
 0x125   : > { %v2983_v21 = vadd.f32 %v2982_v10, %v2728_v9  ;;  %v2729_v22 = vmax.f32 %v1781_v11, 0.0  ;;  %4631 = vmatprep.mubr.msk.bf16.mxu0 %vm1262_vm0, %v4942_v3  ;;  %v3150_v3 = vadd.f32 %v3149_v58, %v2870_v41  ;;  %v2354_v4 = vadd.f32 %v5406_v45, %v2353_v0  ;;  %v4666_v5 = vpop.f32.mrb[22].mxu1  ;;  %v4951_v58 = vld [vmem:[%s5191_s10 + $0x248] sm:$0xff]   ;;  %s4343_s10 = sshll.u32 %s5151_s9, 7 }
 0x126   : > { %v2365_v7 = vadd.f32 %v4666_v5, %v5406_v45  ;;  %v2356_v8 = vpop.f32.mrb[23].mxu1  ;;  %s6410_s17 = scalar_lea.hbm %s6498_s7, %s4343_s10 }
 0x127   : > { %v2984_v29 = vadd.f32 %v2983_v21, %v2729_v22  ;;  %v4525_v32 = vpop.f32.mrb[28].mxu0  ;;  %v2872_v11 = vmax.f32 %v2354_v4, 0.0  ;;  %v3151_v12 = vadd.f32 %v3150_v3, %v2871_v52  ;;  %v2357_v15 = vadd.f32 %v5406_v45, %v2356_v8 }
 0x128   : > { %v1793_v39 = vpop.f32.mrb[29].mxu0  ;;  %v1802_v50 = vadd.f32 %v4525_v32, %v5406_v45  ;;  %v2874_v21 = vmax.f32 %v2362_v63, 0.0  ;;  %v2875_v34 = vmax.f32 %v2365_v7, 0.0 }
 0x129   : > { %v2985_v42 = vadd.f32 %v2984_v29, %v2730_v26  ;;  %v1794_v44 = vadd.f32 %v5406_v45, %v1793_v39  ;;  %v4526_v46 = vpop.f32.mrb[30].mxu0  ;;  %v3152_v26 = vadd.f32 %v3151_v12, %v2872_v11  ;;  %v2873_v27 = vmax.f32 %v2357_v15, 0.0 }
 0x12a   : > { %v1796_v51 = vpop.f32.mrb[31].mxu0  ;;  %v1805_v62 = vadd.f32 %v4526_v46, %v5406_v45  ;;  %v2734_v6 = vmax.f32 %v1802_v50, 0.0 }
 0x12b   : > { %v2732_v53 = vmax.f32 %v1794_v44, 0.0  ;;  %v2986_v54 = vadd.f32 %v2985_v42, %v2731_v38  ;;  %v1797_v57 = vadd.f32 %v5406_v45, %v1796_v51  ;;  %v3153_v37 = vadd.f32 %v3152_v26, %v2873_v27  ;;  %v4669_v38 = vpop.f32.mrb[24].mxu1 }
 0x12c   : > { %4632 = vmatmul.mubr.msk.bf16.gmra.mrb[136].mxu0 %vm1262_vm0, %v4943_v40  ;;  %v2735_v16 = vmax.f32 %v1805_v62, 0.0  ;;  %v2369_v40 = vpop.f32.mrb[25].mxu1  ;;  %v2378_v48 = vadd.f32 %v4669_v38, %v5406_v45 }
 0x12d   : > { %v2987_v1 = vadd.f32 %v2986_v54, %v2732_v53  ;;  %v2733_v2 = vmax.f32 %v1797_v57, 0.0  ;;  %4635 = vmatprep.mubr.msk.bf16.mxu0 %vm1262_vm0, %v4946_v47  ;;  %v3154_v44 = vadd.f32 %v3153_v37, %v2874_v21  ;;  %v2370_v46 = vadd.f32 %v5406_v45, %v2369_v40  ;;  %v4670_v47 = vpop.f32.mrb[26].mxu1 }
 0x12e   : > { %v2372_v49 = vpop.f32.mrb[27].mxu1  ;;  %v2381_v59 = vadd.f32 %v4670_v47, %v5406_v45  ;;  %v2878_v5 = vmax.f32 %v2378_v48, 0.0 }
 0x12f   : > { %v2988_v9 = vadd.f32 %v2987_v1, %v2733_v2  ;;  %v4529_v10 = vpop.f32.mrb[32].mxu0  ;;  %v2876_v53 = vmax.f32 %v2370_v46, 0.0  ;;  %v3155_v54 = vadd.f32 %v3154_v44, %v2875_v34  ;;  %v2373_v62 = vadd.f32 %v5406_v45, %v2372_v49  ;;  %v4673_v11 = vpop.f32.mrb[28].mxu1 }
 0x130   : > { %v1809_v17 = vpop.f32.mrb[33].mxu0  ;;  %v1818_v28 = vadd.f32 %v4529_v10, %v5406_v45  ;;  %v2879_v12 = vmax.f32 %v2381_v59, 0.0 }
 0x131   : > { %v2989_v22 = vadd.f32 %v2988_v9, %v2734_v6  ;;  %v1810_v23 = vadd.f32 %v5406_v45, %v1809_v17  ;;  %v4530_v24 = vpop.f32.mrb[34].mxu0  ;;  %v3156_v3 = vadd.f32 %v3155_v54, %v2876_v53  ;;  %v2877_v6 = vmax.f32 %v2373_v62, 0.0 }
 0x132   : > { %v1812_v29 = vpop.f32.mrb[35].mxu0  ;;  %v1821_v39 = vadd.f32 %v4530_v24, %v5406_v45  ;;  %v2738_v50 = vmax.f32 %v1818_v28, 0.0 }
 0x133   : > { %v5529_v32 = vadd.f32 %v2989_v22, %v2735_v16  ;;  %v1813_v33 = vadd.f32 %v5406_v45, %v1812_v29  ;;  %v2736_v41 = vmax.f32 %v1810_v23, 0.0  ;;  %v3157_v15 = vadd.f32 %v3156_v3, %v2877_v6  ;;  %v2385_v16 = vpop.f32.mrb[29].mxu1 }
 0x134   : > { %4636 = vmatmul.mubr.msk.bf16.gmra.mrb[140].mxu0 %vm1262_vm0, %v4947_v19  ;;  %v2739_v63 = vmax.f32 %v1821_v39, 0.0  ;;  %v2386_v22 = vadd.f32 %v5406_v45, %v2385_v16  ;;  %v4674_v23 = vpop.f32.mrb[30].mxu1 }
 0x135   : > { %v2737_v42 = vmax.f32 %v1813_v33, 0.0  ;;  %4639 = vmatprep.mubr.msk.bf16.mxu0 %vm1262_vm0, %v4950_v25  ;;  %v3158_v24 = vadd.f32 %v3157_v15, %v2878_v5  ;;  %v2394_v25 = vadd.f32 %v4673_v11, %v5406_v45  ;;  %v2388_v26 = vpop.f32.mrb[31].mxu1  ;;  %v2397_v39 = vadd.f32 %v4674_v23, %v5406_v45  ;;  %v4958_v11 = vld [vmem:[%s6494_s3 + $0x10] sm:$0xff]  }
 0x136   : > { %v2880_v33 = vmax.f32 %v2386_v22, 0.0  ;;  %v2389_v34 = vadd.f32 %v5406_v45, %v2388_v26  ;;  %v4677_v54 = vpop.f32.mrb[32].mxu1  ;;  %4756 = vmatpush3.bf16.msra.mxu1 %v4958_v11 }
 0x137   : > { %v2997_v51 = vadd.f32 %v2737_v42, %v2736_v41  ;;  %v4533_v52 = vpop.f32.mrb[36].mxu0  ;;  %v3159_v38 = vadd.f32 %v3158_v24, %v2879_v12  ;;  %v2882_v48 = vmax.f32 %v2394_v25, 0.0  ;;  %v2401_v59 = vpop.f32.mrb[33].mxu1  ;;  %v4959_v24 = vld [vmem:[%s6494_s3 + $0x18] sm:$0xff]   ;;  %4757 = vmatprep.subr.bf16.mxu1 %v5080_v43 }
 0x138   : > { %v1825_v57 = vpop.f32.mrb[37].mxu0  ;;  %v1834_v7 = vadd.f32 %v4533_v52, %v5406_v45  ;;  %v2881_v46 = vmax.f32 %v2389_v34, 0.0 }
 0x139   : > { %v2998_v0 = vadd.f32 %v2997_v51, %v2738_v50  ;;  %v1826_v1 = vadd.f32 %v5406_v45, %v1825_v57  ;;  %v4534_v2 = vpop.f32.mrb[38].mxu0  ;;  %v3160_v49 = vadd.f32 %v3159_v38, %v2880_v33  ;;  %v2883_v57 = vmax.f32 %v2397_v39, 0.0 }
 0x13a   : > { %v1828_v4 = vpop.f32.mrb[39].mxu0  ;;  %v1837_v19 = vadd.f32 %v4534_v2, %v5406_v45  ;;  %v2742_v27 = vmax.f32 %v1834_v7, 0.0  ;;  %v4678_v2 = vpop.f32.mrb[34].mxu1  ;;  %4758 = vmatpush3.bf16.msra.mxu1 %v4959_v24 }
 0x13b   : > { %v2740_v8 = vmax.f32 %v1826_v1, 0.0  ;;  %v2999_v9 = vadd.f32 %v2998_v0, %v2739_v63  ;;  %v1829_v10 = vadd.f32 %v5406_v45, %v1828_v4  ;;  %v2402_v1 = vadd.f32 %v5406_v45, %v2401_v59  ;;  %v2404_v5 = vpop.f32.mrb[35].mxu1  ;;  %4759 = vmatprep.subr.bf16.mxu1 %v5080_v43 }
 0x13c   : > { %4640 = vmatmul.mubr.msk.bf16.gmra.mrb[144].mxu0 %vm1262_vm0, %v4951_v58  ;;  %v2743_v40 = vmax.f32 %v1837_v19, 0.0  ;;  %v3161_v58 = vadd.f32 %v3160_v49, %v2881_v46  ;;  %v2410_v4 = vadd.f32 %v4677_v54, %v5406_v45  ;;  %v2413_v16 = vadd.f32 %v4678_v2, %v5406_v45 }
 0x13d   : > { %v3000_v17 = vadd.f32 %v2999_v9, %v2740_v8  ;;  %v2741_v21 = vmax.f32 %v1829_v10, 0.0  ;;  %v2884_v9 = vmax.f32 %v2402_v1, 0.0  ;;  %v2405_v10 = vadd.f32 %v5406_v45, %v2404_v5 }
 0x13e   : > { %v3162_v3 = vadd.f32 %v3161_v58, %v2882_v48  ;;  %v2886_v26 = vmax.f32 %v2410_v4, 0.0  ;;  %v2887_v38 = vmax.f32 %v2413_v16, 0.0 }
 0x13f   : > { %v3001_v28 = vadd.f32 %v3000_v17, %v2741_v21  ;;  %v4537_v29 = vpop.f32.mrb[40].mxu0  ;;  %v2885_v23 = vmax.f32 %v2405_v10, 0.0 }
 0x140   : > { %v1841_v37 = vpop.f32.mrb[41].mxu0  ;;  %v1850_v50 = vadd.f32 %v4537_v29, %v5406_v45  ;;  %v3163_v15 = vadd.f32 %v3162_v3, %v2883_v57 }
 0x141   : > { %v3002_v41 = vadd.f32 %v3001_v28, %v2742_v27  ;;  %v1842_v42 = vadd.f32 %v5406_v45, %v1841_v37  ;;  %v4538_v44 = vpop.f32.mrb[42].mxu0  ;;  %v4681_v37 = vpop.f32.mrb[36].mxu1 }
 0x142   : > { %v1844_v47 = vpop.f32.mrb[43].mxu0  ;;  %v1853_v63 = vadd.f32 %v4538_v44, %v5406_v45  ;;  %v2746_v6 = vmax.f32 %v1850_v50, 0.0  ;;  %v3164_v27 = vadd.f32 %v3163_v15, %v2884_v9  ;;  %v2426_v49 = vadd.f32 %v4681_v37, %v5406_v45 }
 0x143   : > { %v2744_v51 = vmax.f32 %v1842_v42, 0.0  ;;  %v3003_v52 = vadd.f32 %v3002_v41, %v2743_v40  ;;  %v1845_v53 = vadd.f32 %v5406_v45, %v1844_v47  ;;  %v2417_v40 = vpop.f32.mrb[37].mxu1 }
 0x144   : > { %v2747_v17 = vmax.f32 %v1853_v63, 0.0  ;;  %v3165_v39 = vadd.f32 %v3164_v27, %v2885_v23  ;;  %v2418_v46 = vadd.f32 %v5406_v45, %v2417_v40  ;;  %v4682_v47 = vpop.f32.mrb[38].mxu1  ;;  %v2890_v5 = vmax.f32 %v2426_v49, 0.0 }
 0x145   : > { %v3004_v62 = vadd.f32 %v3003_v52, %v2744_v51  ;;  %v2745_v0 = vmax.f32 %v1845_v53, 0.0  ;;  %v2420_v50 = vpop.f32.mrb[39].mxu1 }
 0x146   : > { %v3166_v48 = vadd.f32 %v3165_v39, %v2886_v26  ;;  %v2888_v54 = vmax.f32 %v2418_v46, 0.0  ;;  %v2421_v57 = vadd.f32 %v5406_v45, %v2420_v50  ;;  %v4685_v11 = vpop.f32.mrb[40].mxu1 }
 0x147   : > { %v3005_v7 = vadd.f32 %v3004_v62, %v2745_v0  ;;  %v4541_v8 = vpop.f32.mrb[44].mxu0  ;;  %v2429_v62 = vadd.f32 %v4682_v47, %v5406_v45  ;;  %v2433_v16 = vpop.f32.mrb[41].mxu1 }
 0x148   : > { %v1857_v12 = vpop.f32.mrb[45].mxu0  ;;  %v1866_v28 = vadd.f32 %v4541_v8, %v5406_v45  ;;  %v3167_v59 = vadd.f32 %v3166_v48, %v2887_v38  ;;  %v2889_v3 = vmax.f32 %v2421_v57, 0.0  ;;  %v4686_v23 = vpop.f32.mrb[42].mxu1 }
 0x149   : > { %v3006_v19 = vadd.f32 %v3005_v7, %v2746_v6  ;;  %v1858_v21 = vadd.f32 %v5406_v45, %v1857_v12  ;;  %v4542_v22 = vpop.f32.mrb[46].mxu0  ;;  %v2891_v12 = vmax.f32 %v2429_v62, 0.0  ;;  %v2436_v26 = vpop.f32.mrb[43].mxu1  ;;  %v2445_v39 = vadd.f32 %v4686_v23, %v5406_v45 }
 0x14a   : > { %v1860_v25 = vpop.f32.mrb[47].mxu0  ;;  %v1869_v42 = vadd.f32 %v4542_v22, %v5406_v45  ;;  %v2750_v51 = vmax.f32 %v1866_v28, 0.0  ;;  %v3168_v6 = vadd.f32 %v3167_v59, %v2888_v54  ;;  %v2434_v22 = vadd.f32 %v5406_v45, %v2433_v16  ;;  %v4689_v54 = vpop.f32.mrb[44].mxu1 }
 0x14b   : > { %v2748_v29 = vmax.f32 %v1858_v21, 0.0  ;;  %v3007_v33 = vadd.f32 %v3006_v19, %v2747_v17  ;;  %v1861_v34 = vadd.f32 %v5406_v45, %v1860_v25  ;;  %v2442_v25 = vadd.f32 %v4685_v11, %v5406_v45  ;;  %v2449_v62 = vpop.f32.mrb[45].mxu1 }
 0x14c   : > { %v2751_v63 = vmax.f32 %v1869_v42, 0.0  ;;  %v3169_v15 = vadd.f32 %v3168_v6, %v2889_v3  ;;  %v4690_v3 = vpop.f32.mrb[46].mxu1 }
 0x14d   : > { %v3008_v41 = vadd.f32 %v3007_v33, %v2748_v29  ;;  %v2749_v44 = vmax.f32 %v1861_v34, 0.0  ;;  %v2892_v33 = vmax.f32 %v2434_v22, 0.0  ;;  %v2437_v34 = vadd.f32 %v5406_v45, %v2436_v26  ;;  %v2452_v6 = vpop.f32.mrb[47].mxu1 }
 0x14e   : > { %v3170_v24 = vadd.f32 %v3169_v15, %v2890_v5  ;;  %v2894_v48 = vmax.f32 %v2442_v25, 0.0  ;;  %v2461_v5 = vadd.f32 %v4690_v3, %v5406_v45  ;;  %v2453_v11 = vadd.f32 %v5406_v45, %v2452_v6 }
 0x14f   : > { %v3009_v52 = vadd.f32 %v3008_v41, %v2749_v44  ;;  %v4545_v53 = vpop.f32.mrb[48].mxu0  ;;  %v2893_v46 = vmax.f32 %v2437_v34, 0.0 }
 0x150   : > { %v1873_v58 = vpop.f32.mrb[49].mxu0  ;;  %v1882_v7 = vadd.f32 %v4545_v53, %v5406_v45  ;;  %v3171_v38 = vadd.f32 %v3170_v24, %v2891_v12  ;;  %v2897_v23 = vmax.f32 %v2453_v11, 0.0  ;;  %v2899_v26 = vmax.f32 %v2461_v5, 0.0 }
 0x151   : > { %v3010_v0 = vadd.f32 %v3009_v52, %v2750_v51  ;;  %v1874_v1 = vadd.f32 %v5406_v45, %v1873_v58  ;;  %v4546_v2 = vpop.f32.mrb[50].mxu0  ;;  %v2895_v58 = vmax.f32 %v2445_v39, 0.0 }
 0x152   : > { %v1876_v4 = vpop.f32.mrb[51].mxu0  ;;  %v1885_v19 = vadd.f32 %v4546_v2, %v5406_v45  ;;  %v2754_v27 = vmax.f32 %v1882_v7, 0.0  ;;  %v3172_v49 = vadd.f32 %v3171_v38, %v2892_v33  ;;  %v2450_v2 = vadd.f32 %v5406_v45, %v2449_v62  ;;  %v4693_v34 = vpop.f32.mrb[48].mxu1 }
 0x153   : > { %v2752_v8 = vmax.f32 %v1874_v1, 0.0  ;;  %v3011_v9 = vadd.f32 %v3010_v0, %v2751_v63  ;;  %v1877_v10 = vadd.f32 %v5406_v45, %v1876_v4  ;;  %v2458_v1 = vadd.f32 %v4689_v54, %v5406_v45 }
 0x154   : > { %v2755_v40 = vmax.f32 %v1885_v19, 0.0  ;;  %v3173_v59 = vadd.f32 %v3172_v49, %v2893_v46  ;;  %v2474_v39 = vadd.f32 %v4693_v34, %v5406_v45 }
 0x155   : > { %v3012_v17 = vadd.f32 %v3011_v9, %v2752_v8  ;;  %v2753_v21 = vmax.f32 %v1877_v10, 0.0  ;;  %v2896_v10 = vmax.f32 %v2450_v2, 0.0  ;;  %v2898_v22 = vmax.f32 %v2458_v1, 0.0 }
 0x156   : > { %v3174_v4 = vadd.f32 %v3173_v59, %v2894_v48  ;;  %v4960_v48 = vld [vmem:[%s6494_s3 + $0x20] sm:$0xff]  }
 0x157   : > { %v3013_v28 = vadd.f32 %v3012_v17, %v2753_v21  ;;  %v4549_v29 = vpop.f32.mrb[52].mxu0  ;;  %v3182_v33 = vadd.f32 %v2897_v23, %v2896_v10  ;;  %4760 = vmatpush3.bf16.msra.mxu1 %v4960_v48 }
 0x158   : > { %v1889_v37 = vpop.f32.mrb[53].mxu0  ;;  %v1898_v50 = vadd.f32 %v4549_v29, %v5406_v45  ;;  %v5589_v16 = vadd.f32 %v3174_v4, %v2895_v58  ;;  %4761 = vmatprep.subr.bf16.mxu1 %v5080_v43 }
 0x159   : > { %v3014_v41 = vadd.f32 %v3013_v28, %v2754_v27  ;;  %v1890_v42 = vadd.f32 %v5406_v45, %v1889_v37  ;;  %v4550_v44 = vpop.f32.mrb[54].mxu0  ;;  %v2991_v37 = vrot.slane %v5529_v32, 4 }
 0x15a   : > { %v1892_v47 = vpop.f32.mrb[55].mxu0  ;;  %v1901_v57 = vadd.f32 %v4550_v44, %v5406_v45  ;;  %v2758_v7 = vmax.f32 %v1898_v50, 0.0  ;;  %v3183_v44 = vadd.f32 %v3182_v33, %v2898_v22 }
 0x15b   : > { %v2756_v51 = vmax.f32 %v1890_v42, 0.0  ;;  %v3015_v52 = vadd.f32 %v3014_v41, %v2755_v40  ;;  %v1893_v53 = vadd.f32 %v5406_v45, %v1892_v47  ;;  %v2465_v40 = vpop.f32.mrb[49].mxu1  ;;  %v2992_v59 = vadd.f32 %v2991_v37, %v5529_v32 }
 0x15c   : > { %v2759_v12 = vmax.f32 %v1901_v57, 0.0  ;;  %v2466_v46 = vadd.f32 %v5406_v45, %v2465_v40  ;;  %v4694_v47 = vpop.f32.mrb[50].mxu1  ;;  %v3184_v57 = vadd.f32 %v3183_v44, %v2899_v26 }
 0x15d   : > { %v3016_v63 = vadd.f32 %v3015_v52, %v2756_v51  ;;  %v2757_v0 = vmax.f32 %v1893_v53, 0.0  ;;  %v2477_v50 = vadd.f32 %v4694_v47, %v5406_v45  ;;  %v2468_v51 = vpop.f32.mrb[51].mxu1 }
 0x15e   : > { %v2900_v54 = vmax.f32 %v2466_v46, 0.0  ;;  %v2469_v58 = vadd.f32 %v5406_v45, %v2468_v51 }
 0x15f   : > { %v3017_v8 = vadd.f32 %v3016_v63, %v2757_v0  ;;  %v4553_v9 = vpop.f32.mrb[56].mxu0  ;;  %v2902_v0 = vmax.f32 %v2474_v39, 0.0 }
 0x160   : > { %v1905_v15 = vpop.f32.mrb[57].mxu0  ;;  %v1914_v24 = vadd.f32 %v4553_v9, %v5406_v45  ;;  %v3185_v4 = vadd.f32 %v3184_v57, %v2900_v54  ;;  %v2901_v5 = vmax.f32 %v2469_v58, 0.0 }
 0x161   : > { %v3018_v17 = vadd.f32 %v3017_v8, %v2758_v7  ;;  %v1906_v19 = vadd.f32 %v5406_v45, %v1905_v15  ;;  %v4554_v21 = vpop.f32.mrb[58].mxu0  ;;  %v2903_v8 = vmax.f32 %v2477_v50, 0.0  ;;  %v2993_v15 = vrot.slane %v2992_v59, 2 }
 0x162   : > { %v1908_v25 = vpop.f32.mrb[59].mxu0  ;;  %v1917_v38 = vadd.f32 %v4554_v21, %v5406_v45  ;;  %v2762_v49 = vmax.f32 %v1914_v24, 0.0  ;;  %v3186_v32 = vadd.f32 %v3185_v4, %v2901_v5 }
 0x163   : > { %v2760_v27 = vmax.f32 %v1906_v19, 0.0  ;;  %v3019_v28 = vadd.f32 %v3018_v17, %v2759_v12  ;;  %v1909_v29 = vadd.f32 %v5406_v45, %v1908_v25  ;;  %v4697_v12 = vpop.f32.mrb[52].mxu1  ;;  %v2994_v40 = vadd.f32 %v2993_v15, %v2992_v59 }
 0x164   : > { %v2763_v62 = vmax.f32 %v1917_v38, 0.0  ;;  %v2490_v19 = vadd.f32 %v4697_v12, %v5406_v45  ;;  %v2481_v21 = vpop.f32.mrb[53].mxu1  ;;  %v3187_v24 = vadd.f32 %v3186_v32, %v2902_v0  ;;  %v5619_v0 = vld [vmem:[%s6493_s2] ss:$0 sm:$0xff] }
 0x165   : > { %v3020_v41 = vadd.f32 %v3019_v28, %v2760_v27  ;;  %v2761_v42 = vmax.f32 %v1909_v29, 0.0  ;;  %v2482_v25 = vadd.f32 %v5406_v45, %v2481_v21  ;;  %v4698_v26 = vpop.f32.mrb[54].mxu1 }
 0x166   : > { %v2493_v28 = vadd.f32 %v4698_v26, %v5406_v45  ;;  %v2484_v29 = vpop.f32.mrb[55].mxu1  ;;  %v3188_v38 = vadd.f32 %v3187_v24, %v2903_v8  ;;  %v2906_v44 = vmax.f32 %v2490_v19, 0.0 }
 0x167   : > { %v3021_v52 = vadd.f32 %v3020_v41, %v2761_v42  ;;  %v4557_v53 = vpop.f32.mrb[60].mxu0  ;;  %v2904_v37 = vmax.f32 %v2482_v25, 0.0  ;;  %v2485_v39 = vadd.f32 %v5406_v45, %v2484_v29 }
 0x168   : > { %v1921_v63 = vpop.f32.mrb[61].mxu0  ;;  %v1930_v6 = vadd.f32 %v4557_v53, %v5406_v45  ;;  %v2907_v57 = vmax.f32 %v2493_v28, 0.0 }
 0x169   : > { %v3022_v1 = vadd.f32 %v3021_v52, %v2762_v49  ;;  %v1922_v2 = vadd.f32 %v5406_v45, %v1921_v63  ;;  %v4558_v3 = vpop.f32.mrb[62].mxu0  ;;  %v3189_v49 = vadd.f32 %v3188_v38, %v2904_v37  ;;  %v2905_v50 = vmax.f32 %v2485_v39, 0.0 }
 0x16a   : > { %v1924_v7 = vpop.f32.mrb[63].mxu0  ;;  %v1933_v17 = vadd.f32 %v4558_v3, %v5406_v45  ;;  %v2766_v27 = vmax.f32 %v1930_v6, 0.0  ;;  %v2995_v63 = vrot.slane %v2994_v40, 1 }
 0x16b   : > { %v2764_v9 = vmax.f32 %v1922_v2, 0.0  ;;  %v3023_v10 = vadd.f32 %v3022_v1, %v2763_v62  ;;  %v1925_v11 = vadd.f32 %v5406_v45, %v1924_v7  ;;  %v3190_v58 = vadd.f32 %v3189_v49, %v2905_v50  ;;  %v4701_v62 = vpop.f32.mrb[56].mxu1 }
 0x16c   : > { %v2767_v41 = vmax.f32 %v1933_v17, 0.0  ;;  %v2497_v2 = vpop.f32.mrb[57].mxu1  ;;  %v2506_v8 = vadd.f32 %v5619_v0, %v4701_v62  ;;  %v2996_v17 = vadd.f32 %v2995_v63, %v2994_v40 }
 0x16d   : > { %v3024_v22 = vadd.f32 %v3023_v10, %v2764_v9  ;;  %v2765_v23 = vmax.f32 %v1925_v11, 0.0  ;;  %v3191_v5 = vadd.f32 %v3190_v58, %v2906_v44  ;;  %v2498_v6 = vadd.f32 %v5619_v0, %v2497_v2  ;;  %v4702_v7 = vpop.f32.mrb[58].mxu1 }
 0x16e   : > { %v2500_v9 = vpop.f32.mrb[59].mxu1  ;;  %v3257_v44 = vmul.f32 0.00390625, %v2996_v17 }
 0x16f   : > { %v3025_v33 = vadd.f32 %v3024_v22, %v2765_v23  ;;  %v4561_v34 = vpop.f32.mrb[64].mxu0  ;;  %v2908_v12 = vmax.f32 %v2498_v6, 0.0  ;;  %v3192_v15 = vadd.f32 %v3191_v5, %v2907_v57  ;;  %v2509_v22 = vadd.f32 %v5619_v0, %v4702_v7 }
 0x170   : > { %v1937_v42 = vpop.f32.mrb[65].mxu0  ;;  %v1946_v51 = vadd.f32 %v4561_v34, %v5406_v45  ;;  %v2501_v23 = vadd.f32 %v5619_v0, %v2500_v9  ;;  %v2910_v34 = vmax.f32 %v2506_v8, 0.0  ;;  %v3265_v5 = vpack.c.bf16 %v3257_v44, %v3257_v44 }
 0x171   : > { %v3026_v46 = vadd.f32 %v3025_v33, %v2766_v27  ;;  %v1938_v47 = vadd.f32 %v5406_v45, %v1937_v42  ;;  %v4562_v48 = vpop.f32.mrb[66].mxu0  ;;  %v3193_v28 = vadd.f32 %v3192_v15, %v2908_v12  ;;  %v4705_v42 = vpop.f32.mrb[60].mxu1 }
 0x172   : > { %v1940_v52 = vpop.f32.mrb[67].mxu0  ;;  %v1949_v1 = vadd.f32 %v5619_v0, %v4562_v48  ;;  %v2909_v37 = vmax.f32 %v2501_v23, 0.0  ;;  %v2513_v49 = vpop.f32.mrb[61].mxu1  ;;  %v2522_v62 = vadd.f32 %v5619_v0, %v4705_v42 }
 0x173   : > { %v3027_v53 = vadd.f32 %v3026_v46, %v2767_v41  ;;  %v1941_v54 = vadd.f32 %v5406_v45, %v1940_v52  ;;  %v2768_v59 = vmax.f32 %v1938_v47, 0.0  ;;  %v2770_v45 = vmax.f32 %v1946_v51, 0.0 }
 0x174   : > { %v2771_v19 = vmax.f32 %v1949_v1, 0.0  ;;  %v2911_v47 = vmax.f32 %v2509_v22, 0.0  ;;  %v3194_v48 = vadd.f32 %v3193_v28, %v2909_v37 }
 0x175   : > { %v3028_v3 = vrot.slane %v3027_v53, 4  ;;  %v2769_v4 = vmax.f32 %v1941_v54, 0.0  ;;  %v4706_v54 = vpop.f32.mrb[62].mxu1 }
 0x176   : > { %v3195_v58 = vadd.f32 %v3194_v48, %v2910_v34  ;;  %v2516_v63 = vpop.f32.mrb[63].mxu1  ;;  %v2525_v8 = vadd.f32 %v5619_v0, %v4706_v54 }
 0x177   : > { %v3029_v10 = vadd.f32 %v3028_v3, %v3027_v53  ;;  %v3034_v11 = vadd.f32 %v2769_v4, %v2768_v59  ;;  %v4565_v32 = vpop.f32.mrb[68].mxu0  ;;  %v2514_v53 = vadd.f32 %v5619_v0, %v2513_v49  ;;  %v2517_v4 = vadd.f32 %v5619_v0, %v2516_v63 }
 0x178   : > { %v1953_v21 = vpop.f32.mrb[69].mxu0  ;;  %v1962_v29 = vadd.f32 %v5619_v0, %v4565_v32 }
 0x179   : > { %v3030_v24 = vrot.slane %v3029_v10, 2  ;;  %v3035_v25 = vadd.f32 %v3034_v11, %v2770_v45  ;;  %v1954_v26 = vadd.f32 %v5619_v0, %v1953_v21  ;;  %v4566_v27 = vpop.f32.mrb[70].mxu0  ;;  %v2912_v3 = vmax.f32 %v2514_v53, 0.0  ;;  %v4961_v53 = vld [vmem:[%s6494_s3 + $0x28] sm:$0xff]  }
 0x17a   : > { %v1956_v33 = vpop.f32.mrb[71].mxu0  ;;  %v1965_v46 = vadd.f32 %v5619_v0, %v4566_v27  ;;  %v2774_v57 = vmax.f32 %v1962_v29, 0.0  ;;  %v3196_v45 = vadd.f32 %v3195_v58, %v2911_v47  ;;  %v2913_v12 = vmax.f32 %v2517_v4, 0.0  ;;  %4762 = vmatpush3.bf16.msra.mxu1 %v4961_v53 }
 0x17b   : > { %v3031_v38 = vadd.f32 %v3030_v24, %v3029_v10  ;;  %v2772_v39 = vmax.f32 %v1954_v26, 0.0  ;;  %v3036_v40 = vadd.f32 %v3035_v25, %v2771_v19  ;;  %v1957_v41 = vadd.f32 %v5619_v0, %v1956_v33  ;;  %v4709_v26 = vpop.f32.mrb[64].mxu1  ;;  %4763 = vmatprep.subr.bf16.mxu1 %v5080_v43 }
 0x17c   : > { %v2775_v6 = vmax.f32 %v1965_v46, 0.0  ;;  %v2914_v19 = vmax.f32 %v2522_v62, 0.0  ;;  %v3197_v21 = vadd.f32 %v3196_v45, %v2912_v3  ;;  %v3304_v27 = vunpack.c.l.b16 %v3265_v5  ;;  %v2529_v34 = vpop.f32.mrb[65].mxu1 }
 0x17d   : > { %v3032_v50 = vrot.slane %v3031_v38, 1  ;;  %v3037_v51 = vadd.f32 %v3036_v40, %v2772_v39  ;;  %v2773_v52 = vmax.f32 %v1957_v41, 0.0  ;;  %v2915_v29 = vmax.f32 %v2525_v8, 0.0  ;;  %v4710_v41 = vpop.f32.mrb[66].mxu1 }
 0x17e   : > { %v3198_v33 = vadd.f32 %v3197_v21, %v2913_v12  ;;  %v2530_v40 = vadd.f32 %v5619_v0, %v2529_v34  ;;  %v2538_v46 = vadd.f32 %v5619_v0, %v4709_v26  ;;  %v2532_v47 = vpop.f32.mrb[67].mxu1  ;;  %v2541_v58 = vadd.f32 %v5619_v0, %v4710_v41 }
 0x17f   : > { %v3033_v59 = vadd.f32 %v3032_v50, %v3031_v38  ;;  %v3038_v1 = vadd.f32 %v3037_v51, %v2773_v52  ;;  %v4569_v2 = vpop.f32.mrb[72].mxu0  ;;  %v2533_v52 = vadd.f32 %v5619_v0, %v2532_v47 }
 0x180   : > { %v1969_v7 = vpop.f32.mrb[73].mxu0  ;;  %v1978_v15 = vadd.f32 %v5619_v0, %v4569_v2  ;;  %v3199_v44 = vadd.f32 %v3198_v33, %v2914_v19  ;;  %v2916_v51 = vmax.f32 %v2530_v40, 0.0  ;;  %v2918_v4 = vmax.f32 %v2538_v46, 0.0 }
 0x181   : > { %v3258_v9 = vmul.f32 0.00390625, %v3033_v59  ;;  %v3039_v10 = vadd.f32 %v3038_v1, %v2774_v57  ;;  %v1970_v11 = vadd.f32 %v5619_v0, %v1969_v7  ;;  %v4570_v32 = vpop.f32.mrb[74].mxu0  ;;  %v2917_v2 = vmax.f32 %v2533_v52, 0.0 }
 0x182   : > { %v1972_v17 = vpop.f32.mrb[75].mxu0  ;;  %v1981_v28 = vadd.f32 %v5619_v0, %v4570_v32  ;;  %v2778_v42 = vmax.f32 %v1978_v15, 0.0  ;;  %v3200_v57 = vadd.f32 %v3199_v44, %v2915_v29 }
 0x183   : > { %v3266_v22 = vpack.c.bf16 %v3258_v9, %v3258_v9  ;;  %v2776_v23 = vmax.f32 %v1970_v11, 0.0  ;;  %v3040_v24 = vadd.f32 %v3039_v10, %v2775_v6  ;;  %v1973_v25 = vadd.f32 %v5619_v0, %v1972_v17  ;;  %v4713_v9 = vpop.f32.mrb[68].mxu1 }
 0x184   : > { %v2779_v62 = vmax.f32 %v1981_v28, 0.0  ;;  %v3201_v5 = vadd.f32 %v3200_v57, %v2916_v51  ;;  %v2919_v10 = vmax.f32 %v2541_v58, 0.0  ;;  %v2545_v32 = vpop.f32.mrb[69].mxu1 }
 0x185   : > { %v3305_v37 = vunpack.c.l.b16 %v3266_v22  ;;  %v3041_v38 = vadd.f32 %v3040_v24, %v2776_v23  ;;  %v2777_v39 = vmax.f32 %v1973_v25, 0.0  ;;  %v2546_v19 = vadd.f32 %v5619_v0, %v2545_v32  ;;  %v4714_v21 = vpop.f32.mrb[70].mxu1 }
 0x186   : > { %v3202_v11 = vadd.f32 %v3201_v5, %v2917_v2  ;;  %v2554_v23 = vadd.f32 %v5619_v0, %v4713_v9  ;;  %v2548_v24 = vpop.f32.mrb[71].mxu1 }
 0x187   : > { %v5641_v48 = vsel %vm3312_vm1, %v3305_v37, %v3304_v27  ;;  %v3042_v49 = vadd.f32 %v3041_v38, %v2777_v39  ;;  %v4573_v50 = vpop.f32.mrb[76].mxu0  ;;  %v2920_v28 = vmax.f32 %v2546_v19, 0.0  ;;  %v2549_v29 = vadd.f32 %v5619_v0, %v2548_v24  ;;  %v4717_v53 = vpop.f32.mrb[72].mxu1 }
 0x188   : > { %v1985_v54 = vpop.f32.mrb[77].mxu0  ;;  %v1994_v6 = vadd.f32 %v5619_v0, %v4573_v50  ;;  %v3203_v22 = vadd.f32 %v3202_v11, %v2918_v4  ;;  %v2557_v37 = vadd.f32 %v5619_v0, %v4714_v21  ;;  %v2922_v46 = vmax.f32 %v2554_v23, 0.0  ;;  %v2561_v58 = vpop.f32.mrb[73].mxu1 }
 0x189   : > { %v3043_v63 = vadd.f32 %v3042_v49, %v2778_v42  ;;  %v1986_v59 = vadd.f32 %v5619_v0, %v1985_v54  ;;  %v4574_v1 = vpop.f32.mrb[78].mxu0  ;;  %v2921_v42 = vmax.f32 %v2549_v29, 0.0  ;;  %v4718_v2 = vpop.f32.mrb[74].mxu1  ;;  %v2570_v4 = vadd.f32 %v5619_v0, %v4717_v53 }
 0x18a   : > { %v1988_v3 = vpop.f32.mrb[79].mxu0  ;;  %v1997_v15 = vadd.f32 %v5619_v0, %v4574_v1  ;;  %v2782_v25 = vmax.f32 %v1994_v6, 0.0  ;;  %v3204_v34 = vadd.f32 %v3203_v22, %v2919_v10  ;;  %v2923_v54 = vmax.f32 %v2557_v37, 0.0  ;;  %v2564_v5 = vpop.f32.mrb[75].mxu1 }
 0x18b   : > { %v2780_v7 = vmax.f32 %v1986_v59, 0.0  ;;  %v3044_v45 = vadd.f32 %v3043_v63, %v2779_v62  ;;  %v1989_v8 = vadd.f32 %v5619_v0, %v1988_v3  ;;  %v2562_v1 = vadd.f32 %v5619_v0, %v2561_v58  ;;  %v4721_v29 = vpop.f32.mrb[76].mxu1 }
 0x18c   : > { %v2783_v38 = vmax.f32 %v1997_v15, 0.0  ;;  %v3205_v47 = vadd.f32 %v3204_v34, %v2920_v28  ;;  %v2565_v9 = vadd.f32 %v5619_v0, %v2564_v5  ;;  %v2573_v32 = vadd.f32 %v5619_v0, %v4718_v2 }
 0x18d   : > { %v3045_v12 = vadd.f32 %v3044_v45, %v2780_v7  ;;  %v2781_v17 = vmax.f32 %v1989_v8, 0.0  ;;  %v2924_v8 = vmax.f32 %v2562_v1, 0.0  ;;  %v2926_v23 = vmax.f32 %v2570_v4, 0.0 }
 0x18e   : > { %v3206_v57 = vadd.f32 %v3205_v47, %v2921_v42  ;;  %v2925_v21 = vmax.f32 %v2565_v9, 0.0  ;;  %v2927_v34 = vmax.f32 %v2573_v32, 0.0 }
 0x18f   : > { %v3046_v26 = vadd.f32 %v3045_v12, %v2781_v17  ;;  %v4577_v27 = vpop.f32.mrb[80].mxu0 }
 0x190   : > { %v2001_v33 = vpop.f32.mrb[81].mxu0  ;;  %v2010_v49 = vadd.f32 %v5619_v0, %v4577_v27  ;;  %v3207_v3 = vadd.f32 %v3206_v57, %v2922_v46 }
 0x191   : > { %v3047_v39 = vadd.f32 %v3046_v26, %v2782_v25  ;;  %v2002_v40 = vadd.f32 %v5619_v0, %v2001_v33  ;;  %v4578_v41 = vpop.f32.mrb[82].mxu0 }
 0x192   : > { %v2004_v44 = vpop.f32.mrb[83].mxu0  ;;  %v2013_v63 = vadd.f32 %v5619_v0, %v4578_v41  ;;  %v2786_v6 = vmax.f32 %v2010_v49, 0.0  ;;  %v3208_v11 = vadd.f32 %v3207_v3, %v2923_v54  ;;  %v2586_v41 = vadd.f32 %v5619_v0, %v4721_v29 }
 0x193   : > { %v2784_v50 = vmax.f32 %v2002_v40, 0.0  ;;  %v3048_v51 = vadd.f32 %v3047_v39, %v2783_v38  ;;  %v2005_v52 = vadd.f32 %v5619_v0, %v2004_v44  ;;  %v2577_v38 = vpop.f32.mrb[77].mxu1 }
 0x194   : > { %v2787_v12 = vmax.f32 %v2013_v63, 0.0  ;;  %v3209_v24 = vadd.f32 %v3208_v11, %v2924_v8  ;;  %v2578_v42 = vadd.f32 %v5619_v0, %v2577_v38  ;;  %v4722_v44 = vpop.f32.mrb[78].mxu1  ;;  %v2930_v2 = vmax.f32 %v2586_v41, 0.0 }
 0x195   : > { %v3049_v62 = vadd.f32 %v3048_v51, %v2784_v50  ;;  %v2785_v59 = vmax.f32 %v2005_v52, 0.0  ;;  %v2589_v47 = vadd.f32 %v5619_v0, %v4722_v44  ;;  %v2580_v49 = vpop.f32.mrb[79].mxu1 }
 0x196   : > { %v3210_v37 = vadd.f32 %v3209_v24, %v2925_v21  ;;  %v2928_v53 = vmax.f32 %v2578_v42, 0.0  ;;  %v2581_v54 = vadd.f32 %v5619_v0, %v2580_v49 }
 0x197   : > { %v3050_v7 = vadd.f32 %v3049_v62, %v2785_v59  ;;  %v4581_v45 = vpop.f32.mrb[84].mxu0 }
 0x198   : > { %v2017_v10 = vpop.f32.mrb[85].mxu0  ;;  %v2026_v25 = vadd.f32 %v5619_v0, %v4581_v45  ;;  %v3211_v46 = vadd.f32 %v3210_v37, %v2926_v23  ;;  %v2929_v3 = vmax.f32 %v2581_v54, 0.0 }
 0x199   : > { %v3051_v15 = vadd.f32 %v3050_v7, %v2786_v6  ;;  %v2018_v17 = vadd.f32 %v5619_v0, %v2017_v10  ;;  %v4582_v19 = vpop.f32.mrb[86].mxu0  ;;  %v2931_v6 = vmax.f32 %v2589_v47, 0.0  ;;  %v4725_v10 = vpop.f32.mrb[80].mxu1 }
 0x19a   : > { %v2020_v22 = vpop.f32.mrb[87].mxu0  ;;  %v2029_v33 = vadd.f32 %v5619_v0, %v4582_v19  ;;  %v2790_v50 = vmax.f32 %v2026_v25, 0.0  ;;  %v5673_v62 = vadd.f32 %v3211_v46, %v2927_v34  ;;  %v3219_v9 = vadd.f32 %v2929_v3, %v2928_v53 }
 0x19b   : > { %v2788_v26 = vmax.f32 %v2018_v17, 0.0  ;;  %v3052_v27 = vadd.f32 %v3051_v15, %v2787_v12  ;;  %v2021_v28 = vadd.f32 %v5619_v0, %v2020_v22  ;;  %v2602_v32 = vadd.f32 %v5619_v0, %v4725_v10  ;;  %v2593_v12 = vpop.f32.mrb[81].mxu1 }
 0x19c   : > { %v2791_v57 = vmax.f32 %v2029_v33, 0.0  ;;  %v3220_v19 = vadd.f32 %v3219_v9, %v2930_v2  ;;  %v2594_v21 = vadd.f32 %v5619_v0, %v2593_v12  ;;  %v4726_v22 = vpop.f32.mrb[82].mxu1 }
 0x19d   : > { %v3053_v39 = vadd.f32 %v3052_v27, %v2788_v26  ;;  %v2789_v40 = vmax.f32 %v2021_v28, 0.0  ;;  %v2605_v24 = vadd.f32 %v5619_v0, %v4726_v22  ;;  %v2596_v25 = vpop.f32.mrb[83].mxu1  ;;  %v2934_v38 = vmax.f32 %v2602_v32, 0.0 }
 0x19e   : > { %v2932_v28 = vmax.f32 %v2594_v21, 0.0  ;;  %v3221_v29 = vadd.f32 %v3220_v19, %v2931_v6  ;;  %v2597_v33 = vadd.f32 %v5619_v0, %v2596_v25  ;;  %v4729_v54 = vpop.f32.mrb[84].mxu1 }
 0x19f   : > { %v3054_v51 = vadd.f32 %v3053_v39, %v2789_v40  ;;  %v4585_v52 = vpop.f32.mrb[88].mxu0  ;;  %v2935_v49 = vmax.f32 %v2605_v24, 0.0  ;;  %v4962_v24 = vld [vmem:[%s6494_s3 + $0x30] sm:$0xff]  }
 0x1a0   : > { %v2033_v58 = vpop.f32.mrb[89].mxu0  ;;  %v2042_v4 = vadd.f32 %v5619_v0, %v4585_v52  ;;  %v3222_v42 = vadd.f32 %v3221_v29, %v2932_v28  ;;  %v2933_v44 = vmax.f32 %v2597_v33, 0.0  ;;  %4764 = vmatpush3.bf16.msra.mxu1 %v4962_v24 }
 0x1a1   : > { %v3055_v63 = vadd.f32 %v3054_v51, %v2790_v50  ;;  %v2034_v59 = vadd.f32 %v5619_v0, %v2033_v58  ;;  %v4586_v1 = vpop.f32.mrb[90].mxu0  ;;  %v2618_v58 = vadd.f32 %v5619_v0, %v4729_v54  ;;  %4765 = vmatprep.subr.bf16.mxu1 %v5080_v43 }
 0x1a2   : > { %v2036_v5 = vpop.f32.mrb[91].mxu0  ;;  %v2045_v11 = vadd.f32 %v5619_v0, %v4586_v1  ;;  %v2794_v23 = vmax.f32 %v2042_v4, 0.0  ;;  %v3223_v53 = vadd.f32 %v3222_v42, %v2933_v44 }
 0x1a3   : > { %v2792_v7 = vmax.f32 %v2034_v59, 0.0  ;;  %v3056_v45 = vadd.f32 %v3055_v63, %v2791_v57  ;;  %v2037_v8 = vadd.f32 %v5619_v0, %v2036_v5  ;;  %v2609_v63 = vpop.f32.mrb[85].mxu1 }
 0x1a4   : > { %v2795_v34 = vmax.f32 %v2045_v11, 0.0  ;;  %v3224_v2 = vadd.f32 %v3223_v53, %v2934_v38  ;;  %v2610_v3 = vadd.f32 %v5619_v0, %v2609_v63  ;;  %v4730_v4 = vpop.f32.mrb[86].mxu1 }
 0x1a5   : > { %v3057_v15 = vadd.f32 %v3056_v45, %v2792_v7  ;;  %v2793_v17 = vmax.f32 %v2037_v8, 0.0  ;;  %v2621_v6 = vadd.f32 %v5619_v0, %v4730_v4  ;;  %v2612_v7 = vpop.f32.mrb[87].mxu1 }
 0x1a6   : > { %v2936_v9 = vmax.f32 %v2610_v3, 0.0  ;;  %v3225_v10 = vadd.f32 %v3224_v2, %v2935_v49  ;;  %v2613_v11 = vadd.f32 %v5619_v0, %v2612_v7 }
 0x1a7   : > { %v3058_v26 = vadd.f32 %v3057_v15, %v2793_v17  ;;  %v4589_v27 = vpop.f32.mrb[92].mxu0  ;;  %v2938_v15 = vmax.f32 %v2618_v58, 0.0  ;;  %v2939_v29 = vmax.f32 %v2621_v6, 0.0 }
 0x1a8   : > { %v2049_v37 = vpop.f32.mrb[93].mxu0  ;;  %v2058_v46 = vadd.f32 %v5619_v0, %v4589_v27  ;;  %v3226_v22 = vadd.f32 %v3225_v10, %v2936_v9 }
 0x1a9   : > { %v3059_v39 = vadd.f32 %v3058_v26, %v2794_v23  ;;  %v2050_v40 = vadd.f32 %v5619_v0, %v2049_v37  ;;  %v4590_v41 = vpop.f32.mrb[94].mxu0  ;;  %v2937_v23 = vmax.f32 %v2613_v11, 0.0  ;;  %v4963_v37 = vld [vmem:[%s6494_s3 + $0x38] sm:$0xff]  }
 0x1aa   : > { %v2052_v47 = vpop.f32.mrb[95].mxu0  ;;  %v2061_v57 = vadd.f32 %v5619_v0, %v4590_v41  ;;  %v2798_v5 = vmax.f32 %v2058_v46, 0.0  ;;  %4766 = vmatpush3.bf16.msra.mxu1 %v4963_v37 }
 0x1ab   : > { %v2796_v50 = vmax.f32 %v2050_v40, 0.0  ;;  %v3060_v51 = vadd.f32 %v3059_v39, %v2795_v34  ;;  %v2053_v52 = vadd.f32 %v5619_v0, %v2052_v47  ;;  %v3227_v33 = vadd.f32 %v3226_v22, %v2937_v23  ;;  %v4733_v34 = vpop.f32.mrb[88].mxu1 }
 0x1ac   : > { %v2799_v32 = vmax.f32 %v2061_v57, 0.0  ;;  %v2625_v40 = vpop.f32.mrb[89].mxu1 }
 0x1ad   : > { %v3061_v59 = vadd.f32 %v3060_v51, %v2796_v50  ;;  %v2797_v1 = vmax.f32 %v2053_v52, 0.0  ;;  %v3228_v44 = vadd.f32 %v3227_v33, %v2938_v15  ;;  %v2626_v46 = vadd.f32 %v5619_v0, %v2625_v40  ;;  %v4734_v47 = vpop.f32.mrb[90].mxu1 }
 0x1ae   : > { %v2634_v50 = vadd.f32 %v5619_v0, %v4733_v34  ;;  %v2628_v51 = vpop.f32.mrb[91].mxu1  ;;  %v2637_v43 = vadd.f32 %v5619_v0, %v4734_v47 }
 0x1af   : > { %v3062_v45 = vadd.f32 %v3061_v59, %v2797_v1  ;;  %v4593_v8 = vpop.f32.mrb[96].mxu0  ;;  %v2940_v57 = vmax.f32 %v2626_v46, 0.0  ;;  %v3229_v58 = vadd.f32 %v3228_v44, %v2939_v29  ;;  %v2629_v1 = vadd.f32 %v5619_v0, %v2628_v51  ;;  %v4737_v15 = vpop.f32.mrb[92].mxu1 }
 0x1b0   : > { %v2065_v12 = vpop.f32.mrb[97].mxu0  ;;  %v2074_v25 = vadd.f32 %v5619_v0, %v4593_v8  ;;  %v2942_v8 = vmax.f32 %v2634_v50, 0.0  ;;  %v2641_v22 = vpop.f32.mrb[93].mxu1  ;;  %v2650_v33 = vadd.f32 %v5619_v0, %v4737_v15 }
 0x1b1   : > { %v3063_v17 = vadd.f32 %v3062_v45, %v2798_v5  ;;  %v2066_v19 = vadd.f32 %v5619_v0, %v2065_v12  ;;  %v4594_v21 = vpop.f32.mrb[98].mxu0  ;;  %v3230_v6 = vadd.f32 %v3229_v58, %v2940_v57  ;;  %v2941_v9 = vmax.f32 %v2629_v1, 0.0 }
 0x1b2   : > { %v2068_v26 = vpop.f32.mrb[99].mxu0  ;;  %v2077_v39 = vadd.f32 %v5619_v0, %v4594_v21  ;;  %v2802_v49 = vmax.f32 %v2074_v25, 0.0  ;;  %v2946_v58 = vmax.f32 %v2650_v33, 0.0 }
 0x1b3   : > { %v3064_v27 = vadd.f32 %v3063_v17, %v2799_v32  ;;  %v2069_v28 = vadd.f32 %v5619_v0, %v2068_v26  ;;  %v2800_v38 = vmax.f32 %v2066_v19, 0.0  ;;  %v2943_v19 = vmax.f32 %v2637_v43, 0.0 }
 0x1b4   : > { %v2803_v63 = vmax.f32 %v2077_v39, 0.0  ;;  %v3231_v21 = vadd.f32 %v3230_v6, %v2941_v9  ;;  %v2642_v26 = vadd.f32 %v5619_v0, %v2641_v22 }
 0x1b5   : > { %v3065_v41 = vrot.slane %v3064_v27, 4  ;;  %v2801_v42 = vmax.f32 %v2069_v28, 0.0 }
 0x1b6   : > { %v3232_v29 = vadd.f32 %v3231_v21, %v2942_v8  ;;  %v2944_v40 = vmax.f32 %v2642_v26, 0.0 }
 0x1b7   : > { %v3066_v52 = vadd.f32 %v3065_v41, %v3064_v27  ;;  %v3071_v53 = vadd.f32 %v2801_v42, %v2800_v38  ;;  %v4597_v54 = vpop.f32.mrb[100].mxu0  ;;  %v4738_v27 = vpop.f32.mrb[94].mxu1 }
 0x1b8   : > { %v2081_v59 = vpop.f32.mrb[101].mxu0  ;;  %v2090_v7 = vadd.f32 %v5619_v0, %v4597_v54  ;;  %v2644_v34 = vpop.f32.mrb[95].mxu1  ;;  %v3233_v46 = vadd.f32 %v3232_v29, %v2943_v19  ;;  %v2653_v47 = vadd.f32 %v5619_v0, %v4738_v27 }
 0x1b9   : > { %v3067_v2 = vrot.slane %v3066_v52, 2  ;;  %v3072_v3 = vadd.f32 %v3071_v53, %v2802_v49  ;;  %v2082_v4 = vadd.f32 %v5619_v0, %v2081_v59  ;;  %v4598_v5 = vpop.f32.mrb[102].mxu0  ;;  %v2645_v41 = vadd.f32 %v5619_v0, %v2644_v34 }
 0x1ba   : > { %v2084_v45 = vpop.f32.mrb[103].mxu0  ;;  %v2093_v17 = vadd.f32 %v5619_v0, %v4598_v5  ;;  %v2806_v28 = vmax.f32 %v2090_v7, 0.0  ;;  %v2947_v5 = vmax.f32 %v2653_v47, 0.0 }
 0x1bb   : > { %v3068_v10 = vadd.f32 %v3067_v2, %v3066_v52  ;;  %v2804_v11 = vmax.f32 %v2082_v4, 0.0  ;;  %v3073_v32 = vadd.f32 %v3072_v3, %v2803_v63  ;;  %v2085_v12 = vadd.f32 %v5619_v0, %v2084_v45  ;;  %v4741_v3 = vpop.f32.mrb[96].mxu1 }
 0x1bc   : > { %v2807_v42 = vmax.f32 %v2093_v17, 0.0  ;;  %v2945_v53 = vmax.f32 %v2645_v41, 0.0  ;;  %v3234_v63 = vadd.f32 %v3233_v46, %v2944_v40  ;;  %v2657_v7 = vpop.f32.mrb[97].mxu1  ;;  %v2666_v15 = vadd.f32 %v5619_v0, %v4741_v3 }
 0x1bd   : > { %v3069_v23 = vrot.slane %v3068_v10, 1  ;;  %v3074_v24 = vadd.f32 %v3073_v32, %v2804_v11  ;;  %v2805_v25 = vmax.f32 %v2085_v12, 0.0  ;;  %v4742_v11 = vpop.f32.mrb[98].mxu1 }
 0x1be   : > { %v3235_v6 = vadd.f32 %v3234_v63, %v2945_v53  ;;  %v2660_v17 = vpop.f32.mrb[99].mxu1  ;;  %v2669_v27 = vadd.f32 %v5619_v0, %v4742_v11 }
 0x1bf   : > { %v3070_v37 = vadd.f32 %v3069_v23, %v3068_v10  ;;  %v3075_v38 = vadd.f32 %v3074_v24, %v2805_v25  ;;  %v4601_v39 = vpop.f32.mrb[104].mxu0  ;;  %v2658_v10 = vadd.f32 %v5619_v0, %v2657_v7  ;;  %v2661_v24 = vadd.f32 %v5619_v0, %v2660_v17  ;;  %v4745_v46 = vpop.f32.mrb[100].mxu1 }
 0x1c0   : > { %v2097_v44 = vpop.f32.mrb[105].mxu0  ;;  %v2106_v54 = vadd.f32 %v5619_v0, %v4601_v39  ;;  %v3236_v12 = vadd.f32 %v3235_v6, %v2946_v58  ;;  %v2950_v39 = vmax.f32 %v2666_v15, 0.0  ;;  %v2951_v47 = vmax.f32 %v2669_v27, 0.0 }
 0x1c1   : > { %v3259_v49 = vmul.f32 0.00390625, %v3070_v37  ;;  %v3076_v50 = vadd.f32 %v3075_v38, %v2806_v28  ;;  %v2098_v51 = vadd.f32 %v5619_v0, %v2097_v44  ;;  %v4602_v52 = vpop.f32.mrb[106].mxu0  ;;  %v2948_v23 = vmax.f32 %v2658_v10, 0.0 }
 0x1c2   : > { %v2100_v57 = vpop.f32.mrb[107].mxu0  ;;  %v2109_v4 = vadd.f32 %v5619_v0, %v4602_v52  ;;  %v2810_v32 = vmax.f32 %v2106_v54, 0.0  ;;  %v3237_v26 = vadd.f32 %v3236_v12, %v2947_v5  ;;  %v2949_v37 = vmax.f32 %v2661_v24, 0.0 }
 0x1c3   : > { %v3267_v59 = vpack.c.bf16 %v3259_v49, %v3259_v49  ;;  %v2808_v43 = vmax.f32 %v2098_v51, 0.0  ;;  %v3077_v1 = vadd.f32 %v3076_v50, %v2807_v42  ;;  %v2101_v2 = vadd.f32 %v5619_v0, %v2100_v57  ;;  %v2673_v50 = vpop.f32.mrb[101].mxu1 }
 0x1c4   : > { %v2811_v28 = vmax.f32 %v2109_v4, 0.0  ;;  %v3238_v40 = vadd.f32 %v3237_v26, %v2948_v23  ;;  %v2674_v54 = vadd.f32 %v5619_v0, %v2673_v50  ;;  %v4746_v57 = vpop.f32.mrb[102].mxu1  ;;  %v2682_v63 = vadd.f32 %v5619_v0, %v4745_v46 }
 0x1c5   : > { %v3306_v45 = vunpack.c.l.b16 %v3267_v59  ;;  %v3078_v8 = vadd.f32 %v3077_v1, %v2808_v43  ;;  %v2809_v9 = vmax.f32 %v2101_v2, 0.0  ;;  %v2676_v59 = vpop.f32.mrb[103].mxu1  ;;  %v2685_v7 = vadd.f32 %v5619_v0, %v4746_v57 }
 0x1c6   : > { %v3239_v49 = vadd.f32 %v3238_v40, %v2949_v37  ;;  %v2952_v3 = vmax.f32 %v2674_v54, 0.0  ;;  %v2677_v4 = vadd.f32 %v5619_v0, %v2676_v59  ;;  %v2954_v12 = vmax.f32 %v2682_v63, 0.0  ;;  %v4749_v24 = vpop.f32.mrb[104].mxu1 }
 0x1c7   : > { %v5722_v19 = vsel %vm3314_vm3, %v3306_v45, %v5641_v48  ;;  %v3079_v21 = vadd.f32 %v3078_v8, %v2809_v9  ;;  %v4605_v22 = vpop.f32.mrb[108].mxu0  ;;  %v2689_v27 = vpop.f32.mrb[105].mxu1 }
 0x1c8   : > { %v2113_v25 = vpop.f32.mrb[109].mxu0  ;;  %v2122_v48 = vadd.f32 %v5619_v0, %v4605_v22  ;;  %v3240_v58 = vadd.f32 %v3239_v49, %v2950_v39  ;;  %v2953_v11 = vmax.f32 %v2677_v4, 0.0  ;;  %v4750_v37 = vpop.f32.mrb[106].mxu1  ;;  %v2698_v39 = vadd.f32 %v5619_v0, %v4749_v24 }
 0x1c9   : > { %v3080_v29 = vadd.f32 %v3079_v21, %v2810_v32  ;;  %v2114_v33 = vadd.f32 %v5619_v0, %v2113_v25  ;;  %v4606_v34 = vpop.f32.mrb[110].mxu0  ;;  %v2955_v25 = vmax.f32 %v2685_v7, 0.0  ;;  %v2692_v40 = vpop.f32.mrb[107].mxu1  ;;  %v2701_v50 = vadd.f32 %v5619_v0, %v4750_v37 }
 0x1ca   : > { %v2116_v38 = vpop.f32.mrb[111].mxu0  ;;  %v2125_v52 = vadd.f32 %v5619_v0, %v4606_v34  ;;  %v2814_v43 = vmax.f32 %v2122_v48, 0.0  ;;  %v3241_v6 = vadd.f32 %v3240_v58, %v2951_v47  ;;  %v2690_v34 = vadd.f32 %v5619_v0, %v2689_v27 }
 0x1cb   : > { %v2812_v41 = vmax.f32 %v2114_v33, 0.0  ;;  %v3081_v42 = vadd.f32 %v3080_v29, %v2811_v28  ;;  %v2117_v44 = vadd.f32 %v5619_v0, %v2116_v38  ;;  %v2693_v46 = vadd.f32 %v5619_v0, %v2692_v40 }
 0x1cc   : > { %v2815_v45 = vmax.f32 %v2125_v52, 0.0  ;;  %v3242_v15 = vadd.f32 %v3241_v6, %v2952_v3  ;;  %v2958_v63 = vmax.f32 %v2698_v39, 0.0  ;;  %v2959_v4 = vmax.f32 %v2701_v50, 0.0 }
 0x1cd   : > { %v3082_v51 = vadd.f32 %v3081_v42, %v2812_v41  ;;  %v2813_v53 = vmax.f32 %v2117_v44, 0.0  ;;  %v2956_v44 = vmax.f32 %v2690_v34, 0.0  ;;  %v2957_v57 = vmax.f32 %v2693_v46, 0.0 }
 0x1ce   : > { %v3243_v26 = vadd.f32 %v3242_v15, %v2953_v11 }
 0x1cf   : > { %v3083_v1 = vadd.f32 %v3082_v51, %v2813_v53  ;;  %v4609_v2 = vpop.f32.mrb[112].mxu0 }
 0x1d0   : > { %v2129_v5 = vpop.f32.mrb[113].mxu0  ;;  %v2138_v17 = vadd.f32 %v5619_v0, %v4609_v2  ;;  %v3244_v38 = vadd.f32 %v3243_v26, %v2954_v12 }
 0x1d1   : > { %v3084_v8 = vadd.f32 %v3083_v1, %v2814_v43  ;;  %v2130_v9 = vadd.f32 %v5619_v0, %v2129_v5  ;;  %v4610_v10 = vpop.f32.mrb[114].mxu0 }
 0x1d2   : > { %v2132_v32 = vpop.f32.mrb[115].mxu0  ;;  %v2141_v29 = vadd.f32 %v5619_v0, %v4610_v10  ;;  %v2818_v48 = vmax.f32 %v2138_v17, 0.0  ;;  %v3245_v49 = vadd.f32 %v3244_v38, %v2955_v25 }
 0x1d3   : > { %v2816_v21 = vmax.f32 %v2130_v9, 0.0  ;;  %v3085_v22 = vadd.f32 %v3084_v8, %v2815_v45  ;;  %v2133_v23 = vadd.f32 %v5619_v0, %v2132_v32 }
 0x1d4   : > { %v2819_v51 = vmax.f32 %v2141_v29, 0.0  ;;  %v3246_v59 = vadd.f32 %v3245_v49, %v2956_v44 }
 0x1d5   : > { %v3086_v28 = vadd.f32 %v3085_v22, %v2816_v21  ;;  %v2817_v33 = vmax.f32 %v2133_v23, 0.0 }
 0x1d6   : > { %v3247_v5 = vadd.f32 %v3246_v59, %v2957_v57 }
 0x1d7   : > { %v3087_v41 = vadd.f32 %v3086_v28, %v2817_v33  ;;  %v4613_v42 = vpop.f32.mrb[116].mxu0 }
 0x1d8   : > { %v2145_v47 = vpop.f32.mrb[117].mxu0  ;;  %v2154_v43 = vadd.f32 %v5619_v0, %v4613_v42  ;;  %v3248_v8 = vadd.f32 %v3247_v5, %v2958_v63 }
 0x1d9   : > { %v3088_v52 = vadd.f32 %v3087_v41, %v2818_v48  ;;  %v2146_v53 = vadd.f32 %v5619_v0, %v2145_v47  ;;  %v4614_v54 = vpop.f32.mrb[118].mxu0 }
 0x1da   : > { %v2148_v58 = vpop.f32.mrb[119].mxu0  ;;  %v2157_v7 = vadd.f32 %v5619_v0, %v4614_v54  ;;  %v2822_v9 = vmax.f32 %v2154_v43, 0.0  ;;  %v5746_v12 = vadd.f32 %v3248_v8, %v2959_v4 }
 0x1db   : > { %v2820_v1 = vmax.f32 %v2146_v53, 0.0  ;;  %v3089_v2 = vadd.f32 %v3088_v52, %v2819_v51  ;;  %v2149_v3 = vadd.f32 %v5619_v0, %v2148_v58 }
 0x1dc   : > { %v2823_v15 = vmax.f32 %v2157_v7, 0.0 }
 0x1dd   : > { %v3090_v6 = vadd.f32 %v3089_v2, %v2820_v1  ;;  %v2821_v45 = vmax.f32 %v2149_v3, 0.0 }
 0x1df   : > { %v3091_v10 = vadd.f32 %v3090_v6, %v2821_v45  ;;  %v4617_v11 = vpop.f32.mrb[120].mxu0 }
 0x1e0   : > { %v2161_v32 = vpop.f32.mrb[121].mxu0  ;;  %v2170_v24 = vadd.f32 %v5619_v0, %v4617_v11 }
 0x1e1   : > { %v3092_v17 = vadd.f32 %v3091_v10, %v2822_v9  ;;  %v2162_v21 = vadd.f32 %v5619_v0, %v2161_v32  ;;  %v4618_v22 = vpop.f32.mrb[122].mxu0 }
 0x1e2   : > { %v2164_v23 = vpop.f32.mrb[123].mxu0  ;;  %v2173_v29 = vadd.f32 %v5619_v0, %v4618_v22  ;;  %v2826_v34 = vmax.f32 %v2170_v24, 0.0 }
 0x1e3   : > { %v2824_v25 = vmax.f32 %v2162_v21, 0.0  ;;  %v3093_v26 = vadd.f32 %v3092_v17, %v2823_v15  ;;  %v2165_v27 = vadd.f32 %v5619_v0, %v2164_v23 }
 0x1e4   : > { %v2827_v40 = vmax.f32 %v2173_v29, 0.0 }
 0x1e5   : > { %v3094_v28 = vadd.f32 %v3093_v26, %v2824_v25  ;;  %v2825_v33 = vmax.f32 %v2165_v27, 0.0 }
 0x1e7   : > { %v3095_v37 = vadd.f32 %v3094_v28, %v2825_v33  ;;  %v4621_v38 = vpop.f32.mrb[124].mxu0 }
 0x1e8   : > { %v2177_v39 = vpop.f32.mrb[125].mxu0  ;;  %v2186_v46 = vadd.f32 %v5619_v0, %v4621_v38 }
 0x1e9   : > { %v3096_v48 = vadd.f32 %v3095_v37, %v2826_v34  ;;  %v2178_v41 = vadd.f32 %v5619_v0, %v2177_v39  ;;  %v4622_v42 = vpop.f32.mrb[126].mxu0  ;;  %v5765_v34 = vld [vmem:[%s6493_s2] ss:$0 sm:$0xff] }
 0x1ea   : > { %v2180_v44 = vpop.f32.mrb[127].mxu0  ;;  %v2189_v52 = vadd.f32 %v5619_v0, %v4622_v42  ;;  %v2830_v54 = vmax.f32 %v2186_v46, 0.0 }
 0x1eb   : > { %v2828_v47 = vmax.f32 %v2178_v41, 0.0  ;;  %v3097_v49 = vadd.f32 %v3096_v48, %v2827_v40  ;;  %v2181_v50 = vadd.f32 %v5619_v0, %v2180_v44 }
 0x1ec   : > { %v2831_v59 = vmax.f32 %v2189_v52, 0.0 }
 0x1ed   : > { %v3098_v51 = vadd.f32 %v3097_v49, %v2828_v47  ;;  %v2829_v53 = vmax.f32 %v2181_v50, 0.0 }
 0x1ef   : > { %v3099_v57 = vadd.f32 %v3098_v51, %v2829_v53  ;;  %v4625_v58 = vpop.f32.mrb[128].mxu0 }
 0x1f0   : > { %v2193_v63 = vpop.f32.mrb[129].mxu0  ;;  %v2202_v5 = vadd.f32 %v5619_v0, %v4625_v58 }
 0x1f1   : > { %v3100_v43 = vadd.f32 %v3099_v57, %v2830_v54  ;;  %v2194_v1 = vadd.f32 %v5619_v0, %v2193_v63  ;;  %v4626_v2 = vpop.f32.mrb[130].mxu0 }
 0x1f2   : > { %v2196_v3 = vpop.f32.mrb[131].mxu0  ;;  %v2205_v8 = vadd.f32 %v5619_v0, %v4626_v2  ;;  %v2834_v11 = vmax.f32 %v2202_v5, 0.0 }
 0x1f3   : > { %v3101_v4 = vadd.f32 %v3100_v43, %v2831_v59  ;;  %v2197_v6 = vadd.f32 %v5619_v0, %v2196_v3  ;;  %v2832_v45 = vmax.f32 %v2194_v1, 0.0 }
 0x1f4   : > { %v2835_v22 = vmax.f32 %v2205_v8, 0.0 }
 0x1f5   : > { %v3102_v7 = vrot.slane %v3101_v4, 4  ;;  %v2833_v9 = vmax.f32 %v2197_v6, 0.0 }
 0x1f7   : > { %v3103_v10 = vadd.f32 %v3102_v7, %v3101_v4  ;;  %v3108_v32 = vadd.f32 %v2833_v9, %v2832_v45  ;;  %v4629_v15 = vpop.f32.mrb[132].mxu0 }
 0x1f8   : > { %v2209_v17 = vpop.f32.mrb[133].mxu0  ;;  %v2218_v26 = vadd.f32 %v5619_v0, %v4629_v15 }
 0x1f9   : > { %v3104_v21 = vrot.slane %v3103_v10, 2  ;;  %v3109_v23 = vadd.f32 %v3108_v32, %v2834_v11  ;;  %v2210_v24 = vadd.f32 %v5619_v0, %v2209_v17  ;;  %v4630_v25 = vpop.f32.mrb[134].mxu0 }
 0x1fa   : > { %v2212_v27 = vpop.f32.mrb[135].mxu0  ;;  %v2221_v40 = vadd.f32 %v5765_v34, %v4630_v25  ;;  %v2838_v42 = vmax.f32 %v2218_v26, 0.0 }
 0x1fb   : > { %v3105_v28 = vadd.f32 %v3104_v21, %v3103_v10  ;;  %v2836_v29 = vmax.f32 %v2210_v24, 0.0  ;;  %v3110_v33 = vadd.f32 %v3109_v23, %v2835_v22  ;;  %v2213_v37 = vadd.f32 %v5765_v34, %v2212_v27 }
 0x1fc   : > { %v2839_v49 = vmax.f32 %v2221_v40, 0.0 }
 0x1fd   : > { %v3106_v38 = vrot.slane %v3105_v28, 1  ;;  %v3111_v39 = vadd.f32 %v3110_v33, %v2836_v29  ;;  %v2837_v48 = vmax.f32 %v2213_v37, 0.0 }
 0x1ff   : > { %v3107_v41 = vadd.f32 %v3106_v38, %v3105_v28  ;;  %v3112_v44 = vadd.f32 %v3111_v39, %v2837_v48  ;;  %v4633_v0 = vpop.f32.mrb[136].mxu0 }
 0x200   : > { %v2225_v46 = vpop.f32.mrb[137].mxu0  ;;  %v2234_v53 = vadd.f32 %v5765_v34, %v4633_v0 }
 0x201   : > { %v3260_v47 = vmul.f32 0.00390625, %v3107_v41  ;;  %v3113_v50 = vadd.f32 %v3112_v44, %v2838_v42  ;;  %v2226_v51 = vadd.f32 %v5765_v34, %v2225_v46  ;;  %v4634_v52 = vpop.f32.mrb[138].mxu0 }
 0x202   : > { %v2228_v54 = vpop.f32.mrb[139].mxu0  ;;  %v2237_v2 = vadd.f32 %v5765_v34, %v4634_v52  ;;  %v2842_v5 = vmax.f32 %v2234_v53, 0.0 }
 0x203   : > { %v3268_v57 = vpack.c.bf16 %v3260_v47, %v3260_v47  ;;  %v2840_v58 = vmax.f32 %v2226_v51, 0.0  ;;  %v3114_v63 = vadd.f32 %v3113_v50, %v2839_v49  ;;  %v2229_v59 = vadd.f32 %v5765_v34, %v2228_v54 }
 0x204   : > { %v2843_v8 = vmax.f32 %v2237_v2, 0.0  ;;  %v2274_v47 = vadd.f32 %v5765_v34, %v5440_v31  ;;  %v2277_v51 = vadd.f32 %v5765_v34, %v5446_v36  ;;  %v2282_v54 = vadd.f32 %v5765_v34, %v5437_v30 }
 0x205   : > { %v3307_v43 = vunpack.c.l.b16 %v3268_v57  ;;  %v3115_v1 = vadd.f32 %v3114_v63, %v2840_v58  ;;  %v2841_v3 = vmax.f32 %v2229_v59, 0.0  ;;  %v2285_v63 = vadd.f32 %v5765_v34, %v5444_v35 }
 0x206   : > { %v2852_v57 = vmax.f32 %v2274_v47, 0.0  ;;  %v2853_v59 = vmax.f32 %v2277_v51, 0.0  ;;  %v2290_v31 = vadd.f32 %v5765_v34, %v5461_v56  ;;  %v2293_v36 = vadd.f32 %v5765_v34, %v5467_v61 }
 0x207   : > { %v5774_v4 = vsel %vm3316_vm4, %v3307_v43, %v5722_v19  ;;  %v3116_v6 = vadd.f32 %v3115_v1, %v2841_v3  ;;  %v4637_v7 = vpop.f32.mrb[140].mxu0  ;;  %v2854_v1 = vmax.f32 %v2282_v54, 0.0  ;;  %v2855_v3 = vmax.f32 %v2285_v63, 0.0 }
 0x208   : > { %v2241_v45 = vpop.f32.mrb[141].mxu0  ;;  %v2250_v15 = vadd.f32 %v5765_v34, %v4637_v7  ;;  %v2298_v30 = vadd.f32 %v5765_v34, %v5458_v55  ;;  %v2301_v35 = vadd.f32 %v5765_v34, %v5465_v60  ;;  %v2306_v56 = vadd.f32 %v5765_v34, %v5477_v14 }
 0x209   : > { %v3117_v9 = vadd.f32 %v3116_v6, %v2842_v5  ;;  %v2242_v10 = vadd.f32 %v5765_v34, %v2241_v45  ;;  %v4638_v11 = vpop.f32.mrb[142].mxu0  ;;  %v2856_v6 = vmax.f32 %v2290_v31, 0.0  ;;  %v2857_v45 = vmax.f32 %v2293_v36, 0.0 }
 0x20a   : > { %v2244_v32 = vpop.f32.mrb[143].mxu0  ;;  %v2253_v19 = vadd.f32 %v5765_v34, %v4638_v11  ;;  %v2846_v25 = vmax.f32 %v2250_v15, 0.0  ;;  %v3213_v11 = vrot.slane %v5673_v62, 4  ;;  %v2859_v15 = vmax.f32 %v2301_v35, 0.0  ;;  %v5833_v35 = vld [vmem:[%s6496_s5 + $0x68] sm:$0xff] }
 0x20b   : > { %v2844_v17 = vmax.f32 %v2242_v10, 0.0  ;;  %v3118_v21 = vadd.f32 %v3117_v9, %v2843_v8  ;;  %v2245_v22 = vadd.f32 %v5765_v34, %v2244_v32  ;;  %v3176_v9 = vrot.slane %v5589_v16, 4 }
 0x20c   : > { %v2847_v29 = vmax.f32 %v2253_v19, 0.0  ;;  %v2858_v10 = vmax.f32 %v2298_v30, 0.0  ;;  %v3250_v32 = vrot.slane %v5746_v12, 4  ;;  %v2309_v55 = vadd.f32 %v5765_v34, %v5486_v20 }
 0x20d   : > { %v3119_v23 = vadd.f32 %v3118_v21, %v2844_v17  ;;  %v2845_v24 = vmax.f32 %v2245_v22, 0.0  ;;  %v3177_v60 = vadd.f32 %v3176_v9, %v5589_v16  ;;  %v2314_v21 = vadd.f32 %v5765_v34, %v5474_v13 }
 0x20e   : > { %v2860_v22 = vmax.f32 %v2306_v56, 0.0  ;;  %v3251_v14 = vadd.f32 %v3250_v32, %v5746_v12  ;;  %v3500_v56 = vmul.f32 %v5833_v35, %v5833_v35 }
 0x20f   : > { %v3120_v26 = vadd.f32 %v3119_v23, %v2845_v24  ;;  %v4641_v27 = vpop.f32.mrb[144].mxu0  ;;  %v3214_v23 = vadd.f32 %v3213_v11, %v5673_v62  ;;  %v2317_v24 = vadd.f32 %v5765_v34, %v5481_v18 }
 0x210   : > { %v2257_v28 = vpop.f32.mrb[145].mxu0  ;;  %v2266_v40 = vadd.f32 %v5765_v34, %v4641_v27  ;;  %v3178_v27 = vrot.slane %v3177_v60, 2 }
 0x211   : > { %v3121_v33 = vadd.f32 %v3120_v26, %v2846_v25  ;;  %v2258_v37 = vadd.f32 %v5765_v34, %v2257_v28  ;;  %v4642_v38 = vpop.f32.mrb[146].mxu0  ;;  %v2861_v25 = vmax.f32 %v2309_v55, 0.0  ;;  %v2862_v28 = vmax.f32 %v2314_v21, 0.0  ;;  %v5858_v55 = vld [vmem:[%s6496_s5] sm:$0xff] }
 0x212   : > { %v2260_v39 = vpop.f32.mrb[147].mxu0  ;;  %v2269_v0 = vadd.f32 %v5765_v34, %v4642_v38  ;;  %v2850_v49 = vmax.f32 %v2266_v40, 0.0  ;;  %v3215_v20 = vrot.slane %v3214_v23, 2  ;;  %v2863_v16 = vmax.f32 %v2317_v24, 0.0  ;;  %v5873_v21 = vld [vmem:[%s6496_s5 + $0x40] sm:$0xff] }
 0x213   : > { %v2848_v48 = vmax.f32 %v2258_v37, 0.0  ;;  %v3122_v41 = vadd.f32 %v3121_v33, %v2847_v29  ;;  %v2261_v42 = vadd.f32 %v5765_v34, %v2260_v39  ;;  %v3252_v33 = vrot.slane %v3251_v14, 2 }
 0x214   : > { %v2851_v52 = vmax.f32 %v2269_v0, 0.0  ;;  %v3179_v38 = vadd.f32 %v3178_v27, %v3177_v60  ;;  %v3216_v13 = vadd.f32 %v3215_v20, %v3214_v23  ;;  %v5868_v60 = vld [vmem:[%s6496_s5 + $0xc8] sm:$0xff]  ;;  %v3487_v23 = vmul.f32 %v5858_v55, %v5858_v55 }
 0x215   : > { %v3123_v44 = vadd.f32 %v3122_v41, %v2848_v48  ;;  %v2849_v46 = vmax.f32 %v2261_v42, 0.0  ;;  %v3253_v40 = vadd.f32 %v3252_v33, %v3251_v14  ;;  %v5896_v27 = vld [vmem:[%s6496_s5 + $0xe8] sm:$0xff] }
 0x216   : > { %v3180_v48 = vrot.slane %v3179_v38, 1  ;;  %v3217_v41 = vrot.slane %v3216_v13, 1 }
 0x217   : > { %v3124_v50 = vadd.f32 %v3123_v44, %v2849_v46  ;;  %v3254_v42 = vrot.slane %v3253_v40, 1 }
 0x218   : > { %v3181_v18 = vadd.f32 %v3180_v48, %v3179_v38  ;;  %v3218_v34 = vadd.f32 %v3217_v41, %v3216_v13  ;;  %v5924_v48 = vld [vmem:[%s6496_s5 + $0x128] sm:$0xff] }
 0x219   : > { %v3125_v53 = vadd.f32 %v3124_v50, %v2850_v49  ;;  %v3255_v46 = vadd.f32 %v3254_v42, %v3253_v40 }
 0x21a   : > { %v3262_v49 = vmul.f32 0.00390625, %v3181_v18  ;;  %v3263_v50 = vmul.f32 0.00390625, %v3218_v34  ;;  %v5933_v18 = vld [vmem:[%s6496_s5 + $0xe0] sm:$0xff]  ;;  %v5938_v34 = vld [vmem:[%s6496_s5 + $0x148] sm:$0xff] }
 0x21b   : > { %v3126_v58 = vadd.f32 %v3125_v53, %v2851_v52  ;;  %v3264_v52 = vmul.f32 0.00390625, %v3255_v46 }
 0x21c   : > { %v3270_v54 = vpack.c.bf16 %v3262_v49, %v3262_v49 }
 0x21d   : > { %v3127_v43 = vadd.f32 %v3126_v58, %v2852_v57  ;;  %v3271_v57 = vpack.c.bf16 %v3263_v50, %v3263_v50  ;;  %v3272_v63 = vpack.c.bf16 %v3264_v52, %v3264_v52  ;;  %v5947_v50 = vld [vmem:[%s6496_s5 + $0x100] sm:$0xff]  ;;  %v3515_v52 = vmul.f32 %v5933_v18, %v5933_v18 }
 0x21f   : > { %v3128_v2 = vadd.f32 %v3127_v43, %v2853_v59  ;;  %v3309_v43 = vunpack.c.l.b16 %v3270_v54  ;;  %v3528_v54 = vmul.f32 %v5938_v34, %v5938_v34 }
 0x221   : > { %v3129_v5 = vadd.f32 %v3128_v2, %v2854_v1  ;;  %v3310_v1 = vunpack.c.l.b16 %v3271_v57  ;;  %v3311_v2 = vunpack.c.l.b16 %v3272_v63  ;;  %v5966_v63 = vld [vmem:[%s6496_s5 + $0x188] sm:$0xff] }
 0x223   : > { %v3130_v7 = vadd.f32 %v3129_v5, %v2855_v3 }
 0x225   : > { %v3131_v8 = vadd.f32 %v3130_v7, %v2856_v6  ;;  %v5818_v6 = vld [vmem:[%s6496_s5 + $0x8] sm:$0xff] }
 0x226   : > { %v5823_v7 = vld [vmem:[%s6496_s5 + $0x28] sm:$0xff] }
 0x227   : > { %v3132_v61 = vadd.f32 %v3131_v8, %v2857_v45  ;;  %v3488_v45 = vmul.f32 %v5818_v6, %v5818_v6  ;;  %v3492_v8 = vmul.f32 %v5823_v7, %v5823_v7 }
 0x229   : > { %v3133_v17 = vadd.f32 %v3132_v61, %v2858_v10  ;;  %v5844_v10 = vld [vmem:[%s6496_s5 + $0x88] sm:$0xff]  ;;  %v3572_v11 = vadd.f32 %v3492_v8, %v3488_v45  ;;  %v5989_v8 = vld [vmem:[%s6496_s5 + $0x160] sm:$0xff] }
 0x22a   : > { %v5851_v61 = vld [vmem:[%s6496_s5 + $0xa8] sm:$0xff]  ;;  %v3504_v32 = vmul.f32 %v5844_v10, %v5844_v10 }
 0x22b   : > { %v3134_v19 = vadd.f32 %v3133_v17, %v2859_v15  ;;  %v5863_v17 = vld [vmem:[%s6496_s5 + $0x20] sm:$0xff]  ;;  %v3508_v14 = vmul.f32 %v5851_v61, %v5851_v61 }
 0x22d   : > { %v3135_v26 = vadd.f32 %v3134_v19, %v2860_v22  ;;  %v5878_v22 = vld [vmem:[%s6496_s5 + $0x60] sm:$0xff]  ;;  %v3491_v19 = vmul.f32 %v5863_v17, %v5863_v17 }
 0x22f   : > { %v3136_v29 = vadd.f32 %v3135_v26, %v2861_v25  ;;  %v5889_v25 = vld [vmem:[%s6496_s5 + $0x80] sm:$0xff]  ;;  %v3495_v26 = vmul.f32 %v5873_v21, %v5873_v21  ;;  %v3551_v20 = vadd.f32 %v3491_v19, %v3487_v23  ;;  %v6008_v19 = vld [vmem:[%s6496_s5 + $0x1e8] sm:$0xff] }
 0x230   : > { %v3503_v38 = vmul.f32 %v5889_v25, %v5889_v25  ;;  %v6003_v23 = vld [vmem:[%s6496_s5 + $0x180] sm:$0xff] }
 0x231   : > { %v3137_v37 = vadd.f32 %v3136_v29, %v2862_v28  ;;  %v3499_v28 = vmul.f32 %v5878_v22, %v5878_v22  ;;  %v3512_v29 = vmul.f32 %v5868_v60, %v5868_v60  ;;  %v3552_v13 = vadd.f32 %v3551_v20, %v3495_v26  ;;  %v6017_v20 = vld [vmem:[%s6496_s5 + $0x1a0] sm:$0xff] }
 0x233   : > { %v3138_v39 = vadd.f32 %v3137_v37, %v2863_v16  ;;  %v5905_v16 = vld [vmem:[%s6496_s5 + $0xa0] sm:$0xff]  ;;  %v5910_v37 = vld [vmem:[%s6496_s5 + $0x108] sm:$0xff] }
 0x234   : > { %v3507_v41 = vmul.f32 %v5905_v16, %v5905_v16  ;;  %v3520_v42 = vmul.f32 %v5910_v37, %v5910_v37 }
 0x235   : > { %v3139_v62 = vrot.slane %v3138_v39, 4 }
 0x237   : > { %v3140_v12 = vadd.f32 %v3139_v62, %v3138_v39  ;;  %v3516_v39 = vmul.f32 %v5896_v27, %v5896_v27  ;;  %v5919_v62 = vld [vmem:[%s6496_s5 + $0xc0] sm:$0xff] }
 0x239   : > { %v3141_v44 = vrot.slane %v3140_v12, 2 }
 0x23b   : > { %v3142_v0 = vadd.f32 %v3141_v44, %v3140_v12  ;;  %v3553_v12 = vadd.f32 %v3552_v13, %v3499_v28 }
 0x23d   : > { %v3143_v47 = vrot.slane %v3142_v0, 1  ;;  %v3554_v46 = vadd.f32 %v3553_v12, %v3503_v38  ;;  %v3548_v38 = vmul.f32 %v6008_v19, %v6008_v19 }
 0x23f   : > { %v3144_v51 = vadd.f32 %v3143_v47, %v3142_v0  ;;  %v3511_v0 = vmul.f32 %v5919_v62, %v5919_v62  ;;  %v3524_v47 = vmul.f32 %v5924_v48, %v5924_v48 }
 0x241   : > { %v3261_v53 = vmul.f32 0.00390625, %v3144_v51  ;;  %v5952_v51 = vld [vmem:[%s6496_s5 + $0x168] sm:$0xff] }
 0x243   : > { %v3269_v58 = vpack.c.bf16 %v3261_v53, %v3261_v53  ;;  %v3555_v53 = vadd.f32 %v3554_v46, %v3507_v41 }
 0x245   : > { %v3308_v59 = vunpack.c.l.b16 %v3269_v58  ;;  %v5961_v58 = vld [vmem:[%s6496_s5 + $0x120] sm:$0xff] }
 0x247   : > { %v3319_v31 = vsel %vm3318_vm5, %v3308_v59, %v5774_v4  ;;  %v5828_v4 = vld [vmem:[%s6496_s5 + $0x48] sm:$0xff]  ;;  %v3519_v59 = vmul.f32 %v5947_v50, %v5947_v50 }
 0x248   : > { %v3321_v3 = vsel %vm3320_vm6, %v3309_v43, %v3319_v31  ;;  %v3496_v9 = vmul.f32 %v5828_v4, %v5828_v4  ;;  %v3556_v43 = vadd.f32 %v3555_v53, %v3511_v0 }
 0x249   : > { %v3323_v36 = vsel %vm3322_vm7, %v3310_v1, %v3321_v3  ;;  %v3532_v1 = vmul.f32 %v5952_v51, %v5952_v51  ;;  %v5980_v3 = vld [vmem:[%s6496_s5 + $0x1a8] sm:$0xff] }
 0x24a   : > { %v3325_v5 = vsel %vm3324_vm8, %v3311_v2, %v3323_v36  ;;  %v3573_v15 = vadd.f32 %v3572_v11, %v3496_v9  ;;  %v5975_v2 = vld [vmem:[%s6496_s5 + $0x140] sm:$0xff]  ;;  %v3523_v36 = vmul.f32 %v5961_v58, %v5961_v58  ;;  %v5994_v9 = vld [vmem:[%s6496_s5 + $0x1c8] sm:$0xff] }
 0x24b   : > { %v3326_v30 = vpack.c.b16 %v3325_v5, %v3325_v5  ;;  %v3557_v5 = vadd.f32 %v3556_v43, %v3515_v52  ;;  %v3544_v26 = vmul.f32 %v5994_v9, %v5994_v9 }
 0x24c   : > { %v3574_v24 = vadd.f32 %v3573_v15, %v3500_v56  ;;  %v3527_v56 = vmul.f32 %v5975_v2, %v5975_v2 }
 0x24d   : > { %4768 = vmatmul.mubr.bf16.vlgmr.msra.gmra.mrb[108].mxu1 %v3326_v30  ;;  %v3536_v30 = vmul.f32 %v5966_v63, %v5966_v63  ;;  %v3558_v11 = vadd.f32 %v3557_v5, %v3519_v59 }
 0x24e   : > { %v3575_v33 = vadd.f32 %v3574_v24, %v3504_v32  ;;  %v3540_v32 = vmul.f32 %v5980_v3, %v5980_v3 }
 0x24f   : > { %v3559_v24 = vadd.f32 %v3558_v11, %v3523_v36 }
 0x250   : > { %v3576_v40 = vadd.f32 %v3575_v33, %v3508_v14  ;;  %v3531_v14 = vmul.f32 %v5989_v8, %v5989_v8 }
 0x251   : > { %v3560_v33 = vadd.f32 %v3559_v24, %v3527_v56 }
 0x252   : > { %v3577_v44 = vadd.f32 %v3576_v40, %v3512_v29  ;;  %v3535_v29 = vmul.f32 %v6003_v23, %v6003_v23  ;;  %v3539_v40 = vmul.f32 %v6017_v20, %v6017_v20 }
 0x253   : > { %v3561_v41 = vadd.f32 %v3560_v33, %v3531_v14 }
 0x254   : > { %v3578_v49 = vadd.f32 %v3577_v44, %v3516_v39  ;;  %v6026_v39 = vld [vmem:[%s6496_s5 + $0x1c0] sm:$0xff] }
 0x255   : > { %v3543_v44 = vmul.f32 %v6026_v39, %v6026_v39  ;;  %v3562_v0 = vadd.f32 %v3561_v41, %v3535_v29 }
 0x256   : > { %v3579_v57 = vadd.f32 %v3578_v49, %v3520_v42  ;;  %v6033_v42 = vld [vmem:[%s6496_s5 + $0x1e0] sm:$0xff] }
 0x257   : > { %v3563_v49 = vadd.f32 %v3562_v0, %v3539_v40 }
 0x258   : > { %v3580_v31 = vadd.f32 %v3579_v57, %v3524_v47  ;;  %v3547_v47 = vmul.f32 %v6033_v42, %v6033_v42 }
 0x259   : > { %v3564_v53 = vadd.f32 %v3563_v49, %v3543_v44 }
 0x25a   : > { %v3581_v45 = vadd.f32 %v3580_v31, %v3528_v54 }
 0x25b   : > { %v3565_v57 = vadd.f32 %v3564_v53, %v3547_v47  ;;  %v6092_v47 = vld [vmem:[%s6496_s5 + $0x58] sm:$0xff] }
 0x25c   : > { %v3582_v15 = vadd.f32 %v3581_v45, %v3532_v1  ;;  %v3498_v49 = vmul.f32 %v6092_v47, %v6092_v47  ;;  %v6099_v53 = vld [vmem:[%s6496_s5 + $0x78] sm:$0xff] }
 0x25d   : > { %v3566_v43 = vrot.slane %v3565_v57, 4 }
 0x25e   : > { %v3583_v28 = vadd.f32 %v3582_v15, %v3536_v30 }
 0x25f   : > { %v3567_v31 = vadd.f32 %v3566_v43, %v3565_v57 }
 0x260   : > { %v3584_v13 = vadd.f32 %v3583_v28, %v3540_v32 }
 0x261   : > { %v3568_v5 = vrot.slane %v3567_v31, 2 }
 0x262   : > { %v3585_v12 = vadd.f32 %v3584_v13, %v3544_v26 }
 0x263   : > { %v3569_v45 = vadd.f32 %v3568_v5, %v3567_v31  ;;  %v6113_v31 = vld [vmem:[%s6496_s5 + $0xb8] sm:$0xff] }
 0x264   : > { %v3586_v46 = vadd.f32 %v3585_v12, %v3548_v38 }
 0x265   : > { %v3570_v11 = vrot.slane %v3569_v45, 1 }
 0x266   : > { %v3587_v52 = vrot.slane %v3586_v46, 4 }
 0x267   : > { %v3571_v32 = vadd.f32 %v3570_v11, %v3569_v45  ;;  %v6127_v11 = vld [vmem:[%s6496_s5 + $0xf8] sm:$0xff] }
 0x268   : > { %v3588_v54 = vadd.f32 %v3587_v52, %v3586_v46 }
 0x269   : > { %v3635_v15 = vadd.f32 1e-06, %v3571_v32  ;;  %v3518_v32 = vmul.f32 %v6127_v11, %v6127_v11 }
 0x26a   : > { %v3589_v59 = vrot.slane %v3588_v54, 2 }
 0x26c   : > { %v3590_v1 = vadd.f32 %v3589_v59, %v3588_v54  ;;  %v3502_v54 = vmul.f32 %v6099_v53, %v6099_v53  ;;  %v6106_v59 = vld [vmem:[%s6496_s5 + $0x98] sm:$0xff] }
 0x26d   : > { %v3506_v43 = vmul.f32 %v6106_v59, %v6106_v59 }
 0x26e   : > { %v3591_v36 = vrot.slane %v3590_v1, 1 }
 0x270   : > { %v3592_v30 = vadd.f32 %v3591_v36, %v3590_v1  ;;  %v3510_v36 = vmul.f32 %v6113_v31, %v6113_v31 }
 0x272   : > { %v3636_v56 = vadd.f32 1e-06, %v3592_v30  ;;  %v6120_v30 = vld [vmem:[%s6496_s5 + $0xd8] sm:$0xff] }
 0x273   : > { %v3514_v45 = vmul.f32 %v6120_v30, %v6120_v30 }
 0x274   : > { %4964 = vrsqrt.f32 %v3636_v56 }
 0x275   : > { %4966 = vrsqrt.f32 %v3635_v15 }
 0x27e   : > { %v6039_v14 = vpop.eup %4964 }
 0x27f   : > { %v3644_v24 = vmul.f32 %v6039_v14, %v5818_v6  ;;  %v3648_v26 = vmul.f32 %v6039_v14, %v5823_v7  ;;  %v3652_v29 = vmul.f32 %v6039_v14, %v5828_v4  ;;  %v3656_v33 = vmul.f32 %v6039_v14, %v5833_v35  ;;  %v6049_v38 = vpop.eup %4966 }
 0x280   : > { %v3643_v13 = vmul.f32 %v6049_v38, %v5858_v55  ;;  %v3647_v40 = vmul.f32 %v6049_v38, %v5863_v17  ;;  %v3651_v6 = vmul.f32 %v6049_v38, %v5873_v21  ;;  %v3655_v7 = vmul.f32 %v6049_v38, %v5878_v22 }
 0x281   : > { %v3709_v28 = vpack.c.bf16 %v3648_v26, %v3644_v24  ;;  %v3713_v41 = vpack.c.bf16 %v3656_v33, %v3652_v29  ;;  %v3660_v4 = vmul.f32 %v6039_v14, %v5844_v10  ;;  %v3664_v35 = vmul.f32 %v6039_v14, %v5851_v61  ;;  %v6134_v24 = vld [vmem:[%s6496_s5 + $0x118] sm:$0xff] }
 0x282   : > { %v3708_v12 = vpack.c.bf16 %v3647_v40, %v3643_v13  ;;  %v3712_v44 = vpack.c.bf16 %v3655_v7, %v3651_v6  ;;  %v3659_v55 = vmul.f32 %v6049_v38, %v5889_v25  ;;  %v3663_v17 = vmul.f32 %v6049_v38, %v5905_v16  ;;  %v6141_v29 = vld [vmem:[%s6496_s5 + $0x138] sm:$0xff] }
 0x283   : > { %3740 = vmatprep.subr.bf16.mxu1 %v3709_v28  ;;  %v3717_v21 = vpack.c.bf16 %v3664_v35, %v3660_v4  ;;  %v3668_v22 = vmul.f32 %v6039_v14, %v5868_v60  ;;  %v3672_v10 = vmul.f32 %v6039_v14, %v5896_v27  ;;  %v3667_v61 = vmul.f32 %v6049_v38, %v5919_v62  ;;  %v6078_v60 = vld [vmem:[%s6496_s5 + $0x18] sm:$0xff] }
 0x284   : > { %3741 = vmatpush1.bf16.msra.mxu1 %v3708_v12  ;;  %v3716_v0 = vpack.c.bf16 %v3663_v17, %v3659_v55  ;;  %v3671_v46 = vmul.f32 %v6049_v38, %v5933_v18  ;;  %v6083_v27 = vld [vmem:[%s6496_s5 + $0x38] sm:$0xff]  ;;  %v3490_v62 = vmul.f32 %v6078_v60, %v6078_v60  ;;  %v3522_v26 = vmul.f32 %v6134_v24, %v6134_v24 }
 0x285   : > { %3742 = vmatprep.subr.bf16.mxu1 %v3713_v41  ;;  %v3721_v25 = vpack.c.bf16 %v3672_v10, %v3668_v22  ;;  %v3494_v18 = vmul.f32 %v6083_v27, %v6083_v27  ;;  %v3526_v33 = vmul.f32 %v6141_v29, %v6141_v29  ;;  %v6148_v40 = vld [vmem:[%s6496_s5 + $0x158] sm:$0xff] }
 0x286   : > { %v3720_v16 = vpack.c.bf16 %v3671_v46, %v3667_v61  ;;  %v3530_v6 = vmul.f32 %v6148_v40, %v6148_v40  ;;  %v6155_v41 = vld [vmem:[%s6496_s5 + $0x178] sm:$0xff] }
 0x287   : > { %v3614_v52 = vadd.f32 %v3494_v18, %v3490_v62  ;;  %v3534_v4 = vmul.f32 %v6155_v41, %v6155_v41  ;;  %v6165_v12 = vld [vmem:[%s6496_s5 + $0x198] sm:$0xff] }
 0x288   : > { %3743 = vmatpush1.bf16.msra.mxu1 %v3712_v44  ;;  %v3538_v44 = vmul.f32 %v6165_v12, %v6165_v12  ;;  %v6172_v17 = vld [vmem:[%s6496_s5 + $0x1b8] sm:$0xff] }
 0x289   : > { %3744 = vmatprep.subr.bf16.mxu1 %v3717_v21  ;;  %v3615_v57 = vadd.f32 %v3614_v52, %v3498_v49  ;;  %v4324_v21 = vld [vmem:[%s6495_s4] ss:$0 sm:$0xff]  ;;  %v3542_v22 = vmul.f32 %v6172_v17, %v6172_v17  ;;  %v6192_v18 = vld [vmem:[%s6496_s5 + $0x1f8] sm:$0xff] }
 0x28a   : > { %v3550_v52 = vmul.f32 %v6192_v18, %v6192_v18 }
 0x28b   : > { %v3616_v1 = vadd.f32 %v3615_v57, %v3502_v54 }
 0x28c   : > { %3745 = vmatpush1.bf16.msra.mxu1 %v3716_v0  ;;  %v6183_v0 = vld [vmem:[%s6496_s5 + $0x1d8] sm:$0xff] }
 0x28d   : > { %3746 = vmatprep.subr.bf16.mxu1 %v3721_v25  ;;  %v3617_v5 = vadd.f32 %v3616_v1, %v3506_v43  ;;  %v3546_v46 = vmul.f32 %v6183_v0, %v6183_v0 }
 0x28f   : > { %v3618_v56 = vadd.f32 %v3617_v5, %v3510_v36 }
 0x290   : > { %3747 = vmatpush1.bf16.msra.mxu1 %v3720_v16 }
 0x291   : > { %v3619_v15 = vadd.f32 %v3618_v56, %v3514_v45 }
 0x293   : > { %v3620_v28 = vadd.f32 %v3619_v15, %v3518_v32  ;;  %v3676_v15 = vmul.f32 %v6039_v14, %v5910_v37  ;;  %v3688_v37 = vmul.f32 %v6039_v14, %v5952_v51  ;;  %v3695_v51 = vmul.f32 %v6049_v38, %v6017_v20 }
 0x295   : > { %v3621_v13 = vadd.f32 %v3620_v28, %v3522_v26  ;;  %v3680_v26 = vmul.f32 %v6039_v14, %v5924_v48  ;;  %v3675_v28 = vmul.f32 %v6049_v38, %v5947_v50  ;;  %v3683_v48 = vmul.f32 %v6049_v38, %v5975_v2 }
 0x296   : > { %v3687_v50 = vmul.f32 %v6049_v38, %v5989_v8  ;;  %v3700_v2 = vmul.f32 %v6039_v14, %v5994_v9  ;;  %v3704_v8 = vmul.f32 %v6039_v14, %v6008_v19 }
 0x297   : > { %v3622_v7 = vadd.f32 %v3621_v13, %v3526_v33  ;;  %v3679_v33 = vmul.f32 %v6049_v38, %v5961_v58 }
 0x298   : > { %v3737_v20 = vpack.c.bf16 %v3704_v8, %v3700_v2  ;;  %v3465_v2 = vld [vmem:[%s6496_s5 + $0x150] sm:$0xff] }
 0x299   : > { %v3623_v35 = vadd.f32 %v3622_v7, %v3530_v6  ;;  %v3725_v6 = vpack.c.bf16 %v3680_v26, %v3676_v15  ;;  %v3724_v7 = vpack.c.bf16 %v3679_v33, %v3675_v28  ;;  %v3529_v8 = vmul.f32 %v3465_v2, %v3465_v2 }
 0x29b   : > { %v3624_v55 = vadd.f32 %v3623_v35, %v3534_v4  ;;  %3748 = vmatprep.subr.bf16.mxu1 %v3725_v6  ;;  %v3684_v35 = vmul.f32 %v6039_v14, %v5938_v34  ;;  %v3691_v34 = vmul.f32 %v6049_v38, %v6003_v23  ;;  %v3703_v23 = vmul.f32 %v6049_v38, %v6033_v42  ;;  %v6340_v6 = vld [vmem:[%s6496_s5 + $0xd0] sm:$0xff] }
 0x29c   : > { %3749 = vmatpush1.bf16.msra.mxu1 %v3724_v7  ;;  %v3513_v7 = vmul.f32 %v6340_v6, %v6340_v6 }
 0x29d   : > { %v3625_v10 = vadd.f32 %v3624_v55, %v3538_v44  ;;  %v3729_v58 = vpack.c.bf16 %v3688_v37, %v3684_v35  ;;  %v3692_v44 = vmul.f32 %v6039_v14, %v5966_v63  ;;  %v3696_v55 = vmul.f32 %v6039_v14, %v5980_v3  ;;  %v3453_v35 = vld [vmem:[%s6496_s5 + $0xf0] sm:$0xff]  ;;  %v3899_v37 = vld [vmem:[%s333_s18] sm:$0xff]  ;;  %s3920_s18 = scalar_lea.sflag [#allocation3], %s6160_s21 }
 0x29e   : > { %v3732_v63 = vpack.c.bf16 %v3695_v51, %v3691_v34  ;;  %v3699_v3 = vmul.f32 %v6049_v38, %v6026_v39  ;;  %v3461_v34 = vld [vmem:[%s6496_s5 + $0x130] sm:$0xff] }
 0x29f   : > { %v3626_v25 = vadd.f32 %v3625_v10, %v3542_v22  ;;  %3750 = vmatprep.subr.bf16.mxu1 %v3729_v58  ;;  %v3733_v22 = vpack.c.bf16 %v3696_v55, %v3692_v44  ;;  %v5082_v10 = vmov 0   ;;  %v3457_v58 = vld [vmem:[%s6496_s5 + $0x110] sm:$0xff] }
 0x2a0   : > { %3772 = vmatprep.mubr.bf16.mxu1 %v5082_v10  ;;  %4824 = vset.pattern.permute.xlu0 %v5082_v10  ;;  %v3736_v9 = vpack.c.bf16 %v3703_v23, %v3699_v3  ;;  %v3521_v44 = vmul.f32 %v3457_v58, %v3457_v58 }
 0x2a1   : > { %v3627_v54 = vadd.f32 %v3626_v25, %v3546_v46 }
 0x2a3   : > { %v3628_v1 = vadd.f32 %v3627_v54, %v3550_v52 }
 0x2a5   : > { %v3629_v36 = vrot.slane %v3628_v1, 4 }
 0x2a7   : > { %v3630_v5 = vadd.f32 %v3629_v36, %v3628_v1 }
 0x2a9   : > { %v3631_v45 = vrot.slane %v3630_v5, 2 }
 0x2ab   : > { %v3632_v56 = vadd.f32 %v3631_v45, %v3630_v5 }
 0x2ad   : > { %v3633_v32 = vrot.slane %v3632_v56, 1 }
 0x2af   : > { %v3634_v13 = vadd.f32 %v3633_v32, %v3632_v56 }
 0x2b1   : > { %v3638_v4 = vadd.f32 1e-06, %v3634_v13 }
 0x2b3   : > { %4968 = vrsqrt.f32 %v3638_v4 }
 0x2bd   : > { %v4969_v19 = vpop.eup %4968 }
 0x2be   : > { %v3646_v14 = vmul.f32 %v4969_v19, %v6078_v60  ;;  %v6239_v42 = vmul.f32 %v4969_v19, %v6092_v47  ;;  %v6242_v38 = vmul.f32 %v4969_v19, %v6099_v53  ;;  %v6247_v25 = vmul.f32 %v4969_v19, %v6106_v59 }
 0x2bf   : > { %v6258_v47 = vmul.f32 %v4969_v19, %v6127_v11  ;;  %v6266_v59 = vmul.f32 %v4969_v19, %v6141_v29  ;;  %v6285_v52 = vmul.f32 %v4969_v19, %v6148_v40  ;;  %v6288_v54 = vmul.f32 %v4969_v19, %v6155_v41  ;;  %v6308_v41 = vld [vmem:[%s6496_s5 + $0x70] sm:$0xff] }
 0x2c0   : > { %v3715_v46 = vpack.c.bf16 %v6242_v38, %v6239_v42  ;;  %v6300_v5 = vmul.f32 %v4969_v19, %v6165_v12  ;;  %v6303_v40 = vmul.f32 %v4969_v19, %v6172_v17  ;;  %v3501_v56 = vmul.f32 %v6308_v41, %v6308_v41  ;;  %v6323_v17 = vld [vmem:[%s6496_s5 + $0x90] sm:$0xff] }
 0x2c1   : > { %v6315_v15 = vmul.f32 %v4969_v19, %v6183_v0  ;;  %v6318_v12 = vmul.f32 %v4969_v19, %v6192_v18  ;;  %v3505_v28 = vmul.f32 %v6323_v17, %v6323_v17  ;;  %v6332_v0 = vld [vmem:[%s6496_s5 + $0xb0] sm:$0xff] }
 0x2c2   : > { %v3735_v45 = vpack.c.bf16 %v6303_v40, %v6300_v5  ;;  %v3509_v18 = vmul.f32 %v6332_v0, %v6332_v0 }
 0x2c3   : > { %v3739_v26 = vpack.c.bf16 %v6318_v12, %v6315_v15 }
 0x320   : > { %v3410_v61 = vpop.f32.mrb[108].mxu1 }
 0x321   : > { %v6187_v16 = vadd.f32 %v4324_v21, %v3410_v61  ;;  %v4769_v62 = vpop.f32.mrb[109].mxu1  ;;  %v3728_v21 = vpack.c.bf16 %v3687_v50, %v3683_v48  ;;  %v3650_v61 = vmul.f32 %v4969_v19, %v6083_v27  ;;  %v6255_v27 = vmul.f32 %v4969_v19, %v6120_v30  ;;  %v6276_v30 = vld [vmem:[%s6496_s5 + $0x30] sm:$0xff] }
 0x322   : > { %v3413_v49 = vpop.f32.mrb[110].mxu1  ;;  %v6250_v62 = vmul.f32 %v4969_v19, %v6113_v31  ;;  %v6271_v31 = vld [vmem:[%s6496_s5 + $0x10] sm:$0xff]  ;;  %v3493_v29 = vmul.f32 %v6276_v30, %v6276_v30  ;;  %v3517_v48 = vmul.f32 %v3453_v35, %v3453_v35 }
 0x323   : > { %v4770_v57 = vpop.f32.mrb[111].mxu1  ;;  %v3417_v43 = vmul.f32 %v6187_v16, %v6187_v16  ;;  %3416 = vst [vmem:[%s6198_s20] sm:$0xff] %v6187_v16  ;;  %3751 = vmatpush1.bf16.msra.mxu1 %v3728_v21  ;;  %v3711_v39 = vpack.c.bf16 %v3650_v61, %v3646_v14  ;;  %v3723_v53 = vpack.c.bf16 %v6258_v47, %v6255_v27  ;;  %v3477_v14 = vld [vmem:[%s6496_s5 + $0x1b0] sm:$0xff] }
 0x324   : > { %3752 = vmatprep.subr.bf16.mxu1 %v3733_v22  ;;  %v3719_v60 = vpack.c.bf16 %v6250_v62, %v6247_v25  ;;  %v6263_v49 = vmul.f32 %v4969_v19, %v6134_v24  ;;  %v3489_v24 = vmul.f32 %v6271_v31, %v6271_v31  ;;  %v6293_v57 = vld [vmem:[%s6496_s5 + $0x50] sm:$0xff]  ;;  %v3525_v21 = vmul.f32 %v3461_v34, %v3461_v34 }
 0x325   : > { %3418 = vadd.xlane.f32.xlu0 %v3417_v43  ;;  %v3731_v43 = vpack.c.bf16 %v6288_v54, %v6285_v52  ;;  %v3497_v1 = vmul.f32 %v6293_v57, %v6293_v57  ;;  %v3541_v61 = vmul.f32 %v3477_v14, %v3477_v14 }
 0x326   : > { %v3727_v11 = vpack.c.bf16 %v6266_v59, %v6263_v49  ;;  %v3593_v36 = vadd.f32 %v3493_v29, %v3489_v24  ;;  %v3481_v24 = vld [vmem:[%s6496_s5 + $0x1d0] sm:$0xff] }
 0x327   : > { %3753 = vmatpush1.bf16.msra.mxu1 %v3732_v63  ;;  %v3469_v63 = vld [vmem:[%s6496_s5 + $0x170] sm:$0xff]  ;;  %v3545_v29 = vmul.f32 %v3481_v24, %v3481_v24 }
 0x328   : > { %3754 = vmatprep.subr.bf16.mxu1 %v3737_v20  ;;  %v3594_v32 = vadd.f32 %v3593_v36, %v3497_v1  ;;  %v3533_v3 = vmul.f32 %v3469_v63, %v3469_v63  ;;  %v3473_v20 = vld [vmem:[%s6496_s5 + $0x190] sm:$0xff] }
 0x329   : > { %v3485_v36 = vld [vmem:[%s6496_s5 + $0x1f0] sm:$0xff] }
 0x32a   : > { %v3595_v33 = vadd.f32 %v3594_v32, %v3501_v56  ;;  %v3549_v56 = vmul.f32 %v3485_v36, %v3485_v36 }
 0x32b   : > { %3755 = vmatpush1.bf16.msra.mxu1 %v3736_v9  ;;  %v3537_v9 = vmul.f32 %v3473_v20, %v3473_v20 }
 0x32c   : > { %3781 = vmatprep.subr.bf16.mxu1 %v3711_v39  ;;  %v3596_v13 = vadd.f32 %v3595_v33, %v3505_v28 }
 0x32e   : > { %v3597_v4 = vadd.f32 %v3596_v13, %v3509_v18 }
 0x330   : > { %v3598_v50 = vadd.f32 %v3597_v4, %v3513_v7 }
 0x332   : > { %v3599_v55 = vadd.f32 %v3598_v50, %v3517_v48 }
 0x334   : > { %v3600_v51 = vadd.f32 %v3599_v55, %v3521_v44 }
 0x336   : > { %v3601_v22 = vadd.f32 %v3600_v51, %v3525_v21 }
 0x338   : > { %v3602_v23 = vadd.f32 %v3601_v22, %v3529_v8 }
 0x33a   : > { %v3603_v19 = vadd.f32 %v3602_v23, %v3533_v3 }
 0x33b   : > { %3901 = vperm.xlu0 %4824, %v3899_v37  }
 0x33c   : > { %v3604_v39 = vadd.f32 %v3603_v19, %v3537_v9 }
 0x33e   : > { %v3605_v1 = vadd.f32 %v3604_v39, %v3541_v61 }
 0x340   : > { %v3606_v32 = vadd.f32 %v3605_v1, %v3545_v29 }
 0x342   : > { %v3607_v28 = vadd.f32 %v3606_v32, %v3549_v56 }
 0x344   : > { %v3608_v33 = vrot.slane %v3607_v28, 4 }
 0x346   : > { %v3609_v18 = vadd.f32 %v3608_v33, %v3607_v28 }
 0x348   : > { %v3610_v13 = vrot.slane %v3609_v18, 2 }
 0x34a   : > { %v3611_v7 = vadd.f32 %v3610_v13, %v3609_v18 }
 0x34c   : > { %v3612_v4 = vrot.slane %v3611_v7, 1 }
 0x34e   : > { %v3613_v37 = vadd.f32 %v3612_v4, %v3611_v7 }
 0x350   : > { %v3637_v48 = vadd.f32 1e-06, %v3613_v37 }
 0x352   : > { %4970 = vrsqrt.f32 %v3637_v48 }
 0x35c   : > { %v4971_v55 = vpop.eup %4970 }
 0x35d   : > { %v3645_v21 = vmul.f32 %v4971_v55, %v6271_v31  ;;  %v3649_v51 = vmul.f32 %v4971_v55, %v6276_v30  ;;  %v3653_v23 = vmul.f32 %v4971_v55, %v6293_v57  ;;  %v3657_v9 = vmul.f32 %v4971_v55, %v6308_v41 }
 0x35e   : > { %v3661_v39 = vmul.f32 %v4971_v55, %v6323_v17  ;;  %v3665_v29 = vmul.f32 %v4971_v55, %v6332_v0  ;;  %v3669_v31 = vmul.f32 %v4971_v55, %v6340_v6  ;;  %v3673_v30 = vmul.f32 %v4971_v55, %v3453_v35 }
 0x35f   : > { %v3710_v3 = vpack.c.bf16 %v3649_v51, %v3645_v21  ;;  %v3714_v61 = vpack.c.bf16 %v3657_v9, %v3653_v23  ;;  %v3677_v41 = vmul.f32 %v4971_v55, %v3457_v58  ;;  %v3681_v17 = vmul.f32 %v4971_v55, %v3461_v34 }
 0x360   : > { %v3722_v57 = vpack.c.bf16 %v3673_v30, %v3669_v31  ;;  %v3685_v42 = vmul.f32 %v4971_v55, %v3465_v2  ;;  %v3689_v38 = vmul.f32 %v4971_v55, %v3469_v63  ;;  %v3693_v25 = vmul.f32 %v4971_v55, %v3473_v20 }
 0x361   : > { %v3697_v62 = vmul.f32 %v4971_v55, %v3477_v14  ;;  %v3701_v27 = vmul.f32 %v4971_v55, %v3481_v24  ;;  %v3705_v47 = vmul.f32 %v4971_v55, %v3485_v36 }
 0x3b2   : > { %v3419_v50 = vpop.xlane.xlu0 %3418 }
 0x3b3   : > { %v3420_v44 = vadd.f32 1e-06, %v3419_v50 }
 0x3b5   : > { %4972 = vrsqrt.f32 %v3420_v44 }
 0x3bf   : > { %v4973_v8 = vpop.eup %4972 }
 0x3c0   : > { %v3422_v22 = vmul.f32 %v4973_v8, %v6187_v16  ;;  %v3718_v16 = vpack.c.bf16 %v3665_v29, %v3661_v39 }
 0x3c2   : > { %v3707_v19 = vpack.c.bf16 %v3422_v22, %v3422_v22 }
 0x3c4   : > { %3773 = vmatmul.mubr.bf16.vlgmr.msra.gmra.mrb[112].mxu1 %v3707_v19 }
 0x3c5   : > { %3782 = vmatpush1.bf16.msra.mxu1 %v3710_v3  ;;  %3813 = vmatprep.mubr.bf16.mxu1 %v5082_v10  ;;  %v3726_v10 = vpack.c.bf16 %v3681_v17, %v3677_v41 }
 0x3c6   : > { %3783 = vmatprep.subr.bf16.mxu1 %v3715_v46  ;;  %v3730_v46 = vpack.c.bf16 %v3689_v38, %v3685_v42 }
 0x3c9   : > { %3784 = vmatpush1.bf16.msra.mxu1 %v3714_v61 }
 0x3ca   : > { %3785 = vmatprep.subr.bf16.mxu1 %v3719_v60  ;;  %v3734_v60 = vpack.c.bf16 %v3697_v62, %v3693_v25 }
 0x3cd   : > { %3786 = vmatpush1.bf16.msra.mxu1 %v3718_v16 }
 0x3ce   : > { %3787 = vmatprep.subr.bf16.mxu1 %v3723_v53  ;;  %v3738_v53 = vpack.c.bf16 %v3705_v47, %v3701_v27 }
 0x3d1   : > { %3788 = vmatpush1.bf16.msra.mxu1 %v3722_v57 }
 0x3d2   : > { %3789 = vmatprep.subr.bf16.mxu1 %v3727_v11 }
 0x3d5   : > { %3790 = vmatpush1.bf16.msra.mxu1 %v3726_v10 }
 0x3d6   : > { %3791 = vmatprep.subr.bf16.mxu1 %v3731_v43 }
 0x3d9   : > { %3792 = vmatpush1.bf16.msra.mxu1 %v3730_v46 }
 0x3da   : > { %3793 = vmatprep.subr.bf16.mxu1 %v3735_v45 }
 0x3dd   : > { %3794 = vmatpush1.bf16.msra.mxu1 %v3734_v60 }
 0x3de   : > { %3795 = vmatprep.subr.bf16.mxu1 %v3739_v26 }
 0x3e1   : > { %3796 = vmatpush1.bf16.msra.mxu1 %v3738_v53 }
 0x3e4   : > { %3814 = vmatmul.mubr.bf16.vlgmr.msra.gmra.mrb[116].mxu1 %v3707_v19 }
 0x3e5   : > { %4997 = shalt.err (!%p4994_p4)
}
 0x3e6   : > { %s4998_s20 = scalar_lea.hbm %s6410_s17, 128  ;;  %s5002_s12 = scalar_lea.hbm %s6498_s7, 256 }
 0x3e7   : > { %p4999_p7 = scmp.ne.s32.totalorder %s6410_s17, %s4998_s20  ;;  %p5003_p10 = scmp.lt.u32.totalorder %s6410_s17, %s6498_s7 }
 0x3e8   : > { %p5004_p11 = scmp.lt.u32.totalorder %s5002_s12, %s4998_s20  ;;  %p5006_p13 = scmp.lt.u32.totalorder %s4998_s20, %s6410_s17 }
 0x3e9   : > { %p5000_p8 = pnand %p4999_p7, %p5168_p5 }
 0x3ea   : > { %p5005_p12 = por %p5004_p11, %p5003_p10 }
 0x3eb   : > { %p5001_p9 = pneg %p5000_p8 }
 0x3ec   : > { %p5007_p0 = por %p5006_p13, %p5005_p12 }
 0x3ee   : > { %p5008_p1 = pnand %p5007_p0, %p5001_p9 }
 0x3f0   : > { %5011 = shalt.err (!%p5008_p1)
}
 0x3f1   : > { %4777 = dma.vmem_to_hbm [thread:$0]  (%p5168_p5), %s3939_s26, 128, %s6410_s17, %s3920_s18   ;;  %v3894_v0 = vlaneseq  ;;  %v6430_v1 = vpop.permute.xlu0 %3901 }
 0x3f2   : > { %s4060_s26 = sshll.u32 %s6160_s21, 5  ;;  %s4348_s18 = sshll.u32 %s5151_s9, 9 }
 0x3f3   : > { %v3895_v35 = vand.u32 127, %v3894_v0  ;;  %s6435_s17 = scalar_lea.vmem [#allocation4], %s4060_s26  ;;  %s6446_s20 = scalar_lea.hbm %s6499_s8, %s4348_s18 }
 0x3f4   : > { %s3952_s19 = sshll.u32 %s6435_s17, 4  ;;  %s3925_s25 = scalar_lea.sflag [#allocation5], %s6160_s21  ;;  %s6448_s19 = int_to_ptr.vmem [resolvable:$true] %s3952_s19 }
 0x3f5   : > { %v3896_v24 = vadd.s32 128, %v3895_v35  ;;  %vm3903_vm13 = vcmp.eq.s32.totalorder %v3895_v35, %v6430_v1  ;;  %v3897_v42 = vadd.s32 256, %v3895_v35  ;;  %v3898_v60 = vadd.s32 384, %v3895_v35  ;;  %s5012_s9 = scalar_lea.vmem %s6448_s19, 512  ;;  %s5084_s10 = smov [#allocation4]  }
 0x3f6   : > { %p5013_p2 = scmp.ne.s32.totalorder %s6448_s19, %s5012_s9  ;;  %s5016_s12 = sshll.u32 %s5084_s10, 4  ;;  %s5017_s12 = int_to_ptr.vmem [resolvable:$false] %s5016_s12 }
 0x3f7   : > { %vm3904_vm15 = vcmp.eq.s32.totalorder %v3896_v24, %v6430_v1  ;;  %vm3905_vm5 = vcmp.eq.s32.totalorder %v3897_v42, %v6430_v1  ;;  %vm3906_vm6 = vcmp.eq.s32.totalorder %v3898_v60, %v6430_v1  ;;  %s5018_s13 = scalar_lea.vmem %s5017_s12, 1024  ;;  %p5019_p7 = scmp.lt.s32.totalorder %s6448_s19, %s5017_s12 }
 0x3f8   : > { %p5014_p3 = pnand %p5013_p2, %p5168_p5  ;;  %p5020_p8 = scmp.lt.s32.totalorder %s5018_s13, %s5012_s9 }
 0x3fa   : > { %p5015_p4 = pneg %p5014_p3  ;;  %p5021_p9 = por %p5020_p8, %p5019_p7 }
 0x3fc   : > { %p5022_p10 = pnand %p5021_p9, %p5015_p4 }
 0x497   : > { %v3774_v49 = vpop.f32.mrb[112].mxu1 }
 0x498   : > { %v4333_v59 = vclamps-f32 %v3774_v49, 0.999999  ;;  %v3776_v11 = vpop.f32.mrb[113].mxu1 }
 0x499   : > { %v4334_v52 = vclamps-f32 %v3776_v11, 0.999999  ;;  %v3778_v54 = vpop.f32.mrb[114].mxu1 }
 0x49a   : > { %v3830_v43 = vmul.f32 %v4333_v59, %v4333_v59  ;;  %v3779_v5 = vpop.f32.mrb[115].mxu1  ;;  %v3870_v32 = vmul.f32 0.87758255, %v4333_v59  ;;  %v4337_v4 = vadd.f32 -0.23971277, %v4333_v59 }
 0x49b   : > { %v3831_v40 = vmul.f32 %v4334_v52, %v4334_v52  ;;  %v3871_v18 = vmul.f32 0.87758255, %v4334_v52  ;;  %vm3882_vm14 = vcmp.gt.f32.partialorder %v4333_v59, -0.87758255  ;;  %v4338_v48 = vadd.f32 -0.23971277, %v4334_v52 }
 0x49c   : > { %v3834_v45 = vsub.f32 1.0, %v3830_v43  ;;  %vm3883_vm0 = vcmp.gt.f32.partialorder %v4334_v52, -0.87758255 }
 0x49d   : > { %v3835_v15 = vsub.f32 1.0, %v3831_v40 }
 0x49e   : > { %v3838_v12 = vmax.f32 %v3834_v45, 1e-12 }
 0x49f   : > { %v3839_v26 = vmax.f32 %v3835_v15, 1e-12 }
 0x4a0   : > { %4974 = vrsqrt.f32 %v3838_v12  ;;  %vm3844_vm9 = vcmp.eq.f32.partialorder %v3838_v12, inf  ;;  %v3847_v2 = vand.u32 2147483648, %v3838_v12  ;;  %vm3846_vm10 = vcmp.eq.f32.partialorder %v3838_v12, 0.0 }
 0x4a1   : > { %4976 = vrsqrt.f32 %v3839_v26  ;;  %vm3851_vm11 = vcmp.eq.f32.partialorder %v3839_v26, inf  ;;  %v3854_v14 = vand.u32 2147483648, %v3839_v26  ;;  %vm3853_vm12 = vcmp.eq.f32.partialorder %v3839_v26, 0.0 }
 0x4aa   : > { %v4975_v6 = vpop.eup %4974 }
 0x4ab   : > { %v4977_v58 = vpop.eup %4976  ;;  %v3843_v34 = vmul.f32 %v4975_v6, %v3838_v12 }
 0x4ac   : > { %v3850_v63 = vmul.f32 %v4977_v58, %v3839_v26 }
 0x4ad   : > { %v3845_v20 = vsel %vm3844_vm9, %v3838_v12, %v3843_v34 }
 0x4ae   : > { %v3848_v36 = vsel %vm3846_vm10, %v3847_v2, %v3845_v20  ;;  %v3852_v56 = vsel %vm3851_vm11, %v3839_v26, %v3850_v63 }
 0x4af   : > { %v3855_v28 = vsel %vm3853_vm12, %v3854_v14, %v3852_v56  ;;  %v3874_v33 = vmul.f32 0.47942555, %v3848_v36 }
 0x4b0   : > { %v3875_v13 = vmul.f32 0.47942555, %v3855_v28 }
 0x4b1   : > { %v3878_v7 = vsub.f32 %v3870_v32, %v3874_v33 }
 0x4b2   : > { %v3879_v37 = vsub.f32 %v3871_v18, %v3875_v13 }
 0x4b3   : > { %v3890_v50 = vsel %vm3882_vm14, %v3878_v7, %v4337_v4 }
 0x4b4   : > { %v3891_v44 = vsel %vm3883_vm0, %v3879_v37, %v4338_v48  ;;  %v3907_v55 = vsel %vm3903_vm13, %v3890_v50, %v4333_v59 }
 0x4b5   : > { %v3908_v21 = vsel %vm3904_vm15, %v3891_v44, %v4334_v52  ;;  %v3911_v51 = vmul.f32 32.0, %v3907_v55 }
 0x4b6   : > { %v3912_v8 = vmul.f32 32.0, %v3908_v21 }
 0x4b7   : > { %v3815_v22 = vpop.f32.mrb[116].mxu1  ;;  %3915 = vst [vmem:[%s6435_s17] sm:$0xff] %v3911_v51 }
 0x4b8   : > { %v4335_v3 = vclamps-f32 %v3815_v22, 0.999999  ;;  %v3817_v23 = vpop.f32.mrb[117].mxu1  ;;  %3916 = vst [vmem:[%s6435_s17 + $0x8] sm:$0xff] %v3912_v8 }
 0x4b9   : > { %v4336_v9 = vclamps-f32 %v3817_v23, 0.999999  ;;  %v3819_v19 = vpop.f32.mrb[118].mxu1 }
 0x4ba   : > { %v3832_v61 = vmul.f32 %v4335_v3, %v4335_v3  ;;  %v3820_v16 = vpop.f32.mrb[119].mxu1  ;;  %v3872_v53 = vmul.f32 0.87758255, %v4335_v3  ;;  %v4339_v43 = vadd.f32 -0.23971277, %v4335_v3 }
 0x4bb   : > { %v3833_v39 = vmul.f32 %v4336_v9, %v4336_v9  ;;  %v3873_v11 = vmul.f32 0.87758255, %v4336_v9  ;;  %vm3884_vm7 = vcmp.gt.f32.partialorder %v4335_v3, -0.87758255  ;;  %v4340_v40 = vadd.f32 -0.23971277, %v4336_v9 }
 0x4bc   : > { %v3836_v29 = vsub.f32 1.0, %v3832_v61  ;;  %vm3885_vm8 = vcmp.gt.f32.partialorder %v4336_v9, -0.87758255 }
 0x4bd   : > { %v3837_v31 = vsub.f32 1.0, %v3833_v39 }
 0x4be   : > { %v3840_v30 = vmax.f32 %v3836_v29, 1e-12 }
 0x4bf   : > { %v3841_v57 = vmax.f32 %v3837_v31, 1e-12 }
 0x4c0   : > { %4978 = vrsqrt.f32 %v3840_v30  ;;  %vm3858_vm1 = vcmp.eq.f32.partialorder %v3840_v30, inf  ;;  %v3861_v38 = vand.u32 2147483648, %v3840_v30  ;;  %vm3860_vm2 = vcmp.eq.f32.partialorder %v3840_v30, 0.0 }
 0x4c1   : > { %4980 = vrsqrt.f32 %v3841_v57  ;;  %vm3865_vm3 = vcmp.eq.f32.partialorder %v3841_v57, inf  ;;  %v3868_v62 = vand.u32 2147483648, %v3841_v57  ;;  %vm3867_vm4 = vcmp.eq.f32.partialorder %v3841_v57, 0.0 }
 0x4ca   : > { %v4979_v41 = vpop.eup %4978 }
 0x4cb   : > { %v4981_v17 = vpop.eup %4980  ;;  %v3857_v10 = vmul.f32 %v4979_v41, %v3840_v30 }
 0x4cc   : > { %v3864_v46 = vmul.f32 %v4981_v17, %v3841_v57 }
 0x4cd   : > { %v3859_v25 = vsel %vm3858_vm1, %v3840_v30, %v3857_v10 }
 0x4ce   : > { %v3862_v27 = vsel %vm3860_vm2, %v3861_v38, %v3859_v25  ;;  %v3866_v47 = vsel %vm3865_vm3, %v3841_v57, %v3864_v46 }
 0x4cf   : > { %v3876_v49 = vmul.f32 0.47942555, %v3862_v27  ;;  %v3869_v59 = vsel %vm3867_vm4, %v3868_v62, %v3866_v47 }
 0x4d0   : > { %v3877_v52 = vmul.f32 0.47942555, %v3869_v59 }
 0x4d1   : > { %v3880_v54 = vsub.f32 %v3872_v53, %v3876_v49 }
 0x4d2   : > { %v3881_v5 = vsub.f32 %v3873_v11, %v3877_v52 }
 0x4d3   : > { %v3892_v45 = vsel %vm3884_vm7, %v3880_v54, %v4339_v43 }
 0x4d4   : > { %v3909_v15 = vsel %vm3905_vm5, %v3892_v45, %v4335_v3  ;;  %v3893_v12 = vsel %vm3885_vm8, %v3881_v5, %v4340_v40 }
 0x4d5   : > { %v3913_v26 = vmul.f32 32.0, %v3909_v15  ;;  %v3910_v0 = vsel %vm3906_vm6, %v3893_v12, %v4336_v9 }
 0x4d6   : > { %v3914_v6 = vmul.f32 32.0, %v3910_v0 }
 0x4d7   : > { %3917 = vst [vmem:[%s6435_s17 + $0x10] sm:$0xff] %v3913_v26 }
 0x4d8   : > { %3918 = vst [vmem:[%s6435_s17 + $0x18] sm:$0xff] %v3914_v6 }
 0x4d9   : > { %5025 = shalt.err (!%p5022_p10)
}
 0x4da   : > { %s5026_s21 = scalar_lea.hbm %s6446_s20, 512  ;;  %s5030_s17 = scalar_lea.hbm %s6499_s8, 1024 }
 0x4db   : > { %p5027_p11 = scmp.ne.s32.totalorder %s6446_s20, %s5026_s21  ;;  %p5031_p0 = scmp.lt.u32.totalorder %s6446_s20, %s6499_s8 }
 0x4dc   : > { %p5032_p1 = scmp.lt.u32.totalorder %s5030_s17, %s5026_s21  ;;  %p5034_p3 = scmp.lt.u32.totalorder %s5026_s21, %s6446_s20 }
 0x4dd   : > { %p5028_p12 = pnand %p5027_p11, %p5168_p5 }
 0x4de   : > { %p5033_p2 = por %p5032_p1, %p5031_p0 }
 0x4df   : > { %p5029_p13 = pneg %p5028_p12 }
 0x4e0   : > { %p5035_p4 = por %p5034_p3, %p5033_p2 }
 0x4e2   : > { %p5036_p7 = pnand %p5035_p4, %p5029_p13 }
 0x4e4   : > { %5039 = shalt.err (!%p5036_p7)
}
 0x4e5   : > { %4778 = dma.vmem_to_hbm [thread:$0]  (%p5168_p5), %s6448_s19, 512, %s6446_s20, %s3925_s25  }
 0x4e6 PF: > { %p4788_p8 = scmp.ge.s32.totalorder %s5078_s30, 2  ;;  %s3964_s24 = sand.u32 1, %s5066_s27  }
 0x4e7   : > { %s3965_s9 = scalar_lea.sflag [#allocation3], %s3964_s24 }
 0x4e8   : > { %p4782_p9 = pnand %p4788_p8, %p5172_p6 }
 0x4ea   : > { %5057 = dma.done.wait (!%p4782_p9), %s3965_s9, 128  }
 0x4eb   : > { %5059 = vsyncadd (!%p4782_p9), %s3965_s9, 4294967168  ;;  %s3974_s10 = scalar_lea.sflag [#allocation5], %s3964_s24 }
 0x4ec   : > { %5061 = dma.done.wait (!%p4782_p9), %s3974_s10, 512  }
 0x4ed   : > { %5063 = vsyncadd (!%p4782_p9), %s3974_s10, 4294966784  ;;  %p22_p5 = scmp.ge.s32.totalorder %s5155_s11, 4   ;;  %s6502_s27 = smov %s5070_s28 }
 0x4ee   : > { %s6503_s28 = smov %s5074_s29  ;;  %s6504_s29 = smov %s5166_s14 }
 0x4ef   : > { %s6505_s30 = smov %s5155_s11  ;;  %24 = sbr.rel (!%p22_p5) target bundleno = 5 (0x5), region = 103 }
 0x4f6   :  { %3979 = vsyncpa [#allocation3], 1 }
 0x4f7   :  { %3981 = vsyncpa [#allocation3 + $0x1], 1 }
 0x4f8   :  { %3982 = vsyncpa [#allocation5], 1 }
 0x4f9   :  { %3984 = vsyncpa [#allocation5 + $0x1], 1 }

</bundles_post_ra>
